<compile_context>
chip_gen: v5e
topology: v5e:2x2
jax: 0.10.0
libtpu: 0.0.40
codegen_flags: <defaults>
</compile_context>

<pallas_src>
import functools

import jax
import jax.numpy as jnp
from jax import lax
from jax.experimental import pallas as pl
from jax.experimental.pallas import tpu as pltpu


# ----------------------------------------------------------------------------
# Fused bottleneck kernel
# ----------------------------------------------------------------------------
def _bottleneck_kernel(x_ref, w1_ref, s1_ref, b1_ref, w2_ref, s2_ref, b2_ref,
                       w3_ref, s3_ref, b3_ref, o_ref, feat_ref,
                       *, H, W, Cin, P, Cout, TILE_H):
    """Grid = (N, H // TILE_H).

    x_ref    : (H+2, W+2, Cin) f32   spatially zero-padded input image
                                     (VMEM-resident across the row-tile axis)
    w1_ref   : (Cin, P)      bf16    1x1 conv1 weight
    w2_ref   : (9, P, P)     bf16    3x3 conv2 weight, taps flattened (ky,kx)
    w3_ref   : (P, Cout)     bf16    1x1 conv3 weight
    s*/b*    : (1, C)        f32     folded BatchNorm scale / bias
    o_ref    : (TILE_H, W, Cout) f32 output row tile
    feat_ref : (H+2, W+2, P) f32     scratch: zero-padded conv1 feature map
    """
    i = pl.program_id(1)

    # ---- stage 1 (once per image): conv1 + bn1 + relu over the whole padded
    #      image; border pixels are masked back to zero so the 3x3 conv below
    #      sees proper zero padding. ----
    @pl.when(i == 0)
    def _():
        xp = x_ref[...].reshape((H + 2) * (W + 2), Cin).astype(jnp.bfloat16)
        f = jnp.dot(xp, w1_ref[...], preferred_element_type=jnp.float32)
        f = jnp.maximum(f * s1_ref[...] + b1_ref[...], 0.0)
        f = f.reshape(H + 2, W + 2, P)
        row = lax.broadcasted_iota(jnp.int32, (H + 2, W + 2, P), 0)
        col = lax.broadcasted_iota(jnp.int32, (H + 2, W + 2, P), 1)
        interior = (row >= 1) & (row <= H) & (col >= 1) & (col <= W)
        feat_ref[...] = jnp.where(interior, f, 0.0)

    # ---- stage 2: 3x3 conv + bn2 + relu on this row tile (halo rows come
    #      straight from the padded feature scratch). ----
    r0 = pl.multiple_of(i * TILE_H, TILE_H)
    win = feat_ref[pl.ds(r0, TILE_H + 2), :, :]            # (TILE_H+2, W+2, P)
    acc = jnp.zeros((TILE_H * W, P), jnp.float32)
    for t in range(9):                                     # 9 MXU taps, f32 acc
        ky, kx = divmod(t, 3)
        tap = win[ky:ky + TILE_H, kx:kx + W, :].reshape(TILE_H * W, P)
        acc = acc + jnp.dot(tap.astype(jnp.bfloat16), w2_ref[t],
                            preferred_element_type=jnp.float32)
    attn = jnp.maximum(acc * s2_ref[...] + b2_ref[...], 0.0)

    # ---- stage 3: 1x1 conv + bn3 + residual add + relu ----
    y = jnp.dot(attn.astype(jnp.bfloat16), w3_ref[...],
                preferred_element_type=jnp.float32)
    xwin = x_ref[pl.ds(r0 + 1, TILE_H), :, :]              # (TILE_H, W+2, Cin)
    res = xwin[:, 1:W + 1, :].reshape(TILE_H * W, Cin)     # f32 residual
    y = y * s3_ref[...] + b3_ref[...] + res
    o_ref[...] = jnp.maximum(y, 0.0).reshape(TILE_H, W, Cout)


# ----------------------------------------------------------------------------
# Wrapper
# ----------------------------------------------------------------------------
def fold_bn(gamma, beta, mean, var, eps=1e-5):
    scale = gamma / jnp.sqrt(var + eps)
    bias = beta - mean * scale
    return scale[None, :].astype(jnp.float32), bias[None, :].astype(jnp.float32)


def bottleneck_forward(x_nchw, p, tile_h=8):
    """stride=1, downsample=None (inplanes == planes*4), use_cross=False."""
    N, Cin, H, W = x_nchw.shape
    planes = p["w1"].shape[1]
    Cout = planes * 4
    if Cin != Cout:
        # TODO(synk): stride>1 / downsample branch not implemented.
        raise NotImplementedError("identity residual requires inplanes == planes*4")
    TILE_H = tile_h if H % tile_h == 0 else H

    # NCHW -> NHWC plus a one-time spatial zero pad at the module boundary
    # (in a full NHWC pipeline both would disappear).
    x = jnp.transpose(x_nchw, (0, 2, 3, 1)).astype(jnp.float32)
    x_pad = jnp.pad(x, ((0, 0), (1, 1), (1, 1), (0, 0)))

    # Folded BN params (f32) and bf16 MXU weights.
    s1, b1 = fold_bn(p["g1"], p["b1"], p["m1"], p["v1"])
    s2, b2 = fold_bn(p["g2"], p["b2"], p["m2"], p["v2"])
    s3, b3 = fold_bn(p["g3"], p["b3"], p["m3"], p["v3"])
    w1 = p["w1"].astype(jnp.bfloat16)                                # (Cin, P)
    w2 = p["w2"].reshape(9, planes, planes).astype(jnp.bfloat16)     # (9, P, P)
    w3 = p["w3"].astype(jnp.bfloat16)                                # (P, Cout)

    kernel = functools.partial(_bottleneck_kernel, H=H, W=W, Cin=Cin,
                               P=planes, Cout=Cout, TILE_H=TILE_H)

    const2 = lambda n, i: (0, 0)            # resident weights / BN params
    out = pl.pallas_call(
        kernel,
        out_shape=jax.ShapeDtypeStruct((N, H, W, Cout), jnp.float32),
        grid_spec=pltpu.PrefetchScalarGridSpec(
            num_scalar_prefetch=0,
            grid=(N, H // TILE_H),
            in_specs=[
                # Padded image: fetched once per image, resident across row tiles.
                pl.BlockSpec((None, H + 2, W + 2, Cin), lambda n, i: (n, 0, 0, 0)),
                pl.BlockSpec((Cin, planes), const2),
                pl.BlockSpec((1, planes), const2),
                pl.BlockSpec((1, planes), const2),
                pl.BlockSpec((9, planes, planes), lambda n, i: (0, 0, 0)),
                pl.BlockSpec((1, planes), const2),
                pl.BlockSpec((1, planes), const2),
                pl.BlockSpec((planes, Cout), const2),
                pl.BlockSpec((1, Cout), const2),
                pl.BlockSpec((1, Cout), const2),
            ],
            out_specs=pl.BlockSpec((None, TILE_H, W, Cout),
                                   lambda n, i: (n, i, 0, 0)),
            scratch_shapes=[
                pltpu.VMEM((H + 2, W + 2, planes), jnp.float32),  # conv1 feature map
            ],
        ),
        compiler_params=pltpu.CompilerParams(
            dimension_semantics=("parallel", "arbitrary"),
            vmem_limit_bytes=32 * 1024 * 1024,
        ),
    )(x_pad, w1, s1, b1, w2, s2, b2, w3, s3, b3)

    return jnp.transpose(out, (0, 3, 1, 2))                # NHWC -> NCHW


# ----------------------------------------------------------------------------
# Pure-JAX reference (mirrors the kernel's precision: bf16 matmul operands,
# f32 accumulation/epilogue, f32 residual)
# ----------------------------------------------------------------------------
def bottleneck_ref(x_nchw, p):
    bf = lambda a: a.astype(jnp.bfloat16).astype(jnp.float32)
    x = jnp.transpose(x_nchw, (0, 2, 3, 1))
    dn = ("NHWC", "HWIO", "NHWC")
    hi = lax.Precision.HIGHEST

    def bn(y, g, b, m, v, eps=1e-5):
        return g * (y - m) / jnp.sqrt(v + eps) + b

    planes = p["w1"].shape[1]
    out = lax.conv_general_dilated(bf(x), bf(p["w1"]).reshape(1, 1, -1, planes),
                                   (1, 1), "VALID", dimension_numbers=dn,
                                   precision=hi)
    out = jnp.maximum(bn(out, p["g1"], p["b1"], p["m1"], p["v1"]), 0.0)
    out = lax.conv_general_dilated(bf(out), bf(p["w2"]), (1, 1),
                                   ((1, 1), (1, 1)), dimension_numbers=dn,
                                   precision=hi)
    out = jnp.maximum(bn(out, p["g2"], p["b2"], p["m2"], p["v2"]), 0.0)
    out = lax.conv_general_dilated(bf(out), bf(p["w3"]).reshape(1, 1, planes, -1),
                                   (1, 1), "VALID", dimension_numbers=dn,
                                   precision=hi)
    out = bn(out, p["g3"], p["b3"], p["m3"], p["v3"])
    out = jnp.maximum(out + x, 0.0)
    return jnp.transpose(out, (0, 3, 1, 2))


# ----------------------------------------------------------------------------
# main
# ----------------------------------------------------------------------------
if __name__ == "__main__":
    # planes=64 -> Cout=256 (lane-dense, multiple of 128), inplanes=256 so the
    # identity residual applies (no downsample), like ResNet50 layer1.
    N, planes, H, W = 2, 64, 16, 16
    inplanes = planes * 4

    key = jax.random.PRNGKey(0)
    ks = jax.random.split(key, 8)

    def bn_params(k, c):
        k1, k2, k3, k4 = jax.random.split(k, 4)
        return (1.0 + 0.1 * jax.random.normal(k1, (c,), jnp.float32),    # gamma
                0.1 * jax.random.normal(k2, (c,), jnp.float32),          # beta
                0.1 * jax.random.normal(k3, (c,), jnp.float32),          # running_mean
                0.5 + jnp.abs(jax.random.normal(k4, (c,), jnp.float32))) # running_var

    g1, b1, m1, v1 = bn_params(ks[0], planes)
    g2, b2, m2, v2 = bn_params(ks[1], planes)
    g3, b3, m3, v3 = bn_params(ks[2], planes * 4)

    params = {
        "w1": 0.1 * jax.random.normal(ks[3], (inplanes, planes), jnp.float32),
        "w2": 0.1 * jax.random.normal(ks[4], (3, 3, planes, planes), jnp.float32),
        "w3": 0.1 * jax.random.normal(ks[5], (planes, planes * 4), jnp.float32),
        "g1": g1, "b1": b1, "m1": m1, "v1": v1,
        "g2": g2, "b2": b2, "m2": m2, "v2": v2,
        "g3": g3, "b3": b3, "m3": m3, "v3": v3,
    }

    x = jax.random.normal(ks[6], (N, inplanes, H, W), jnp.float32)

    fwd = jax.jit(bottleneck_forward)
    out = jax.block_until_ready(fwd(x, params))
    ref = jax.block_until_ready(bottleneck_ref(x, params))

    assert out.shape == (N, inplanes, H, W), out.shape
    max_err = float(jnp.max(jnp.abs(out - ref)))
    assert jnp.allclose(out, ref, atol=5e-3, rtol=5e-3), max_err

    print("KERNEL_OK")
</pallas_src>

<mosaic_0001>
module attributes {stable_mosaic.version = 11 : i64} {
  func.func @_bottleneck_kernel(%arg0: i32, %arg1: i32, %arg2: memref<1x18x18x256xf32, #tpu.memory_space<vmem>>, %arg3: memref<256x64xbf16, #tpu.memory_space<vmem>>, %arg4: memref<1x64xf32, #tpu.memory_space<vmem>>, %arg5: memref<1x64xf32, #tpu.memory_space<vmem>>, %arg6: memref<9x64x64xbf16, #tpu.memory_space<vmem>>, %arg7: memref<1x64xf32, #tpu.memory_space<vmem>>, %arg8: memref<1x64xf32, #tpu.memory_space<vmem>>, %arg9: memref<64x256xbf16, #tpu.memory_space<vmem>>, %arg10: memref<1x256xf32, #tpu.memory_space<vmem>>, %arg11: memref<1x256xf32, #tpu.memory_space<vmem>>, %arg12: memref<1x8x16x256xf32, #tpu.memory_space<vmem>>, %arg13: memref<18x18x64xf32, #tpu.memory_space<vmem>>) attributes {dimension_semantics = [#tpu.dimension_semantics<parallel>, #tpu.dimension_semantics<arbitrary>], iteration_bounds = array<i64: 2, 2>, scalar_prefetch = 0 : i64, scratch_operands = 1 : i64, tpu.core_type = #tpu.core_type<tc>, window_params = [{transform_indices = @transform_0, window_bounds = array<i64: 1, 18, 18, 256>}, {pipeline_mode = #tpu.pipeline_mode<synchronous>, transform_indices = @transform_1, window_bounds = array<i64: 256, 64>}, {pipeline_mode = #tpu.pipeline_mode<synchronous>, transform_indices = @transform_2, window_bounds = array<i64: 1, 64>}, {pipeline_mode = #tpu.pipeline_mode<synchronous>, transform_indices = @transform_3, window_bounds = array<i64: 1, 64>}, {pipeline_mode = #tpu.pipeline_mode<synchronous>, transform_indices = @transform_4, window_bounds = array<i64: 9, 64, 64>}, {pipeline_mode = #tpu.pipeline_mode<synchronous>, transform_indices = @transform_5, window_bounds = array<i64: 1, 64>}, {pipeline_mode = #tpu.pipeline_mode<synchronous>, transform_indices = @transform_6, window_bounds = array<i64: 1, 64>}, {pipeline_mode = #tpu.pipeline_mode<synchronous>, transform_indices = @transform_7, window_bounds = array<i64: 64, 256>}, {pipeline_mode = #tpu.pipeline_mode<synchronous>, transform_indices = @transform_8, window_bounds = array<i64: 1, 256>}, {pipeline_mode = #tpu.pipeline_mode<synchronous>, transform_indices = @transform_9, window_bounds = array<i64: 1, 256>}, {transform_indices = @transform_10, window_bounds = array<i64: 1, 8, 16, 256>}]} {
    %c0_i32 = arith.constant 0 : i32
    %0 = arith.cmpi eq, %arg1, %c0_i32 : i32
    %1 = arith.extui %0 : i1 to i32
    %c0_i32_0 = arith.constant 0 : i32
    %2 = arith.cmpi ne, %1, %c0_i32_0 : i32
    scf.if %2 {
      %c0_50 = arith.constant 0 : index
      %c0_51 = arith.constant 0 : index
      %c0_52 = arith.constant 0 : index
      %c0_53 = arith.constant 0 : index
      %101 = vector.load %arg2[%c0_50, %c0_51, %c0_52, %c0_53] : memref<1x18x18x256xf32, #tpu.memory_space<vmem>>, vector<1x18x18x256xf32>
      %102 = vector.shape_cast %101 : vector<1x18x18x256xf32> to vector<18x18x256xf32>
      %103 = vector.shape_cast %102 : vector<18x18x256xf32> to vector<324x256xf32>
      %104 = arith.truncf %103 : vector<324x256xf32> to vector<324x256xbf16>
      %c0_54 = arith.constant 0 : index
      %c0_55 = arith.constant 0 : index
      %105 = vector.load %arg3[%c0_54, %c0_55] : memref<256x64xbf16, #tpu.memory_space<vmem>>, vector<256x64xbf16>
      %cst_56 = arith.constant dense<0.000000e+00> : vector<324x64xf32>
      %106 = tpu.matmul %104, %105, %cst_56 {dimension_numbers = #tpu.dot_dimension_numbers<[1], [0], [0], [1], [0, 0, 1, 1], [], []>} : vector<324x256xbf16>, vector<256x64xbf16>, vector<324x64xf32> -> vector<324x64xf32>
      %c0_57 = arith.constant 0 : index
      %c0_58 = arith.constant 0 : index
      %107 = vector.load %arg4[%c0_57, %c0_58] : memref<1x64xf32, #tpu.memory_space<vmem>>, vector<1x64xf32>
      %108 = vector.broadcast %107 : vector<1x64xf32> to vector<324x64xf32>
      %109 = arith.mulf %106, %108 : vector<324x64xf32>
      %c0_59 = arith.constant 0 : index
      %c0_60 = arith.constant 0 : index
      %110 = vector.load %arg5[%c0_59, %c0_60] : memref<1x64xf32, #tpu.memory_space<vmem>>, vector<1x64xf32>
      %111 = vector.broadcast %110 : vector<1x64xf32> to vector<324x64xf32>
      %112 = arith.addf %109, %111 : vector<324x64xf32>
      %cst_61 = arith.constant 0.000000e+00 : f32
      %113 = vector.broadcast %cst_61 : f32 to vector<324x64xf32>
      %114 = arith.maximumf %112, %113 : vector<324x64xf32>
      %115 = vector.shape_cast %114 : vector<324x64xf32> to vector<18x18x64xf32>
      %116 = tpu.iota {dimensions = array<i32: 0>} : vector<18x18x64xi32>
      %117 = tpu.iota {dimensions = array<i32: 1>} : vector<18x18x64xi32>
      %c1_i32_62 = arith.constant 1 : i32
      %118 = vector.broadcast %c1_i32_62 : i32 to vector<18x18x64xi32>
      %119 = arith.cmpi sge, %116, %118 : vector<18x18x64xi32>
      %c16_i32 = arith.constant 16 : i32
      %120 = vector.broadcast %c16_i32 : i32 to vector<18x18x64xi32>
      %121 = arith.cmpi sle, %116, %120 : vector<18x18x64xi32>
      %122 = arith.andi %119, %121 : vector<18x18x64xi1>
      %c1_i32_63 = arith.constant 1 : i32
      %123 = vector.broadcast %c1_i32_63 : i32 to vector<18x18x64xi32>
      %124 = arith.cmpi sge, %117, %123 : vector<18x18x64xi32>
      %125 = arith.andi %122, %124 : vector<18x18x64xi1>
      %c16_i32_64 = arith.constant 16 : i32
      %126 = vector.broadcast %c16_i32_64 : i32 to vector<18x18x64xi32>
      %127 = arith.cmpi sle, %117, %126 : vector<18x18x64xi32>
      %128 = arith.andi %125, %127 : vector<18x18x64xi1>
      %cst_65 = arith.constant 0.000000e+00 : f32
      %129 = vector.broadcast %cst_65 : f32 to vector<18x18x64xf32>
      %130 = arith.select %128, %115, %129 : vector<18x18x64xi1>, vector<18x18x64xf32>
      %c0_66 = arith.constant 0 : index
      %c0_67 = arith.constant 0 : index
      %c0_68 = arith.constant 0 : index
      %131 = vector.load %arg13[%c0_66, %c0_67, %c0_68] : memref<18x18x64xf32, #tpu.memory_space<vmem>>, vector<18x18x64xf32>
      tpu.vector_store %arg13[%c0_66, %c0_67, %c0_68], %130 {strides = array<i32>} : memref<18x18x64xf32, #tpu.memory_space<vmem>>, vector<18x18x64xf32>,
    } else {
    }
    %c8_i32 = arith.constant 8 : i32
    %3 = arith.muli %arg1, %c8_i32 : i32
    %4 = tpu.assume_multiple %3, 8 : i32
    %5 = arith.index_cast %4 : i32 to index
    %c0 = arith.constant 0 : index
    %c0_1 = arith.constant 0 : index
    %6 = vector.load %arg13[%5, %c0, %c0_1] : memref<18x18x64xf32, #tpu.memory_space<vmem>>, vector<10x18x64xf32>
    %cst = arith.constant 0.000000e+00 : f32
    %7 = vector.broadcast %cst : f32 to vector<128x64xf32>
    %8 = vector.extract_strided_slice %6 {offsets = [0, 0, 0], sizes = [8, 16, 64], strides = [1, 1, 1]} : vector<10x18x64xf32> to vector<8x16x64xf32>
    %9 = vector.shape_cast %8 : vector<8x16x64xf32> to vector<128x64xf32>
    %10 = arith.truncf %9 : vector<128x64xf32> to vector<128x64xbf16>
    %c0_2 = arith.constant 0 : index
    %c0_3 = arith.constant 0 : index
    %c0_4 = arith.constant 0 : index
    %11 = vector.load %arg6[%c0_2, %c0_3, %c0_4] : memref<9x64x64xbf16, #tpu.memory_space<vmem>>, vector<1x64x64xbf16>
    %12 = vector.shape_cast %11 : vector<1x64x64xbf16> to vector<64x64xbf16>
    %cst_5 = arith.constant dense<0.000000e+00> : vector<128x64xf32>
    %13 = tpu.matmul %10, %12, %cst_5 {dimension_numbers = #tpu.dot_dimension_numbers<[1], [0], [0], [1], [0, 0, 1, 1], [], []>} : vector<128x64xbf16>, vector<64x64xbf16>, vector<128x64xf32> -> vector<128x64xf32>
    %14 = arith.addf %7, %13 : vector<128x64xf32>
    %15 = vector.extract_strided_slice %6 {offsets = [0, 1, 0], sizes = [8, 16, 64], strides = [1, 1, 1]} : vector<10x18x64xf32> to vector<8x16x64xf32>
    %16 = vector.shape_cast %15 : vector<8x16x64xf32> to vector<128x64xf32>
    %17 = arith.truncf %16 : vector<128x64xf32> to vector<128x64xbf16>
    %c1 = arith.constant 1 : index
    %c0_6 = arith.constant 0 : index
    %c0_7 = arith.constant 0 : index
    %18 = vector.load %arg6[%c1, %c0_6, %c0_7] : memref<9x64x64xbf16, #tpu.memory_space<vmem>>, vector<1x64x64xbf16>
    %19 = vector.shape_cast %18 : vector<1x64x64xbf16> to vector<64x64xbf16>
    %cst_8 = arith.constant dense<0.000000e+00> : vector<128x64xf32>
    %20 = tpu.matmul %17, %19, %cst_8 {dimension_numbers = #tpu.dot_dimension_numbers<[1], [0], [0], [1], [0, 0, 1, 1], [], []>} : vector<128x64xbf16>, vector<64x64xbf16>, vector<128x64xf32> -> vector<128x64xf32>
    %21 = arith.addf %14, %20 : vector<128x64xf32>
    %22 = vector.extract_strided_slice %6 {offsets = [0, 2, 0], sizes = [8, 16, 64], strides = [1, 1, 1]} : vector<10x18x64xf32> to vector<8x16x64xf32>
    %23 = vector.shape_cast %22 : vector<8x16x64xf32> to vector<128x64xf32>
    %24 = arith.truncf %23 : vector<128x64xf32> to vector<128x64xbf16>
    %c2 = arith.constant 2 : index
    %c0_9 = arith.constant 0 : index
    %c0_10 = arith.constant 0 : index
    %25 = vector.load %arg6[%c2, %c0_9, %c0_10] : memref<9x64x64xbf16, #tpu.memory_space<vmem>>, vector<1x64x64xbf16>
    %26 = vector.shape_cast %25 : vector<1x64x64xbf16> to vector<64x64xbf16>
    %cst_11 = arith.constant dense<0.000000e+00> : vector<128x64xf32>
    %27 = tpu.matmul %24, %26, %cst_11 {dimension_numbers = #tpu.dot_dimension_numbers<[1], [0], [0], [1], [0, 0, 1, 1], [], []>} : vector<128x64xbf16>, vector<64x64xbf16>, vector<128x64xf32> -> vector<128x64xf32>
    %28 = arith.addf %21, %27 : vector<128x64xf32>
    %29 = vector.extract_strided_slice %6 {offsets = [1, 0, 0], sizes = [8, 16, 64], strides = [1, 1, 1]} : vector<10x18x64xf32> to vector<8x16x64xf32>
    %30 = vector.shape_cast %29 : vector<8x16x64xf32> to vector<128x64xf32>
    %31 = arith.truncf %30 : vector<128x64xf32> to vector<128x64xbf16>
    %c3 = arith.constant 3 : index
    %c0_12 = arith.constant 0 : index
    %c0_13 = arith.constant 0 : index
    %32 = vector.load %arg6[%c3, %c0_12, %c0_13] : memref<9x64x64xbf16, #tpu.memory_space<vmem>>, vector<1x64x64xbf16>
    %33 = vector.shape_cast %32 : vector<1x64x64xbf16> to vector<64x64xbf16>
    %cst_14 = arith.constant dense<0.000000e+00> : vector<128x64xf32>
    %34 = tpu.matmul %31, %33, %cst_14 {dimension_numbers = #tpu.dot_dimension_numbers<[1], [0], [0], [1], [0, 0, 1, 1], [], []>} : vector<128x64xbf16>, vector<64x64xbf16>, vector<128x64xf32> -> vector<128x64xf32>
    %35 = arith.addf %28, %34 : vector<128x64xf32>
    %36 = vector.extract_strided_slice %6 {offsets = [1, 1, 0], sizes = [8, 16, 64], strides = [1, 1, 1]} : vector<10x18x64xf32> to vector<8x16x64xf32>
    %37 = vector.shape_cast %36 : vector<8x16x64xf32> to vector<128x64xf32>
    %38 = arith.truncf %37 : vector<128x64xf32> to vector<128x64xbf16>
    %c4 = arith.constant 4 : index
    %c0_15 = arith.constant 0 : index
    %c0_16 = arith.constant 0 : index
    %39 = vector.load %arg6[%c4, %c0_15, %c0_16] : memref<9x64x64xbf16, #tpu.memory_space<vmem>>, vector<1x64x64xbf16>
    %40 = vector.shape_cast %39 : vector<1x64x64xbf16> to vector<64x64xbf16>
    %cst_17 = arith.constant dense<0.000000e+00> : vector<128x64xf32>
    %41 = tpu.matmul %38, %40, %cst_17 {dimension_numbers = #tpu.dot_dimension_numbers<[1], [0], [0], [1], [0, 0, 1, 1], [], []>} : vector<128x64xbf16>, vector<64x64xbf16>, vector<128x64xf32> -> vector<128x64xf32>
    %42 = arith.addf %35, %41 : vector<128x64xf32>
    %43 = vector.extract_strided_slice %6 {offsets = [1, 2, 0], sizes = [8, 16, 64], strides = [1, 1, 1]} : vector<10x18x64xf32> to vector<8x16x64xf32>
    %44 = vector.shape_cast %43 : vector<8x16x64xf32> to vector<128x64xf32>
    %45 = arith.truncf %44 : vector<128x64xf32> to vector<128x64xbf16>
    %c5 = arith.constant 5 : index
    %c0_18 = arith.constant 0 : index
    %c0_19 = arith.constant 0 : index
    %46 = vector.load %arg6[%c5, %c0_18, %c0_19] : memref<9x64x64xbf16, #tpu.memory_space<vmem>>, vector<1x64x64xbf16>
    %47 = vector.shape_cast %46 : vector<1x64x64xbf16> to vector<64x64xbf16>
    %cst_20 = arith.constant dense<0.000000e+00> : vector<128x64xf32>
    %48 = tpu.matmul %45, %47, %cst_20 {dimension_numbers = #tpu.dot_dimension_numbers<[1], [0], [0], [1], [0, 0, 1, 1], [], []>} : vector<128x64xbf16>, vector<64x64xbf16>, vector<128x64xf32> -> vector<128x64xf32>
    %49 = arith.addf %42, %48 : vector<128x64xf32>
    %50 = vector.extract_strided_slice %6 {offsets = [2, 0, 0], sizes = [8, 16, 64], strides = [1, 1, 1]} : vector<10x18x64xf32> to vector<8x16x64xf32>
    %51 = vector.shape_cast %50 : vector<8x16x64xf32> to vector<128x64xf32>
    %52 = arith.truncf %51 : vector<128x64xf32> to vector<128x64xbf16>
    %c6 = arith.constant 6 : index
    %c0_21 = arith.constant 0 : index
    %c0_22 = arith.constant 0 : index
    %53 = vector.load %arg6[%c6, %c0_21, %c0_22] : memref<9x64x64xbf16, #tpu.memory_space<vmem>>, vector<1x64x64xbf16>
    %54 = vector.shape_cast %53 : vector<1x64x64xbf16> to vector<64x64xbf16>
    %cst_23 = arith.constant dense<0.000000e+00> : vector<128x64xf32>
    %55 = tpu.matmul %52, %54, %cst_23 {dimension_numbers = #tpu.dot_dimension_numbers<[1], [0], [0], [1], [0, 0, 1, 1], [], []>} : vector<128x64xbf16>, vector<64x64xbf16>, vector<128x64xf32> -> vector<128x64xf32>
    %56 = arith.addf %49, %55 : vector<128x64xf32>
    %57 = vector.extract_strided_slice %6 {offsets = [2, 1, 0], sizes = [8, 16, 64], strides = [1, 1, 1]} : vector<10x18x64xf32> to vector<8x16x64xf32>
    %58 = vector.shape_cast %57 : vector<8x16x64xf32> to vector<128x64xf32>
    %59 = arith.truncf %58 : vector<128x64xf32> to vector<128x64xbf16>
    %c7 = arith.constant 7 : index
    %c0_24 = arith.constant 0 : index
    %c0_25 = arith.constant 0 : index
    %60 = vector.load %arg6[%c7, %c0_24, %c0_25] : memref<9x64x64xbf16, #tpu.memory_space<vmem>>, vector<1x64x64xbf16>
    %61 = vector.shape_cast %60 : vector<1x64x64xbf16> to vector<64x64xbf16>
    %cst_26 = arith.constant dense<0.000000e+00> : vector<128x64xf32>
    %62 = tpu.matmul %59, %61, %cst_26 {dimension_numbers = #tpu.dot_dimension_numbers<[1], [0], [0], [1], [0, 0, 1, 1], [], []>} : vector<128x64xbf16>, vector<64x64xbf16>, vector<128x64xf32> -> vector<128x64xf32>
    %63 = arith.addf %56, %62 : vector<128x64xf32>
    %64 = vector.extract_strided_slice %6 {offsets = [2, 2, 0], sizes = [8, 16, 64], strides = [1, 1, 1]} : vector<10x18x64xf32> to vector<8x16x64xf32>
    %65 = vector.shape_cast %64 : vector<8x16x64xf32> to vector<128x64xf32>
    %66 = arith.truncf %65 : vector<128x64xf32> to vector<128x64xbf16>
    %c8 = arith.constant 8 : index
    %c0_27 = arith.constant 0 : index
    %c0_28 = arith.constant 0 : index
    %67 = vector.load %arg6[%c8, %c0_27, %c0_28] : memref<9x64x64xbf16, #tpu.memory_space<vmem>>, vector<1x64x64xbf16>
    %68 = vector.shape_cast %67 : vector<1x64x64xbf16> to vector<64x64xbf16>
    %cst_29 = arith.constant dense<0.000000e+00> : vector<128x64xf32>
    %69 = tpu.matmul %66, %68, %cst_29 {dimension_numbers = #tpu.dot_dimension_numbers<[1], [0], [0], [1], [0, 0, 1, 1], [], []>} : vector<128x64xbf16>, vector<64x64xbf16>, vector<128x64xf32> -> vector<128x64xf32>
    %70 = arith.addf %63, %69 : vector<128x64xf32>
    %c0_30 = arith.constant 0 : index
    %c0_31 = arith.constant 0 : index
    %71 = vector.load %arg7[%c0_30, %c0_31] : memref<1x64xf32, #tpu.memory_space<vmem>>, vector<1x64xf32>
    %72 = vector.broadcast %71 : vector<1x64xf32> to vector<128x64xf32>
    %73 = arith.mulf %70, %72 : vector<128x64xf32>
    %c0_32 = arith.constant 0 : index
    %c0_33 = arith.constant 0 : index
    %74 = vector.load %arg8[%c0_32, %c0_33] : memref<1x64xf32, #tpu.memory_space<vmem>>, vector<1x64xf32>
    %75 = vector.broadcast %74 : vector<1x64xf32> to vector<128x64xf32>
    %76 = arith.addf %73, %75 : vector<128x64xf32>
    %cst_34 = arith.constant 0.000000e+00 : f32
    %77 = vector.broadcast %cst_34 : f32 to vector<128x64xf32>
    %78 = arith.maximumf %76, %77 : vector<128x64xf32>
    %79 = arith.truncf %78 : vector<128x64xf32> to vector<128x64xbf16>
    %c0_35 = arith.constant 0 : index
    %c0_36 = arith.constant 0 : index
    %80 = vector.load %arg9[%c0_35, %c0_36] : memref<64x256xbf16, #tpu.memory_space<vmem>>, vector<64x256xbf16>
    %cst_37 = arith.constant dense<0.000000e+00> : vector<128x256xf32>
    %81 = tpu.matmul %79, %80, %cst_37 {dimension_numbers = #tpu.dot_dimension_numbers<[1], [0], [0], [1], [0, 0, 1, 1], [], []>} : vector<128x64xbf16>, vector<64x256xbf16>, vector<128x256xf32> -> vector<128x256xf32>
    %c1_i32 = arith.constant 1 : i32
    %82 = arith.addi %4, %c1_i32 : i32
    %c0_38 = arith.constant 0 : index
    %83 = arith.index_cast %82 : i32 to index
    %c0_39 = arith.constant 0 : index
    %c0_40 = arith.constant 0 : index
    %84 = vector.load %arg2[%c0_38, %83, %c0_39, %c0_40] : memref<1x18x18x256xf32, #tpu.memory_space<vmem>>, vector<1x8x18x256xf32>
    %85 = vector.shape_cast %84 : vector<1x8x18x256xf32> to vector<8x18x256xf32>
    %86 = vector.extract_strided_slice %85 {offsets = [0, 1, 0], sizes = [8, 16, 256], strides = [1, 1, 1]} : vector<8x18x256xf32> to vector<8x16x256xf32>
    %87 = vector.shape_cast %86 : vector<8x16x256xf32> to vector<128x256xf32>
    %c0_41 = arith.constant 0 : index
    %c0_42 = arith.constant 0 : index
    %88 = vector.load %arg10[%c0_41, %c0_42] : memref<1x256xf32, #tpu.memory_space<vmem>>, vector<1x256xf32>
    %89 = vector.broadcast %88 : vector<1x256xf32> to vector<128x256xf32>
    %90 = arith.mulf %81, %89 : vector<128x256xf32>
    %c0_43 = arith.constant 0 : index
    %c0_44 = arith.constant 0 : index
    %91 = vector.load %arg11[%c0_43, %c0_44] : memref<1x256xf32, #tpu.memory_space<vmem>>, vector<1x256xf32>
    %92 = vector.broadcast %91 : vector<1x256xf32> to vector<128x256xf32>
    %93 = arith.addf %90, %92 : vector<128x256xf32>
    %94 = arith.addf %93, %87 : vector<128x256xf32>
    %cst_45 = arith.constant 0.000000e+00 : f32
    %95 = vector.broadcast %cst_45 : f32 to vector<128x256xf32>
    %96 = arith.maximumf %94, %95 : vector<128x256xf32>
    %97 = vector.shape_cast %96 : vector<128x256xf32> to vector<8x16x256xf32>
    %c0_46 = arith.constant 0 : index
    %c0_47 = arith.constant 0 : index
    %c0_48 = arith.constant 0 : index
    %c0_49 = arith.constant 0 : index
    %98 = vector.load %arg12[%c0_46, %c0_47, %c0_48, %c0_49] : memref<1x8x16x256xf32, #tpu.memory_space<vmem>>, vector<1x8x16x256xf32>
    %99 = vector.shape_cast %98 : vector<1x8x16x256xf32> to vector<8x16x256xf32>
    %100 = vector.shape_cast %97 : vector<8x16x256xf32> to vector<1x8x16x256xf32>
    tpu.vector_store %arg12[%c0_46, %c0_47, %c0_48, %c0_49], %100 {strides = array<i32>} : memref<1x8x16x256xf32, #tpu.memory_space<vmem>>, vector<1x8x16x256xf32>,
    return
  }
  func.func @transform_0(%arg0: i32, %arg1: i32) -> (i32, i32, i32, i32) {
    %c0_i32 = arith.constant 0 : i32
    %c0_i32_0 = arith.constant 0 : i32
    %c0_i32_1 = arith.constant 0 : i32
    %c0_i32_2 = arith.constant 0 : i32
    return %arg0, %c0_i32, %c0_i32_0, %c0_i32_1 : i32, i32, i32, i32
  }
  func.func @transform_1(%arg0: i32, %arg1: i32) -> (i32, i32) {
    %c0_i32 = arith.constant 0 : i32
    %c0_i32_0 = arith.constant 0 : i32
    %c0_i32_1 = arith.constant 0 : i32
    return %c0_i32, %c0_i32_0 : i32, i32
  }
  func.func @transform_2(%arg0: i32, %arg1: i32) -> (i32, i32) {
    %c0_i32 = arith.constant 0 : i32
    %c0_i32_0 = arith.constant 0 : i32
    %c0_i32_1 = arith.constant 0 : i32
    return %c0_i32, %c0_i32_0 : i32, i32
  }
  func.func @transform_3(%arg0: i32, %arg1: i32) -> (i32, i32) {
    %c0_i32 = arith.constant 0 : i32
    %c0_i32_0 = arith.constant 0 : i32
    %c0_i32_1 = arith.constant 0 : i32
    return %c0_i32, %c0_i32_0 : i32, i32
  }
  func.func @transform_4(%arg0: i32, %arg1: i32) -> (i32, i32, i32) {
    %c0_i32 = arith.constant 0 : i32
    %c0_i32_0 = arith.constant 0 : i32
    %c0_i32_1 = arith.constant 0 : i32
    %c0_i32_2 = arith.constant 0 : i32
    return %c0_i32, %c0_i32_0, %c0_i32_1 : i32, i32, i32
  }
  func.func @transform_5(%arg0: i32, %arg1: i32) -> (i32, i32) {
    %c0_i32 = arith.constant 0 : i32
    %c0_i32_0 = arith.constant 0 : i32
    %c0_i32_1 = arith.constant 0 : i32
    return %c0_i32, %c0_i32_0 : i32, i32
  }
  func.func @transform_6(%arg0: i32, %arg1: i32) -> (i32, i32) {
    %c0_i32 = arith.constant 0 : i32
    %c0_i32_0 = arith.constant 0 : i32
    %c0_i32_1 = arith.constant 0 : i32
    return %c0_i32, %c0_i32_0 : i32, i32
  }
  func.func @transform_7(%arg0: i32, %arg1: i32) -> (i32, i32) {
    %c0_i32 = arith.constant 0 : i32
    %c0_i32_0 = arith.constant 0 : i32
    %c0_i32_1 = arith.constant 0 : i32
    return %c0_i32, %c0_i32_0 : i32, i32
  }
  func.func @transform_8(%arg0: i32, %arg1: i32) -> (i32, i32) {
    %c0_i32 = arith.constant 0 : i32
    %c0_i32_0 = arith.constant 0 : i32
    %c0_i32_1 = arith.constant 0 : i32
    return %c0_i32, %c0_i32_0 : i32, i32
  }
  func.func @transform_9(%arg0: i32, %arg1: i32) -> (i32, i32) {
    %c0_i32 = arith.constant 0 : i32
    %c0_i32_0 = arith.constant 0 : i32
    %c0_i32_1 = arith.constant 0 : i32
    return %c0_i32, %c0_i32_0 : i32, i32
  }
  func.func @transform_10(%arg0: i32, %arg1: i32) -> (i32, i32, i32, i32) {
    %c0_i32 = arith.constant 0 : i32
    %c0_i32_0 = arith.constant 0 : i32
    %c0_i32_1 = arith.constant 0 : i32
    return %arg0, %arg1, %c0_i32, %c0_i32_0 : i32, i32, i32, i32
  }
}

</mosaic_0001>

<bundles_post_ra>
// kernel: bottleneck_forward.1
= control target key start
LH: loop header
LB: loop body
LE: loop exit
PB: predicated region body
PF: predicated region fallthrough
CT: control target
= control target key end

     0   :  { %s6863_s0 = inlined_call_operand.vmem [shape: f32[2,18,18,256], index: 0, kind: input, shape index: {}]   ;;  %s6864_s1 = inlined_call_operand.vmem [shape: bf16[256,64], index: 1, kind: input, shape index: {}]   ;;  %s6865_s2 = inlined_call_operand.vmem [shape: f32[1,64], index: 2, kind: input, shape index: {}]   ;;  %s6866_s3 = inlined_call_operand.vmem [shape: f32[1,64], index: 3, kind: input, shape index: {}]   ;;  %s6867_s4 = inlined_call_operand.vmem [shape: bf16[9,64,64], index: 4, kind: input, shape index: {}]   ;;  %s6868_s5 = inlined_call_operand.vmem [shape: f32[1,64], index: 5, kind: input, shape index: {}]   ;;  %s6869_s6 = inlined_call_operand.vmem [shape: f32[1,64], index: 6, kind: input, shape index: {}]   ;;  %s6870_s7 = inlined_call_operand.vmem [shape: bf16[64,256], index: 7, kind: input, shape index: {}]   ;;  %s6871_s8 = inlined_call_operand.vmem [shape: f32[1,256], index: 8, kind: input, shape index: {}]   ;;  %s6872_s9 = inlined_call_operand.vmem [shape: f32[1,256], index: 9, kind: input, shape index: {}]   ;;  %s6873_s10 = inlined_call_operand.hbm [shape: f32[2,16,16,256], index: 10, kind: output, shape index: {}]  }
   0x1   :  { %6879 = sst [smem:[#allocation10_spill]] %s6863_s0 }
   0x2   :  { %6880 = sst [smem:[#allocation11_spill]] %s6864_s1 }
   0x3   :  { %15 = vsyncpa [#allocation4], 0 }
   0x4   :  { %17 = vsyncpa [#allocation4 + $0x1], 0  ;;  %s5030_s13 = smov 0   ;;  %s5032_s14 = smov 0  }
   0x5   :  { %s5034_s15 = smov 0   ;;  %s5036_s16 = smov 0  }
   0x6   :  { %s5038_s17 = smov 0   ;;  %s5040_s18 = smov 0  }
   0x7   :  { %s5042_s19 = smov 0   ;;  %s5044_s20 = smov 0  }
   0x8 LB: > { %6881 = sst [smem:[#allocation6_spill]] %s4962_s18  ;;  %s4247_s21 = sadd.s32 4294967295, %s4970_s20   ;;  %s4970_s20 = sphi %s5044_s20, %s23_s20   ;;  %s4966_s19 = sphi %s5042_s19, %s6898_s19   ;;  %s4962_s18 = sphi %s5040_s18, %s6892_s18   ;;  %s4958_s17 = sphi %s5038_s17, %s6897_s17   ;;  %s4954_s16 = sphi %s5036_s16, %s6891_s16   ;;  %s4950_s15 = sphi %s5034_s15, %s6896_s15   ;;  %s4946_s14 = sphi %s5032_s14, %s6895_s14   ;;  %s4942_s13 = sphi %s5030_s13, %s6894_s13  }
   0x9   : > { %s4248_s22 = sadd.s32 4294967294, %s4970_s20   ;;  %s32_s23 = sadd.s32 1, %s4962_s18 }
   0xa   : > { %p33_p0 = scmp.ge.s32.totalorder %s32_s23, 2  ;;  %s35_s24 = sadd.s32 1, %s4966_s19 }
   0xb   : > { %p269_p1 = scmp.ne.s32.totalorder %s4950_s15, %s4946_s14  ;;  %p270_p2 = scmp.eq.s32.totalorder %s4247_s21, 3 }
   0xc   : > { %s6900_s23 = smov (%p33_p0, %s32_s23), 0  ;;  %s6902_s24 = smov (!%p33_p0, %s35_s24), %s4966_s19 }
   0xd   : > { %6882 = sst [smem:[#allocation7_spill]] %s6900_s23  ;;  %s255_s25 = ssub.s32 %s4962_s18, %s6900_s23 }
   0xe   : > { %p5081_p3 = por %p270_p2, %p269_p1  ;;  %p37_p4 = scmp.ge.s32.totalorder %s6902_s24, 2 }
   0xf   : > { %p275_p5 = scmp.ne.s32.totalorder %s4946_s14, %s4942_s13  ;;  %p276_p6 = scmp.eq.s32.totalorder %s4248_s22, 3 }
  0x10   : > { %p4251_p7 = scmp.ge.s32.totalorder %s4970_s20, 1  ;;  %s6904_s24 = smov (%p37_p4, %s6902_s24), 0 }
  0x11   : > { %6884 = sst [smem:[#allocation8_spill]] %s6904_s24  ;;  %p5090_p8 = por %p276_p6, %p275_p5 }
  0x12   : > { %p329_p9 = scmp.lt.s32.totalorder %s4970_s20, 5  ;;  %s254_s28 = ssub.s32 %s4966_s19, %s6904_s24 }
  0x13   : > { %s6885_s27 = scalar_select %p5090_p8, 1, 0 }
  0x14   : > { %s259_s29 = sadd.s32 1, %s4950_s15  ;;  %s256_s30 = sor.u32 %s255_s25, %s254_s28 }
  0x15   : > { %6886 = sst [smem:[#allocation9_spill]] %s6885_s27  ;;  %p330_p10 = pnand %p4251_p7, %p329_p9 }
  0x16   : > { %p257_p11 = scmp.eq.s32.totalorder %s256_s30, 0  ;;  %s6878_s12 = sand.u32 (!%p330_p10), 1, %s4946_s14  }
  0x17   : > { %333 = sbr.rel (%p330_p10) target bundleno = 1222 (0x4c6), region = 60  ;;  %p367_p12 = scmp.lt.s32.totalorder (!%p330_p10), %s4958_s17, 1 }
  0x18   : > { %s5099_s11 = scalar_select %p257_p11, %s4950_s15, %s259_s29  }
  0x19   : > { %s4252_s21 = sshll.u32 (!%p330_p10), %s6878_s12, 8  ;;  %s6887_s0 = sld [smem:[#allocation10_spill]] (!%p330_p10) }
  0x1a   : > { %s5111_s25 = scalar_lea.vmem (!%p330_p10), [#allocation3], %s4252_s21  ;;  %p4254_p13 = scmp.ne.s32.totalorder (!%p330_p10), %s4954_s16, 0 }
  0x1c   : > { %s368_s22 = scalar_select %p367_p12, %s4958_s17, 1 }
  0x1d   : > { %377 = sbr.rel (%p4254_p13) target bundleno = 566 (0x236), region = 64  ;;  %s6888_s1 = sld [smem:[#allocation11_spill]] (!%p4254_p13) }
  0x1e   : > { %s4795_s23 = smul.u32 864, %s368_s22 }
  0x20   : > { %s5109_s24 = scalar_lea.vmem %s6887_s0, %s4795_s23 }
  0x22   : > { %v378_v4 = vld [vmem:[%s5109_s24] sm:$0xff]  ;;  %v379_v5 = vld [vmem:[%s5109_s24 + $0x8] sm:$0xff]  ;;  %vm648_vm0 = vcmask 1041408   ;;  %vm650_vm1 = vcmask 1043458   ;;  %vm653_vm2 = vcmask 1045508   ;;  %vm656_vm3 = vcmask 1045504  }
  0x23   : > { %v4713_v0 = vld [vmem:[%s6888_s1 + $0x38] sm:$0xff]  ;;  %v4712_v2 = vld [vmem:[%s6888_s1 + $0x30] sm:$0xff]  ;;  %v4711_v6 = vld [vmem:[%s6888_s1 + $0x28] sm:$0xff]  ;;  %v594_v9 = vrot.slane %v379_v5, 6  ;;  %vm2297_vm4 = vcmask 523264   ;;  %vm2300_vm7 = vcmask 517120  }
  0x24   : > { %v4721_v1 = vld [vmem:[%s6888_s1 + $0x78] sm:$0xff]  ;;  %1425 = vmatpush.bf16.msra.mxu0 %v4713_v0  ;;  %v4720_v3 = vld [vmem:[%s6888_s1 + $0x70] sm:$0xff]  ;;  %4767 = vmatpush.bf16.msra.mxu2 %v4713_v0  ;;  %v4719_v7 = vld [vmem:[%s6888_s1 + $0x68] sm:$0xff] }
  0x25   : > { %1538 = vmatpush.bf16.msra.mxu1 %v4721_v1  ;;  %4775 = vmatpush.bf16.msra.mxu3 %v4721_v1  ;;  %v381_v8 = vld [vmem:[%s5109_s24 + $0x18] sm:$0xff]  ;;  %v380_v10 = vld [vmem:[%s5109_s24 + $0x10] sm:$0xff]  ;;  %v649_v12 = vsel %vm648_vm0, %v378_v4, %v594_v9  ;;  %v651_v13 = vsel %vm650_vm1, %v378_v4, %v594_v9  ;;  %v654_v14 = vsel %vm653_vm2, %v378_v4, %v594_v9  ;;  %v4710_v21 = vld [vmem:[%s6888_s1 + $0x20] sm:$0xff] }
  0x26   : > { %v595_v11 = vrot.slane %v381_v8, 6  ;;  %v657_v15 = vsel %vm656_vm3, %v594_v9, %v378_v4  ;;  %v652_v16 = vrot.slane %v651_v13, 2  ;;  %v655_v17 = vrot.slane %v654_v14, 4  ;;  %922 = vst [vmem:[#allocation1] ss:$4 sm:$0xff] %v649_v12  ;;  %v385_v20 = vld [vmem:[%s5109_s24 + $0x38] sm:$0xff] }
  0x27   : > { %v658_v18 = vrot.slane %v657_v15, 6  ;;  %v4718_v22 = vld [vmem:[%s6888_s1 + $0x60] sm:$0xff]  ;;  %v383_v28 = vld [vmem:[%s5109_s24 + $0x28] sm:$0x3]  ;;  %v597_v30 = vrot.slane %v385_v20, 6  ;;  %v384_v31 = vld [vmem:[%s5109_s24 + $0x30] sm:$0xff] }
  0x28   : > { %1426 = vmatpush.bf16.msra.mxu0 %v4712_v2  ;;  %4768 = vmatpush.bf16.msra.mxu2 %v4712_v2  ;;  %v659_v19 = vsel %vm648_vm0, %v380_v10, %v595_v11  ;;  %v660_v23 = vsel %vm650_vm1, %v380_v10, %v595_v11  ;;  %v662_v24 = vsel %vm653_vm2, %v380_v10, %v595_v11  ;;  %v4709_v32 = vld [vmem:[%s6888_s1 + $0x18] sm:$0xff]  ;;  %v387_v34 = vld [vmem:[%s5109_s24 + $0x48] sm:$0xff]  ;;  %v596_v35 = vrot.slane %v383_v28, 6  ;;  %v382_v36 = vld [vmem:[%s5109_s24 + $0x20] sm:$0x3] }
  0x29   : > { %1539 = vmatpush.bf16.msra.mxu1 %v4720_v3  ;;  %4776 = vmatpush.bf16.msra.mxu3 %v4720_v3  ;;  %v664_v25 = vsel %vm656_vm3, %v595_v11, %v380_v10  ;;  %930 = vst [vmem:[#allocation1 + $0x20] ss:$4 sm:$0xff] %v659_v19  ;;  %v661_v26 = vrot.slane %v660_v23, 2  ;;  %v663_v27 = vrot.slane %v662_v24, 4  ;;  %v4717_v33 = vld [vmem:[%s6888_s1 + $0x58] sm:$0xff]  ;;  %v668_v37 = vsel %vm650_vm1, %v384_v31, %v597_v30  ;;  %v4708_v39 = vld [vmem:[%s6888_s1 + $0x10] sm:$0xff] }
  0x2a   : > { %924 = vst [vmem:[#allocation1 + $0x1] ss:$4 sm:$0xff] %v652_v16  ;;  %v665_v29 = vrot.slane %v664_v25, 6  ;;  %v598_v38 = vrot.slane %v387_v34, 6  ;;  %v4716_v40 = vld [vmem:[%s6888_s1 + $0x50] sm:$0xff]  ;;  %v386_v41 = vld [vmem:[%s5109_s24 + $0x40] sm:$0xff]  ;;  %v666_v42 = vsel %vm648_vm0, %v382_v36, %v596_v35  ;;  %v670_v43 = vsel %vm653_vm2, %v384_v31, %v597_v30 }
  0x2b   : > { %926 = vst [vmem:[#allocation1 + $0x2] ss:$4 sm:$0xff] %v655_v17  ;;  %v667_v44 = vsel %vm648_vm0, %v384_v31, %v597_v30  ;;  %v669_v45 = vrot.slane %v668_v37, 2  ;;  %v672_v46 = vsel %vm656_vm3, %v597_v30, %v384_v31  ;;  %v671_v49 = vrot.slane %v670_v43, 4  ;;  %v4707_v51 = vld [vmem:[%s6888_s1 + $0x8] sm:$0xff]  ;;  %v4706_v62 = vld [vmem:[%s6888_s1] sm:$0xff] }
  0x2c   : > { %1427 = vmatpush.bf16.msra.mxu0 %v4711_v6  ;;  %4769 = vmatpush.bf16.msra.mxu2 %v4711_v6  ;;  %928 = vst [vmem:[#allocation1 + $0x3] ss:$4 sm:$0xff] %v658_v18  ;;  %v675_v50 = vsel %vm650_vm1, %v386_v41, %v598_v38  ;;  %v4715_v52 = vld [vmem:[%s6888_s1 + $0x48] sm:$0xff]  ;;  %v673_v53 = vrot.slane %v672_v46, 6  ;;  %v677_v54 = vsel %vm653_vm2, %v386_v41, %v598_v38  ;;  %v389_v60 = vld [vmem:[%s5109_s24 + $0x58] sm:$0x3] }
  0x2d   : > { %1540 = vmatpush.bf16.msra.mxu1 %v4719_v7  ;;  %4777 = vmatpush.bf16.msra.mxu3 %v4719_v7  ;;  %932 = vst [vmem:[#allocation1 + $0x21] ss:$4 sm:$0xff] %v661_v26  ;;  %v391_v55 = vld [vmem:[%s5109_s24 + $0x68] sm:$0xff]  ;;  %v674_v58 = vsel %vm648_vm0, %v386_v41, %v598_v38  ;;  %v676_v59 = vrot.slane %v675_v50, 2  ;;  %v678_v61 = vrot.slane %v677_v54, 4  ;;  %v4714_v63 = vld [vmem:[%s6888_s1 + $0x40] sm:$0xff]  ;;  %v679_v1 = vsel %vm656_vm3, %v598_v38, %v386_v41 }
  0x2e   : > { %934 = vst [vmem:[#allocation1 + $0x22] ss:$4 sm:$0xff] %v663_v27  ;;  %v600_v0 = vrot.slane %v391_v55, 6  ;;  %v390_v2 = vld [vmem:[%s5109_s24 + $0x60] sm:$0xff]  ;;  %v393_v3 = vld [vmem:[%s5109_s24 + $0x78] sm:$0xff]  ;;  %v599_v4 = vrot.slane %v389_v60, 6 }
  0x2f   : > { %936 = vst [vmem:[#allocation1 + $0x23] ss:$4 sm:$0xff] %v665_v29  ;;  %v388_v5 = vld [vmem:[%s5109_s24 + $0x50] sm:$0x3]  ;;  %v680_v8 = vrot.slane %v679_v1, 6  ;;  %v601_v9 = vrot.slane %v393_v3, 6 }
  0x30   : > { %1428 = vmatpush.bf16.msra.mxu0 %v4710_v21  ;;  %4770 = vmatpush.bf16.msra.mxu2 %v4710_v21  ;;  %v683_v10 = vsel %vm650_vm1, %v390_v2, %v600_v0  ;;  %v392_v11 = vld [vmem:[%s5109_s24 + $0x70] sm:$0xff]  ;;  %v681_v12 = vsel %vm648_vm0, %v388_v5, %v599_v4  ;;  %v685_v13 = vsel %vm653_vm2, %v390_v2, %v600_v0  ;;  %v395_v26 = vld [vmem:[%s5109_s24 + $0x88] sm:$0x3]  ;;  %v397_v27 = vld [vmem:[%s5109_s24 + $0x98] sm:$0xff] }
  0x31   : > { %1541 = vmatpush.bf16.msra.mxu1 %v4718_v22  ;;  %4778 = vmatpush.bf16.msra.mxu3 %v4718_v22  ;;  %v682_v16 = vsel %vm648_vm0, %v390_v2, %v600_v0  ;;  %v687_v17 = vsel %vm656_vm3, %v600_v0, %v390_v2  ;;  %v684_v18 = vrot.slane %v683_v10, 2  ;;  %v686_v19 = vrot.slane %v685_v13, 4  ;;  %v394_v31 = vld [vmem:[%s5109_s24 + $0x80] sm:$0x3]  ;;  %v396_v34 = vld [vmem:[%s5109_s24 + $0x90] sm:$0xff]  ;;  %v399_v36 = vld [vmem:[%s5109_s24 + $0xa8] sm:$0xff] }
  0x32   : > { %v690_v20 = vsel %vm650_vm1, %v392_v11, %v601_v9  ;;  %v688_v21 = vrot.slane %v687_v17, 6  ;;  %v689_v24 = vsel %vm648_vm0, %v392_v11, %v601_v9  ;;  %v692_v28 = vsel %vm653_vm2, %v392_v11, %v601_v9  ;;  %v402_v60 = vld [vmem:[%s5109_s24 + $0xc0] sm:$0xff]  ;;  %v400_v0 = vld [vmem:[%s5109_s24 + $0xb0] sm:$0x3]  ;;  %v405_v2 = vld [vmem:[%s5109_s24 + $0xd8] sm:$0xff] }
  0x33   : > { %v937_v47 = vld.sshfl [vmem:[#allocation1] sm:$0xff pattern:$0x73625140]  ;;  %v938_v48 = vld.sshfl [vmem:[#allocation1 + $0x8] sm:$0xff pattern:$0x73625140]  ;;  %v694_v29 = vsel %vm656_vm3, %v601_v9, %v392_v11 }
  0x34   : > { %1429 = vmatpush.bf16.msra.mxu0 %v4709_v32  ;;  %4771 = vmatpush.bf16.msra.mxu2 %v4709_v32  ;;  %941 = vst [vmem:[#allocation1] ss:$4 sm:$0xff] %v666_v42  ;;  %v691_v25 = vrot.slane %v690_v20, 2  ;;  %v602_v30 = vrot.slane %v395_v26, 6  ;;  %v603_v32 = vrot.slane %v397_v27, 6  ;;  %v695_v35 = vrot.slane %v694_v29, 6 }
  0x35   : > { %1542 = vmatpush.bf16.msra.mxu1 %v4717_v33  ;;  %4779 = vmatpush.bf16.msra.mxu3 %v4717_v33  ;;  %942 = vst [vmem:[#allocation1 + $0x1] ss:$4 sm:$0xff] %v667_v44  ;;  %v693_v33 = vrot.slane %v692_v28, 4  ;;  %v607_v13 = vrot.slane %v405_v2, 6  ;;  %v406_v28 = vld [vmem:[%s5109_s24 + $0xe0] sm:$0x3] }
  0x36   : > { %v939_v56 = vld.sshfl [vmem:[#allocation1 + $0x20] sm:$0xff pattern:$0x73625140]  ;;  %v940_v57 = vld.sshfl [vmem:[#allocation1 + $0x28] sm:$0xff pattern:$0x73625140]  ;;  %v698_v37 = vsel %vm650_vm1, %v396_v34, %v603_v32  ;;  %v700_v41 = vsel %vm653_vm2, %v396_v34, %v603_v32  ;;  %v702_v42 = vsel %vm656_vm3, %v603_v32, %v396_v34  ;;  %v697_v46 = vsel %vm648_vm0, %v396_v34, %v603_v32 }
  0x37   : > { %943 = vst [vmem:[#allocation1 + $0x2] ss:$4 sm:$0xff] %v669_v45  ;;  %v1255_v6 = vpack.c.bf16 %v939_v56, %v937_v47  ;;  %v1256_v7 = vpack.c.bf16 %v940_v57, %v938_v48  ;;  %v604_v45 = vrot.slane %v399_v36, 6  ;;  %v699_v47 = vrot.slane %v698_v37, 2  ;;  %v398_v48 = vld [vmem:[%s5109_s24 + $0xa0] sm:$0xff] }
  0x38   : > { %1430 = vmatpush.bf16.msra.mxu0 %v4708_v39  ;;  %4772 = vmatpush.bf16.msra.mxu2 %v4708_v39  ;;  %944 = vst [vmem:[#allocation1 + $0x3] ss:$4 sm:$0xff] %v671_v49  ;;  %v701_v49 = vrot.slane %v700_v41, 4  ;;  %v703_v50 = vrot.slane %v702_v42, 6  ;;  %v401_v56 = vld [vmem:[%s5109_s24 + $0xb8] sm:$0x3] }
  0x39   : > { %1543 = vmatpush.bf16.msra.mxu1 %v4716_v40  ;;  %4780 = vmatpush.bf16.msra.mxu3 %v4716_v40  ;;  %945 = vst [vmem:[#allocation1 + $0x20] ss:$4 sm:$0xff] %v673_v53  ;;  %v696_v40 = vsel %vm648_vm0, %v394_v31, %v602_v30  ;;  %v403_v53 = vld [vmem:[%s5109_s24 + $0xc8] sm:$0xff]  ;;  %v704_v54 = vsel %vm648_vm0, %v398_v48, %v604_v45 }
  0x3a   : > { %946 = vst [vmem:[#allocation1 + $0x21] ss:$4 sm:$0xff] %v674_v58  ;;  %v705_v55 = vsel %vm650_vm1, %v398_v48, %v604_v45  ;;  %v707_v57 = vsel %vm653_vm2, %v398_v48, %v604_v45  ;;  %v606_v58 = vrot.slane %v403_v53, 6 }
  0x3b   : > { %947 = vst [vmem:[#allocation1 + $0x22] ss:$4 sm:$0xff] %v676_v59  ;;  %v709_v59 = vsel %vm656_vm3, %v604_v45, %v398_v48 }
  0x3c   : > { %1431 = vmatpush.bf16.msra.mxu0 %v4707_v51  ;;  %4773 = vmatpush.bf16.msra.mxu2 %v4707_v51  ;;  %948 = vst [vmem:[#allocation1 + $0x23] ss:$4 sm:$0xff] %v678_v61  ;;  %v706_v61 = vrot.slane %v705_v55, 2  ;;  %v710_v1 = vrot.slane %v709_v59, 6  ;;  %v713_v5 = vsel %vm650_vm1, %v402_v60, %v606_v58  ;;  %v712_v9 = vsel %vm648_vm0, %v402_v60, %v606_v58 }
  0x3d   : > { %1544 = vmatpush.bf16.msra.mxu1 %v4715_v52  ;;  %4781 = vmatpush.bf16.msra.mxu3 %v4715_v52  ;;  %v714_v10 = vrot.slane %v713_v5, 2 }
  0x3f   : > { %v949_v14 = vld.sshfl [vmem:[#allocation1] sm:$0xff pattern:$0x73625140]  ;;  %v950_v15 = vld.sshfl [vmem:[#allocation1 + $0x8] sm:$0xff pattern:$0x73625140] }
  0x40   : > { %1432 = vmatpush.bf16.msra.mxu0 %v4706_v62  ;;  %4774 = vmatpush.bf16.msra.mxu2 %v4706_v62  ;;  %953 = vst [vmem:[#allocation1] ss:$4 sm:$0xff] %v680_v8  ;;  %v605_v62 = vrot.slane %v401_v56, 6  ;;  %v717_v8 = vsel %vm656_vm3, %v606_v58, %v402_v60 }
  0x41   : > { %1545 = vmatpush.bf16.msra.mxu1 %v4714_v63  ;;  %4782 = vmatpush.bf16.msra.mxu3 %v4714_v63  ;;  %954 = vst [vmem:[#allocation1 + $0x1] ss:$4 sm:$0xff] %v681_v12  ;;  %v708_v63 = vrot.slane %v707_v57, 4  ;;  %v404_v12 = vld [vmem:[%s5109_s24 + $0xd0] sm:$0xff] }
  0x42   : > { %955 = vst [vmem:[#allocation1 + $0x2] ss:$4 sm:$0xff] %v682_v16  ;;  %v720_v20 = vsel %vm650_vm1, %v404_v12, %v607_v13  ;;  %v724_v27 = vsel %vm656_vm3, %v607_v13, %v404_v12 }
  0x43   : > { %1433 = vmatmul.bf16.vlgmr.msra.gmra.mxu0 %v1255_v6  ;;  %v951_v22 = vld.sshfl [vmem:[#allocation1 + $0x20] sm:$0xff pattern:$0x73625140]  ;;  %v952_v23 = vld.sshfl [vmem:[#allocation1 + $0x28] sm:$0xff pattern:$0x73625140]  ;;  %v715_v6 = vsel %vm653_vm2, %v402_v60, %v606_v58 }
  0x44   : > { %1546 = vmatmul.bf16.vlgmr.msra.gmra.mxu1 %v1256_v7  ;;  %956 = vst [vmem:[#allocation1 + $0x3] ss:$4 sm:$0xff] %v684_v18  ;;  %v1257_v43 = vpack.c.bf16 %v951_v22, %v949_v14  ;;  %v1258_v44 = vpack.c.bf16 %v952_v23, %v950_v15  ;;  %v711_v7 = vsel %vm648_vm0, %v400_v0, %v605_v62  ;;  %v716_v11 = vrot.slane %v715_v6, 4 }
  0x45   : > { %957 = vst [vmem:[#allocation1 + $0x20] ss:$4 sm:$0xff] %v686_v19  ;;  %v718_v18 = vrot.slane %v717_v8, 6  ;;  %v409_v19 = vld [vmem:[%s5109_s24 + $0xf8] sm:$0xff]  ;;  %v722_v23 = vsel %vm653_vm2, %v404_v12, %v607_v13  ;;  %v721_v26 = vrot.slane %v720_v20, 2  ;;  %v725_v34 = vrot.slane %v724_v27, 6 }
  0x46   : > { %958 = vst [vmem:[#allocation1 + $0x21] ss:$4 sm:$0xff] %v688_v21  ;;  %v407_v21 = vld [vmem:[%s5109_s24 + $0xe8] sm:$0x3]  ;;  %v609_v22 = vrot.slane %v409_v19, 6  ;;  %v723_v30 = vrot.slane %v722_v23, 4 }
  0x47   : > { %959 = vst [vmem:[#allocation1 + $0x22] ss:$4 sm:$0xff] %v689_v24  ;;  %v408_v24 = vld [vmem:[%s5109_s24 + $0xf0] sm:$0xff]  ;;  %v608_v29 = vrot.slane %v407_v21, 6 }
  0x48   : > { %960 = vst [vmem:[#allocation1 + $0x23] ss:$4 sm:$0xff] %v691_v25  ;;  %v719_v25 = vsel %vm648_vm0, %v404_v12, %v607_v13  ;;  %v727_v41 = vsel %vm648_vm0, %v408_v24, %v609_v22  ;;  %v732_v45 = vsel %vm656_vm3, %v609_v22, %v408_v24  ;;  %v419_v12 = vld [vmem:[%s5109_s24 + $0x148] sm:$0x3] }
  0x49   : > { %v726_v36 = vsel %vm648_vm0, %v406_v28, %v608_v29  ;;  %v614_v23 = vrot.slane %v419_v12, 6  ;;  %v420_v28 = vld [vmem:[%s5109_s24 + $0x150] sm:$0xff] }
  0x4b   : > { %v5210_v38 = vld.sshfl [vmem:[#allocation1] sm:$0xff pattern:$0x73625140]  ;;  %v5212_v39 = vld.sshfl [vmem:[#allocation1 + $0x8] sm:$0xff pattern:$0x73625140] }
  0x4c   : > { %965 = vst [vmem:[#allocation1] ss:$4 sm:$0xff] %v693_v33  ;;  %v728_v33 = vsel %vm650_vm1, %v408_v24, %v609_v22 }
  0x4d   : > { %966 = vst [vmem:[#allocation1 + $0x1] ss:$4 sm:$0xff] %v695_v35  ;;  %v730_v35 = vsel %vm653_vm2, %v408_v24, %v609_v22  ;;  %v729_v37 = vrot.slane %v728_v33, 2  ;;  %v423_v33 = vld [vmem:[%s5109_s24 + $0x168] sm:$0xff] }
  0x4e   : > { %967 = vst [vmem:[#allocation1 + $0x2] ss:$4 sm:$0xff] %v696_v40  ;;  %v731_v42 = vrot.slane %v730_v35, 4 }
  0x4f   : > { %v963_v51 = vld.sshfl [vmem:[#allocation1 + $0x20] sm:$0xff pattern:$0x73625140]  ;;  %v964_v52 = vld.sshfl [vmem:[#allocation1 + $0x28] sm:$0xff pattern:$0x73625140] }
  0x50   : > { %968 = vst [vmem:[#allocation1 + $0x3] ss:$4 sm:$0xff] %v697_v46  ;;  %v1259_v16 = vpack.c.bf16 %v963_v51, %v5210_v38  ;;  %v1260_v17 = vpack.c.bf16 %v964_v52, %v5212_v39  ;;  %v411_v38 = vld [vmem:[%s5109_s24 + $0x108] sm:$0xff]  ;;  %v414_v52 = vld [vmem:[%s5109_s24 + $0x120] sm:$0xff] }
  0x51   : > { %969 = vst [vmem:[#allocation1 + $0x20] ss:$4 sm:$0xff] %v699_v47  ;;  %v415_v46 = vld [vmem:[%s5109_s24 + $0x128] sm:$0xff] }
  0x52   : > { %970 = vst [vmem:[#allocation1 + $0x21] ss:$4 sm:$0xff] %v701_v49  ;;  %v413_v49 = vld [vmem:[%s5109_s24 + $0x118] sm:$0x3]  ;;  %v612_v53 = vrot.slane %v415_v46, 6 }
  0x53   : > { %1438 = vmatmul.bf16.gmra.mxu0 %v1257_v43  ;;  %971 = vst [vmem:[#allocation1 + $0x22] ss:$4 sm:$0xff] %v703_v50  ;;  %v610_v43 = vrot.slane %v411_v38, 6  ;;  %v733_v50 = vrot.slane %v732_v45, 6  ;;  %v611_v59 = vrot.slane %v413_v49, 6  ;;  %v616_v38 = vrot.slane %v423_v33, 6 }
  0x54   : > { %1551 = vmatmul.bf16.gmra.mxu1 %v1258_v44  ;;  %972 = vst [vmem:[#allocation1 + $0x23] ss:$4 sm:$0xff] %v704_v54  ;;  %v410_v44 = vld [vmem:[%s5109_s24 + $0x100] sm:$0xff]  ;;  %v742_v5 = vsel %vm648_vm0, %v414_v52, %v612_v53  ;;  %v745_v8 = vsel %vm653_vm2, %v414_v52, %v612_v53 }
  0x55   : > { %v735_v51 = vsel %vm650_vm1, %v410_v44, %v610_v43  ;;  %v737_v54 = vsel %vm653_vm2, %v410_v44, %v610_v43  ;;  %v734_v57 = vsel %vm648_vm0, %v410_v44, %v610_v43  ;;  %v739_v58 = vsel %vm656_vm3, %v610_v43, %v410_v44  ;;  %v427_v43 = vld [vmem:[%s5109_s24 + $0x188] sm:$0xff] }
  0x56   : > { %v736_v60 = vrot.slane %v735_v51, 2  ;;  %v738_v62 = vrot.slane %v737_v54, 4  ;;  %v740_v0 = vrot.slane %v739_v58, 6 }
  0x57   : > { %v5228_v3 = vld.sshfl [vmem:[#allocation1] sm:$0xff pattern:$0x73625140]  ;;  %v5230_v4 = vld.sshfl [vmem:[#allocation1 + $0x8] sm:$0xff pattern:$0x73625140] }
  0x58   : > { %977 = vst [vmem:[#allocation1] ss:$4 sm:$0xff] %v706_v61  ;;  %v412_v61 = vld [vmem:[%s5109_s24 + $0x110] sm:$0x3] }
  0x59   : > { %978 = vst [vmem:[#allocation1 + $0x1] ss:$4 sm:$0xff] %v708_v63  ;;  %v417_v63 = vld [vmem:[%s5109_s24 + $0x138] sm:$0xff] }
  0x5a   : > { %979 = vst [vmem:[#allocation1 + $0x2] ss:$4 sm:$0xff] %v710_v1  ;;  %v743_v1 = vsel %vm650_vm1, %v414_v52, %v612_v53 }
  0x5b   : > { %v975_v14 = vld.sshfl [vmem:[#allocation1 + $0x20] sm:$0xff pattern:$0x73625140]  ;;  %v976_v15 = vld.sshfl [vmem:[#allocation1 + $0x28] sm:$0xff pattern:$0x73625140] }
  0x5c   : > { %980 = vst [vmem:[#allocation1 + $0x3] ss:$4 sm:$0xff] %v711_v7  ;;  %v1261_v47 = vpack.c.bf16 %v975_v14, %v5228_v3  ;;  %v1262_v48 = vpack.c.bf16 %v976_v15, %v5230_v4  ;;  %v741_v4 = vsel %vm648_vm0, %v412_v61, %v611_v59  ;;  %v744_v6 = vrot.slane %v743_v1, 2  ;;  %v421_v15 = vld [vmem:[%s5109_s24 + $0x158] sm:$0xff] }
  0x5d   : > { %981 = vst [vmem:[#allocation1 + $0x20] ss:$4 sm:$0xff] %v712_v9  ;;  %v613_v7 = vrot.slane %v417_v63, 6  ;;  %v416_v9 = vld [vmem:[%s5109_s24 + $0x130] sm:$0xff] }
  0x5e   : > { %982 = vst [vmem:[#allocation1 + $0x21] ss:$4 sm:$0xff] %v714_v10  ;;  %v747_v10 = vsel %vm656_vm3, %v612_v53, %v414_v52  ;;  %v618_v52 = vrot.slane %v427_v43, 6 }
  0x5f   : > { %983 = vst [vmem:[#allocation1 + $0x22] ss:$4 sm:$0xff] %v716_v11  ;;  %v746_v11 = vrot.slane %v745_v8, 4  ;;  %v748_v13 = vrot.slane %v747_v10, 6  ;;  %v750_v14 = vsel %vm650_vm1, %v416_v9, %v613_v7  ;;  %v749_v19 = vsel %vm648_vm0, %v416_v9, %v613_v7 }
  0x60   : > { %984 = vst [vmem:[#allocation1 + $0x23] ss:$4 sm:$0xff] %v718_v18  ;;  %v754_v20 = vsel %vm656_vm3, %v613_v7, %v416_v9  ;;  %v751_v24 = vrot.slane %v750_v14, 2 }
  0x61   : > { %v755_v29 = vrot.slane %v754_v20, 6 }
  0x63   : > { %1443 = vmatmul.bf16.gmra.mxu0 %v1259_v16  ;;  %v5248_v31 = vld.sshfl [vmem:[#allocation1] sm:$0xff pattern:$0x73625140]  ;;  %v5250_v32 = vld.sshfl [vmem:[#allocation1 + $0x8] sm:$0xff pattern:$0x73625140]  ;;  %v752_v16 = vsel %vm653_vm2, %v416_v9, %v613_v7 }
  0x64   : > { %1556 = vmatmul.bf16.gmra.mxu1 %v1260_v17  ;;  %989 = vst [vmem:[#allocation1] ss:$4 sm:$0xff] %v719_v25  ;;  %v418_v25 = vld [vmem:[%s5109_s24 + $0x140] sm:$0x3]  ;;  %v753_v27 = vrot.slane %v752_v16, 4  ;;  %v433_v7 = vld [vmem:[%s5109_s24 + $0x1b8] sm:$0xff] }
  0x65   : > { %990 = vst [vmem:[#allocation1 + $0x1] ss:$4 sm:$0xff] %v721_v26  ;;  %v615_v26 = vrot.slane %v421_v15, 6  ;;  %v621_v14 = vrot.slane %v433_v7, 6  ;;  %v431_v16 = vld [vmem:[%s5109_s24 + $0x1a8] sm:$0x3] }
  0x66   : > { %991 = vst [vmem:[#allocation1 + $0x2] ss:$4 sm:$0xff] %v723_v30 }
  0x67   : > { %v5256_v39 = vld.sshfl [vmem:[#allocation1 + $0x20] sm:$0xff pattern:$0x73625140]  ;;  %v5258_v40 = vld.sshfl [vmem:[#allocation1 + $0x28] sm:$0xff pattern:$0x73625140]  ;;  %v758_v35 = vsel %vm650_vm1, %v420_v28, %v615_v26 }
  0x68   : > { %992 = vst [vmem:[#allocation1 + $0x3] ss:$4 sm:$0xff] %v725_v34  ;;  %v1263_v17 = vpack.c.bf16 %v5256_v39, %v5248_v31  ;;  %v1264_v18 = vpack.c.bf16 %v5258_v40, %v5250_v32  ;;  %v756_v32 = vsel %vm648_vm0, %v418_v25, %v614_v23  ;;  %v757_v34 = vsel %vm648_vm0, %v420_v28, %v615_v26  ;;  %v422_v40 = vld [vmem:[%s5109_s24 + $0x160] sm:$0xff]  ;;  %v435_v25 = vld [vmem:[%s5109_s24 + $0x1c8] sm:$0xff] }
  0x69   : > { %993 = vst [vmem:[#allocation1 + $0x20] ss:$4 sm:$0xff] %v726_v36  ;;  %v760_v36 = vsel %vm653_vm2, %v420_v28, %v615_v26  ;;  %v759_v39 = vrot.slane %v758_v35, 2  ;;  %v765_v45 = vsel %vm650_vm1, %v422_v40, %v616_v38  ;;  %v767_v46 = vsel %vm653_vm2, %v422_v40, %v616_v38  ;;  %v434_v35 = vld [vmem:[%s5109_s24 + $0x1c0] sm:$0xff] }
  0x6a   : > { %994 = vst [vmem:[#allocation1 + $0x21] ss:$4 sm:$0xff] %v727_v41  ;;  %v761_v41 = vrot.slane %v760_v36, 4  ;;  %v764_v53 = vsel %vm648_vm0, %v422_v40, %v616_v38  ;;  %v766_v54 = vrot.slane %v765_v45, 2  ;;  %v768_v58 = vrot.slane %v767_v46, 4  ;;  %v439_v45 = vld [vmem:[%s5109_s24 + $0x1e8] sm:$0xff] }
  0x6b   : > { %995 = vst [vmem:[#allocation1 + $0x22] ss:$4 sm:$0xff] %v729_v37  ;;  %v762_v37 = vsel %vm656_vm3, %v615_v26, %v420_v28  ;;  %v430_v28 = vld [vmem:[%s5109_s24 + $0x1a0] sm:$0x3] }
  0x6c   : > { %996 = vst [vmem:[#allocation1 + $0x23] ss:$4 sm:$0xff] %v731_v42  ;;  %v425_v42 = vld [vmem:[%s5109_s24 + $0x178] sm:$0x3]  ;;  %v763_v44 = vrot.slane %v762_v37, 6 }
  0x6d   : > { %v617_v51 = vrot.slane %v425_v42, 6 }
  0x6f   : > { %v5270_v55 = vld.sshfl [vmem:[#allocation1] sm:$0xff pattern:$0x73625140]  ;;  %v5272_v56 = vld.sshfl [vmem:[#allocation1 + $0x8] sm:$0xff pattern:$0x73625140] }
  0x70   : > { %1001 = vst [vmem:[#allocation1] ss:$4 sm:$0xff] %v733_v50  ;;  %v426_v50 = vld [vmem:[%s5109_s24 + $0x180] sm:$0xff] }
  0x71   : > { %1002 = vst [vmem:[#allocation1 + $0x1] ss:$4 sm:$0xff] %v734_v57  ;;  %v424_v57 = vld [vmem:[%s5109_s24 + $0x170] sm:$0x3] }
  0x72   : > { %1003 = vst [vmem:[#allocation1 + $0x2] ss:$4 sm:$0xff] %v736_v60  ;;  %v771_v1 = vsel %vm648_vm0, %v424_v57, %v617_v51  ;;  %v441_v57 = vld [vmem:[%s5109_s24 + $0x1f8] sm:$0xff] }
  0x73   : > { %1448 = vmatmul.bf16.gmra.mxu0 %v1261_v47  ;;  %v5279_v2 = vld.sshfl [vmem:[#allocation1 + $0x20] sm:$0xff pattern:$0x73625140]  ;;  %v5281_v3 = vld.sshfl [vmem:[#allocation1 + $0x28] sm:$0xff pattern:$0x73625140]  ;;  %v769_v47 = vsel %vm656_vm3, %v616_v38, %v422_v40 }
  0x74   : > { %1561 = vmatmul.bf16.gmra.mxu1 %v1262_v48  ;;  %1004 = vst [vmem:[#allocation1 + $0x3] ss:$4 sm:$0xff] %v738_v62  ;;  %v770_v59 = vrot.slane %v769_v47, 6  ;;  %v1265_v60 = vpack.c.bf16 %v5279_v2, %v5270_v55  ;;  %v1266_v61 = vpack.c.bf16 %v5281_v3, %v5272_v56  ;;  %v775_v55 = vsel %vm653_vm2, %v426_v50, %v618_v52  ;;  %v428_v56 = vld [vmem:[%s5109_s24 + $0x190] sm:$0xff] }
  0x75   : > { %1005 = vst [vmem:[#allocation1 + $0x20] ss:$4 sm:$0xff] %v740_v0  ;;  %v429_v0 = vld [vmem:[%s5109_s24 + $0x198] sm:$0xff]  ;;  %v772_v2 = vsel %vm648_vm0, %v426_v50, %v618_v52  ;;  %v776_v8 = vrot.slane %v775_v55, 4 }
  0x76   : > { %1006 = vst [vmem:[#allocation1 + $0x21] ss:$4 sm:$0xff] %v741_v4  ;;  %v773_v4 = vsel %vm650_vm1, %v426_v50, %v618_v52 }
  0x77   : > { %1007 = vst [vmem:[#allocation1 + $0x22] ss:$4 sm:$0xff] %v742_v5  ;;  %v619_v5 = vrot.slane %v429_v0, 6  ;;  %v774_v3 = vrot.slane %v773_v4, 2 }
  0x78   : > { %1008 = vst [vmem:[#allocation1 + $0x23] ss:$4 sm:$0xff] %v744_v6  ;;  %v777_v6 = vsel %vm656_vm3, %v618_v52, %v426_v50 }
  0x79   : > { %v780_v9 = vsel %vm650_vm1, %v428_v56, %v619_v5  ;;  %v782_v10 = vsel %vm653_vm2, %v428_v56, %v619_v5  ;;  %v784_v15 = vsel %vm656_vm3, %v619_v5, %v428_v56 }
  0x7a   : > { %v785_v26 = vrot.slane %v784_v15, 6 }
  0x7b   : > { %v5298_v21 = vld.sshfl [vmem:[#allocation1] sm:$0xff pattern:$0x73625140]  ;;  %v5300_v22 = vld.sshfl [vmem:[#allocation1 + $0x8] sm:$0xff pattern:$0x73625140] }
  0x7c   : > { %1013 = vst [vmem:[#allocation1] ss:$4 sm:$0xff] %v746_v11 }
  0x7d   : > { %1014 = vst [vmem:[#allocation1 + $0x1] ss:$4 sm:$0xff] %v748_v13  ;;  %v778_v13 = vrot.slane %v777_v6, 6 }
  0x7e   : > { %1015 = vst [vmem:[#allocation1 + $0x2] ss:$4 sm:$0xff] %v749_v19  ;;  %v783_v19 = vrot.slane %v782_v10, 4 }
  0x7f   : > { %v5304_v30 = vld.sshfl [vmem:[#allocation1 + $0x20] sm:$0xff pattern:$0x73625140]  ;;  %v5306_v31 = vld.sshfl [vmem:[#allocation1 + $0x28] sm:$0xff pattern:$0x73625140] }
  0x80   : > { %1016 = vst [vmem:[#allocation1 + $0x3] ss:$4 sm:$0xff] %v751_v24  ;;  %v432_v24 = vld [vmem:[%s5109_s24 + $0x1b0] sm:$0xff]  ;;  %v1267_v33 = vpack.c.bf16 %v5304_v30, %v5298_v21 }
  0x81   : > { %1017 = vst [vmem:[#allocation1 + $0x20] ss:$4 sm:$0xff] %v753_v27  ;;  %v620_v27 = vrot.slane %v431_v16, 6  ;;  %v790_v37 = vsel %vm653_vm2, %v432_v24, %v621_v14  ;;  %v787_v38 = vsel %vm648_vm0, %v432_v24, %v621_v14  ;;  %v792_v40 = vsel %vm656_vm3, %v621_v14, %v432_v24 }
  0x82   : > { %1018 = vst [vmem:[#allocation1 + $0x21] ss:$4 sm:$0xff] %v755_v29  ;;  %v622_v29 = vrot.slane %v435_v25, 6  ;;  %v793_v30 = vrot.slane %v792_v40, 6  ;;  %v442_v25 = vld [vmem:[%s5109_s24 + $0x200] sm:$0x3] }
  0x83   : > { %1453 = vmatmul.bf16.gmra.mxu0 %v1263_v17  ;;  %1019 = vst [vmem:[#allocation1 + $0x22] ss:$4 sm:$0xff] %v756_v32  ;;  %v779_v17 = vsel %vm648_vm0, %v428_v56, %v619_v5  ;;  %v788_v32 = vsel %vm650_vm1, %v432_v24, %v621_v14  ;;  %v786_v36 = vsel %vm648_vm0, %v430_v28, %v620_v27  ;;  %v444_v28 = vld [vmem:[%s5109_s24 + $0x210] sm:$0xff] }
  0x84   : > { %1566 = vmatmul.bf16.gmra.mxu1 %v1264_v18  ;;  %1020 = vst [vmem:[#allocation1 + $0x23] ss:$4 sm:$0xff] %v757_v34  ;;  %v781_v18 = vrot.slane %v780_v9, 2  ;;  %v1268_v34 = vpack.c.bf16 %v5306_v31, %v5300_v22  ;;  %v791_v22 = vrot.slane %v790_v37, 4  ;;  %v797_v31 = vsel %vm653_vm2, %v434_v35, %v622_v29 }
  0x85   : > { %v794_v46 = vsel %vm648_vm0, %v434_v35, %v622_v29  ;;  %v798_v51 = vrot.slane %v797_v31, 4  ;;  %v799_v52 = vsel %vm656_vm3, %v622_v29, %v434_v35 }
  0x87   : > { %v5320_v48 = vld.sshfl [vmem:[#allocation1] sm:$0xff pattern:$0x73625140]  ;;  %v5322_v49 = vld.sshfl [vmem:[#allocation1 + $0x8] sm:$0xff pattern:$0x73625140] }
  0x88   : > { %1025 = vst [vmem:[#allocation1] ss:$4 sm:$0xff] %v759_v39  ;;  %v789_v39 = vrot.slane %v788_v32, 2 }
  0x89   : > { %1026 = vst [vmem:[#allocation1 + $0x1] ss:$4 sm:$0xff] %v761_v41  ;;  %v795_v41 = vsel %vm650_vm1, %v434_v35, %v622_v29  ;;  %v447_v29 = vld [vmem:[%s5109_s24 + $0x228] sm:$0xff] }
  0x8a   : > { %1027 = vst [vmem:[#allocation1 + $0x2] ss:$4 sm:$0xff] %v763_v44  ;;  %v796_v43 = vrot.slane %v795_v41, 2  ;;  %v437_v44 = vld [vmem:[%s5109_s24 + $0x1d8] sm:$0x3]  ;;  %v446_v41 = vld [vmem:[%s5109_s24 + $0x220] sm:$0xff] }
  0x8b   : > { %v5331_v62 = vld.sshfl [vmem:[#allocation1 + $0x20] sm:$0xff pattern:$0x73625140]  ;;  %v5333_v63 = vld.sshfl [vmem:[#allocation1 + $0x28] sm:$0xff pattern:$0x73625140] }
  0x8c   : > { %1028 = vst [vmem:[#allocation1 + $0x3] ss:$4 sm:$0xff] %v764_v53  ;;  %v624_v53 = vrot.slane %v439_v45, 6  ;;  %v1269_v6 = vpack.c.bf16 %v5331_v62, %v5320_v48  ;;  %v1270_v7 = vpack.c.bf16 %v5333_v63, %v5322_v49  ;;  %v443_v63 = vld [vmem:[%s5109_s24 + $0x208] sm:$0x3] }
  0x8d   : > { %1029 = vst [vmem:[#allocation1 + $0x20] ss:$4 sm:$0xff] %v766_v54  ;;  %v438_v54 = vld [vmem:[%s5109_s24 + $0x1e0] sm:$0xff] }
  0x8e   : > { %1030 = vst [vmem:[#allocation1 + $0x21] ss:$4 sm:$0xff] %v768_v58  ;;  %v623_v58 = vrot.slane %v437_v44, 6  ;;  %v803_v0 = vsel %vm650_vm1, %v438_v54, %v624_v53  ;;  %v805_v5 = vsel %vm653_vm2, %v438_v54, %v624_v53 }
  0x8f   : > { %1031 = vst [vmem:[#allocation1 + $0x22] ss:$4 sm:$0xff] %v770_v59  ;;  %v436_v59 = vld [vmem:[%s5109_s24 + $0x1d0] sm:$0x3]  ;;  %v806_v9 = vrot.slane %v805_v5, 4 }
  0x90   : > { %1032 = vst [vmem:[#allocation1 + $0x23] ss:$4 sm:$0xff] %v771_v1  ;;  %v440_v1 = vld [vmem:[%s5109_s24 + $0x1f0] sm:$0xff]  ;;  %v801_v4 = vsel %vm648_vm0, %v436_v59, %v623_v58 }
  0x93   : > { %1458 = vmatmul.bf16.gmra.mxu0 %v1265_v60  ;;  %v5345_v11 = vld.sshfl [vmem:[#allocation1] sm:$0xff pattern:$0x73625140]  ;;  %v5347_v12 = vld.sshfl [vmem:[#allocation1 + $0x8] sm:$0xff pattern:$0x73625140] }
  0x94   : > { %1571 = vmatmul.bf16.gmra.mxu1 %v1266_v61  ;;  %1037 = vst [vmem:[#allocation1] ss:$4 sm:$0xff] %v772_v2  ;;  %v800_v60 = vrot.slane %v799_v52, 6  ;;  %v625_v61 = vrot.slane %v441_v57, 6  ;;  %v802_v2 = vsel %vm648_vm0, %v438_v54, %v624_v53 }
  0x95   : > { %1038 = vst [vmem:[#allocation1 + $0x1] ss:$4 sm:$0xff] %v774_v3  ;;  %v807_v3 = vsel %vm656_vm3, %v624_v53, %v438_v54  ;;  %v449_v53 = vld [vmem:[%s5109_s24 + $0x238] sm:$0x3] }
  0x96   : > { %1039 = vst [vmem:[#allocation1 + $0x2] ss:$4 sm:$0xff] %v776_v8  ;;  %v804_v8 = vrot.slane %v803_v0, 2  ;;  %v810_v10 = vsel %vm650_vm1, %v440_v1, %v625_v61  ;;  %v809_v62 = vsel %vm648_vm0, %v440_v1, %v625_v61  ;;  %v812_v16 = vsel %vm653_vm2, %v440_v1, %v625_v61  ;;  %v448_v0 = vld [vmem:[%s5109_s24 + $0x230] sm:$0x3] }
  0x97   : > { %v5352_v20 = vld.sshfl [vmem:[#allocation1 + $0x20] sm:$0xff pattern:$0x73625140]  ;;  %v5354_v23 = vld.sshfl [vmem:[#allocation1 + $0x28] sm:$0xff pattern:$0x73625140] }
  0x98   : > { %1040 = vst [vmem:[#allocation1 + $0x3] ss:$4 sm:$0xff] %v778_v13  ;;  %v808_v13 = vrot.slane %v807_v3, 6  ;;  %v811_v49 = vrot.slane %v810_v10, 2  ;;  %v813_v24 = vrot.slane %v812_v16, 4  ;;  %v629_v59 = vrot.slane %v449_v53, 6 }
  0x99   : > { %1041 = vst [vmem:[#allocation1 + $0x20] ss:$4 sm:$0xff] %v779_v17  ;;  %v445_v17 = vld [vmem:[%s5109_s24 + $0x218] sm:$0xff] }
  0x9a   : > { %1042 = vst [vmem:[#allocation1 + $0x21] ss:$4 sm:$0xff] %v781_v18  ;;  %v814_v18 = vsel %vm656_vm3, %v625_v61, %v440_v1  ;;  %v453_v1 = vld [vmem:[%s5109_s24 + $0x258] sm:$0xff]  ;;  %v831_v3 = vsel %vm648_vm0, %v448_v0, %v629_v59 }
  0x9b   : > { %1043 = vst [vmem:[#allocation1 + $0x22] ss:$4 sm:$0xff] %v783_v19  ;;  %v626_v19 = vrot.slane %v443_v63, 6  ;;  %v815_v27 = vrot.slane %v814_v18, 6  ;;  %v631_v10 = vrot.slane %v453_v1, 6  ;;  %v457_v18 = vld [vmem:[%s5109_s24 + $0x278] sm:$0xff] }
  0x9c   : > { %1044 = vst [vmem:[#allocation1 + $0x23] ss:$4 sm:$0xff] %v785_v26  ;;  %v627_v26 = vrot.slane %v445_v17, 6 }
  0x9d   : > { %v816_v35 = vsel %vm648_vm0, %v442_v25, %v626_v19 }
  0x9e   : > { %v818_v32 = vsel %vm650_vm1, %v444_v28, %v627_v26  ;;  %v822_v37 = vsel %vm656_vm3, %v627_v26, %v444_v28 }
  0x9f   : > { %v5370_v42 = vld.sshfl [vmem:[#allocation1] sm:$0xff pattern:$0x73625140]  ;;  %v5372_v21 = vld.sshfl [vmem:[#allocation1 + $0x8] sm:$0xff pattern:$0x73625140] }
  0xa0   : > { %1049 = vst [vmem:[#allocation1] ss:$4 sm:$0xff] %v786_v36  ;;  %v820_v36 = vsel %vm653_vm2, %v444_v28, %v627_v26  ;;  %v819_v40 = vrot.slane %v818_v32, 2  ;;  %v459_v32 = vld [vmem:[%s5109_s24 + $0x288] sm:$0xff] }
  0xa1   : > { %1050 = vst [vmem:[#allocation1 + $0x1] ss:$4 sm:$0xff] %v787_v38  ;;  %v628_v38 = vrot.slane %v447_v29, 6  ;;  %v456_v29 = vld [vmem:[%s5109_s24 + $0x270] sm:$0xff] }
  0xa2   : > { %1051 = vst [vmem:[#allocation1 + $0x2] ss:$4 sm:$0xff] %v789_v39  ;;  %v817_v39 = vsel %vm648_vm0, %v444_v28, %v627_v26 }
  0xa3   : > { %1463 = vmatmul.bf16.gmra.mxu0 %v1267_v33  ;;  %v5378_v47 = vld.sshfl [vmem:[#allocation1 + $0x20] sm:$0xff pattern:$0x73625140]  ;;  %v5380_v50 = vld.sshfl [vmem:[#allocation1 + $0x28] sm:$0xff pattern:$0x73625140]  ;;  %v824_v45 = vsel %vm648_vm0, %v446_v41, %v628_v38  ;;  %v827_v52 = vsel %vm653_vm2, %v446_v41, %v628_v38  ;;  %v829_v54 = vsel %vm656_vm3, %v628_v38, %v446_v41 }
  0xa4   : > { %1576 = vmatmul.bf16.gmra.mxu1 %v1268_v34  ;;  %1052 = vst [vmem:[#allocation1 + $0x3] ss:$4 sm:$0xff] %v791_v22  ;;  %v821_v22 = vrot.slane %v820_v36, 4  ;;  %v828_v58 = vrot.slane %v827_v52, 4  ;;  %v830_v61 = vrot.slane %v829_v54, 6  ;;  %v463_v54 = vld [vmem:[%s5109_s24 + $0x2a8] sm:$0xff] }
  0xa5   : > { %1053 = vst [vmem:[#allocation1 + $0x20] ss:$4 sm:$0xff] %v793_v30  ;;  %v823_v30 = vrot.slane %v822_v37, 6 }
  0xa6   : > { %1054 = vst [vmem:[#allocation1 + $0x21] ss:$4 sm:$0xff] %v794_v46  ;;  %v825_v46 = vsel %vm650_vm1, %v446_v41, %v628_v38 }
  0xa7   : > { %1055 = vst [vmem:[#allocation1 + $0x22] ss:$4 sm:$0xff] %v796_v43  ;;  %v826_v57 = vrot.slane %v825_v46, 2 }
  0xa8   : > { %1056 = vst [vmem:[#allocation1 + $0x23] ss:$4 sm:$0xff] %v798_v51 }
  0xab   : > { %v1057_v55 = vld.sshfl [vmem:[#allocation1] sm:$0xff pattern:$0x73625140]  ;;  %v5390_v56 = vld.sshfl [vmem:[#allocation1 + $0x8] sm:$0xff pattern:$0x73625140] }
  0xac   : > { %1061 = vst [vmem:[#allocation1] ss:$4 sm:$0xff] %v800_v60  ;;  %v451_v60 = vld [vmem:[%s5109_s24 + $0x248] sm:$0xff] }
  0xad   : > { %1062 = vst [vmem:[#allocation1 + $0x1] ss:$4 sm:$0xff] %v801_v4  ;;  %v630_v4 = vrot.slane %v451_v60, 6 }
  0xae   : > { %1063 = vst [vmem:[#allocation1 + $0x2] ss:$4 sm:$0xff] %v802_v2  ;;  %v450_v2 = vld [vmem:[%s5109_s24 + $0x240] sm:$0xff] }
  0xaf   : > { %v1059_v14 = vld.sshfl [vmem:[#allocation1 + $0x20] sm:$0xff pattern:$0x73625140]  ;;  %v5399_v15 = vld.sshfl [vmem:[#allocation1 + $0x28] sm:$0xff pattern:$0x73625140] }
  0xb0   : > { %v1275_v48 = vpack.c.bf16 %v1059_v14, %v1057_v55  ;;  %1064 = vst [vmem:[#allocation1 + $0x3] ss:$4 sm:$0xff] %v804_v8  ;;  %v837_v8 = vsel %vm656_vm3, %v630_v4, %v450_v2 }
  0xb1   : > { %1065 = vst [vmem:[#allocation1 + $0x20] ss:$4 sm:$0xff] %v806_v9  ;;  %v452_v9 = vld [vmem:[%s5109_s24 + $0x250] sm:$0xff]  ;;  %v838_v63 = vrot.slane %v837_v8, 6 }
  0xb2   : > { %1483 = vmatmul.bf16.vlgmr.msra.gmra.mxu2 %v1275_v48  ;;  %1066 = vst [vmem:[#allocation1 + $0x21] ss:$4 sm:$0xff] %v808_v13  ;;  %v832_v13 = vsel %vm648_vm0, %v450_v2, %v630_v4  ;;  %v840_v17 = vsel %vm650_vm1, %v452_v9, %v631_v10  ;;  %v842_v19 = vsel %vm653_vm2, %v452_v9, %v631_v10 }
  0xb3   : > { %1468 = vmatmul.bf16.gmra.mxu0 %v1269_v6  ;;  %1067 = vst [vmem:[#allocation1 + $0x22] ss:$4 sm:$0xff] %v809_v62  ;;  %v833_v6 = vsel %vm650_vm1, %v450_v2, %v630_v4  ;;  %v839_v25 = vsel %vm648_vm0, %v452_v9, %v631_v10  ;;  %v841_v26 = vrot.slane %v840_v17, 2 }
  0xb4   : > { %1581 = vmatmul.bf16.gmra.mxu1 %v1270_v7  ;;  %1068 = vst [vmem:[#allocation1 + $0x23] ss:$4 sm:$0xff] %v811_v49  ;;  %v835_v7 = vsel %vm653_vm2, %v450_v2, %v630_v4  ;;  %v834_v14 = vrot.slane %v833_v6, 2  ;;  %v636_v4 = vrot.slane %v463_v54, 6 }
  0xb5   : > { %v836_v48 = vrot.slane %v835_v7, 4 }
  0xb7   : > { %v1069_v33 = vld.sshfl [vmem:[#allocation1] sm:$0xff pattern:$0x73625140]  ;;  %v1070_v34 = vld.sshfl [vmem:[#allocation1 + $0x8] sm:$0xff pattern:$0x73625140] }
  0xb8   : > { %1073 = vst [vmem:[#allocation1] ss:$4 sm:$0xff] %v813_v24  ;;  %v844_v24 = vsel %vm656_vm3, %v631_v10, %v452_v9  ;;  %v461_v9 = vld [vmem:[%s5109_s24 + $0x298] sm:$0x3] }
  0xb9   : > { %1074 = vst [vmem:[#allocation1 + $0x1] ss:$4 sm:$0xff] %v815_v27  ;;  %v455_v27 = vld [vmem:[%s5109_s24 + $0x268] sm:$0x3] }
  0xba   : > { %1075 = vst [vmem:[#allocation1 + $0x2] ss:$4 sm:$0xff] %v816_v35  ;;  %v845_v35 = vrot.slane %v844_v24, 6  ;;  %v632_v38 = vrot.slane %v455_v27, 6 }
  0xbb   : > { %v1071_v31 = vld.sshfl [vmem:[#allocation1 + $0x20] sm:$0xff pattern:$0x73625140]  ;;  %v1072_v43 = vld.sshfl [vmem:[#allocation1 + $0x28] sm:$0xff pattern:$0x73625140] }
  0xbc   : > { %v1278_v44 = vpack.c.bf16 %v1072_v43, %v1070_v34  ;;  %1076 = vst [vmem:[#allocation1 + $0x3] ss:$4 sm:$0xff] %v817_v39  ;;  %v1277_v51 = vpack.c.bf16 %v1071_v31, %v1069_v33  ;;  %v633_v33 = vrot.slane %v457_v18, 6  ;;  %v843_v34 = vrot.slane %v842_v19, 4  ;;  %v454_v39 = vld [vmem:[%s5109_s24 + $0x260] sm:$0x3] }
  0xbd   : > { %1077 = vst [vmem:[#allocation1 + $0x20] ss:$4 sm:$0xff] %v819_v40  ;;  %v634_v40 = vrot.slane %v459_v32, 6  ;;  %v846_v31 = vsel %vm648_vm0, %v454_v39, %v632_v38 }
  0xbe   : > { %1601 = vmatmul.bf16.vlgmr.msra.gmra.mxu3 %v1278_v44  ;;  %1078 = vst [vmem:[#allocation1 + $0x21] ss:$4 sm:$0xff] %v821_v22  ;;  %v848_v41 = vsel %vm650_vm1, %v456_v29, %v633_v33  ;;  %v458_v22 = vld [vmem:[%s5109_s24 + $0x280] sm:$0xff]  ;;  %v847_v44 = vsel %vm648_vm0, %v456_v29, %v633_v33 }
  0xbf   : > { %1079 = vst [vmem:[#allocation1 + $0x22] ss:$4 sm:$0xff] %v823_v30  ;;  %v852_v30 = vsel %vm656_vm3, %v633_v33, %v456_v29  ;;  %v855_v46 = vsel %vm650_vm1, %v458_v22, %v634_v40  ;;  %v854_v59 = vsel %vm648_vm0, %v458_v22, %v634_v40 }
  0xc0   : > { %1080 = vst [vmem:[#allocation1 + $0x23] ss:$4 sm:$0xff] %v824_v45  ;;  %v849_v45 = vrot.slane %v848_v41, 2  ;;  %v853_v53 = vrot.slane %v852_v30, 6  ;;  %v856_v60 = vrot.slane %v855_v46, 2  ;;  %v1272_v46 = vpack.c.bf16 %v5354_v23, %v5347_v12 }
  0xc1   : > { %v466_v23 = vld [vmem:[%s5109_s24 + $0x2c0] sm:$0x3] }
  0xc2   : > { %1488 = vmatmul.bf16.gmra.mxu2 %v1277_v51  ;;  %v857_v51 = vsel %vm653_vm2, %v458_v22, %v634_v40 }
  0xc3   : > { %v1081_v5 = vld.sshfl [vmem:[#allocation1] sm:$0xff pattern:$0x73625140]  ;;  %v1082_v55 = vld.sshfl [vmem:[#allocation1 + $0x8] sm:$0xff pattern:$0x73625140] }
  0xc4   : > { %1085 = vst [vmem:[#allocation1] ss:$4 sm:$0xff] %v826_v57  ;;  %v850_v57 = vsel %vm653_vm2, %v456_v29, %v633_v33  ;;  %1586 = vmatmul.bf16.gmra.mxu1 %v1272_v46 }
  0xc5   : > { %1086 = vst [vmem:[#allocation1 + $0x1] ss:$4 sm:$0xff] %v828_v58  ;;  %v465_v58 = vld [vmem:[%s5109_s24 + $0x2b8] sm:$0xff] }
  0xc6   : > { %1087 = vst [vmem:[#allocation1 + $0x2] ss:$4 sm:$0xff] %v830_v61  ;;  %v858_v61 = vrot.slane %v857_v51, 4  ;;  %v637_v2 = vrot.slane %v465_v58, 6  ;;  %v467_v51 = vld [vmem:[%s5109_s24 + $0x2c8] sm:$0x3] }
  0xc7   : > { %v1083_v62 = vld.sshfl [vmem:[#allocation1 + $0x20] sm:$0xff pattern:$0x73625140]  ;;  %v1084_v49 = vld.sshfl [vmem:[#allocation1 + $0x28] sm:$0xff pattern:$0x73625140] }
  0xc8   : > { %1088 = vst [vmem:[#allocation1 + $0x3] ss:$4 sm:$0xff] %v831_v3  ;;  %v1280_v16 = vpack.c.bf16 %v1084_v49, %v1082_v55  ;;  %v1279_v28 = vpack.c.bf16 %v1083_v62, %v1081_v5  ;;  %v851_v5 = vrot.slane %v850_v57, 4  ;;  %v462_v55 = vld [vmem:[%s5109_s24 + $0x2a0] sm:$0xff]  ;;  %v464_v3 = vld [vmem:[%s5109_s24 + $0x2b0] sm:$0xff] }
  0xc9   : > { %1089 = vst [vmem:[#allocation1 + $0x20] ss:$4 sm:$0xff] %v832_v13  ;;  %v865_v6 = vsel %vm653_vm2, %v462_v55, %v636_v4  ;;  %v867_v7 = vsel %vm656_vm3, %v636_v4, %v462_v55  ;;  %v870_v8 = vsel %vm650_vm1, %v464_v3, %v637_v2  ;;  %v469_v13 = vld [vmem:[%s5109_s24 + $0x2d8] sm:$0xff]  ;;  %v460_v49 = vld [vmem:[%s5109_s24 + $0x290] sm:$0x3]  ;;  %v862_v32 = vsel %vm648_vm0, %v462_v55, %v636_v4 }
  0xca   : > { %1090 = vst [vmem:[#allocation1 + $0x21] ss:$4 sm:$0xff] %v834_v14  ;;  %v866_v10 = vrot.slane %v865_v6, 4  ;;  %v868_v14 = vrot.slane %v867_v7, 6  ;;  %v871_v62 = vrot.slane %v870_v8, 2  ;;  %v639_v19 = vrot.slane %v469_v13, 6 }
  0xcb   : > { %1091 = vst [vmem:[#allocation1 + $0x22] ss:$4 sm:$0xff] %v836_v48  ;;  %v859_v48 = vsel %vm656_vm3, %v634_v40, %v458_v22  ;;  %v470_v22 = vld [vmem:[%s5109_s24 + $0x2e0] sm:$0xff]  ;;  %v874_v58 = vsel %vm656_vm3, %v637_v2, %v464_v3 }
  0xcc   : > { %1092 = vst [vmem:[#allocation1 + $0x23] ss:$4 sm:$0xff] %v838_v63  ;;  %v635_v63 = vrot.slane %v461_v9, 6  ;;  %v860_v24 = vrot.slane %v859_v48, 6 }
  0xce   : > { %1606 = vmatmul.bf16.gmra.mxu3 %v1280_v16  ;;  %v869_v16 = vsel %vm648_vm0, %v464_v3, %v637_v2 }
  0xcf   : > { %v5438_v36 = vld.sshfl [vmem:[#allocation1] sm:$0xff pattern:$0x73625140]  ;;  %v5440_v37 = vld.sshfl [vmem:[#allocation1 + $0x8] sm:$0xff pattern:$0x73625140] }
  0xd0   : > { %1097 = vst [vmem:[#allocation1] ss:$4 sm:$0xff] %v839_v25  ;;  %v863_v25 = vsel %vm650_vm1, %v462_v55, %v636_v4  ;;  %v875_v4 = vrot.slane %v874_v58, 6 }
  0xd1   : > { %1098 = vst [vmem:[#allocation1 + $0x1] ss:$4 sm:$0xff] %v841_v26  ;;  %v468_v26 = vld [vmem:[%s5109_s24 + $0x2d0] sm:$0xff]  ;;  %v864_v33 = vrot.slane %v863_v25, 2  ;;  %v479_v25 = vld [vmem:[%s5109_s24 + $0x328] sm:$0x3] }
  0xd2   : > { %1493 = vmatmul.bf16.gmra.mxu2 %v1279_v28  ;;  %1099 = vst [vmem:[#allocation1 + $0x2] ss:$4 sm:$0xff] %v843_v34  ;;  %v861_v28 = vsel %vm648_vm0, %v460_v49, %v635_v63  ;;  %v471_v34 = vld [vmem:[%s5109_s24 + $0x2e8] sm:$0xff]  ;;  %v880_v38 = vsel %vm653_vm2, %v468_v26, %v639_v19  ;;  %v882_v39 = vsel %vm656_vm3, %v639_v19, %v468_v26  ;;  %v473_v49 = vld [vmem:[%s5109_s24 + $0x2f8] sm:$0x3] }
  0xd3   : > { %1100 = vst [vmem:[#allocation1 + $0x3] ss:$4 sm:$0xff] %v845_v35  ;;  %v5447_v43 = vld.sshfl [vmem:[#allocation1 + $0x20] sm:$0xff pattern:$0x73625140]  ;;  %v878_v35 = vsel %vm650_vm1, %v468_v26, %v639_v19  ;;  %v640_v40 = vrot.slane %v471_v34, 6  ;;  %v877_v9 = vsel %vm648_vm0, %v468_v26, %v639_v19 }
  0xd4   : > { %v5452_v52 = vld.sshfl [vmem:[#allocation1 + $0x28] sm:$0xff pattern:$0x73625140]  ;;  %v879_v41 = vrot.slane %v878_v35, 2  ;;  %v881_v30 = vrot.slane %v880_v38, 4  ;;  %v641_v34 = vrot.slane %v473_v49, 6  ;;  %v1273_v49 = vpack.c.bf16 %v5378_v47, %v5370_v42 }
  0xd5   : > { %1101 = vst [vmem:[#allocation1 + $0x20] ss:$4 sm:$0xff] %v846_v31  ;;  %v475_v31 = vld [vmem:[%s5109_s24 + $0x308] sm:$0xff]  ;;  %v885_v63 = vsel %vm650_vm1, %v470_v22, %v640_v40  ;;  %v887_v19 = vsel %vm653_vm2, %v470_v22, %v640_v40  ;;  %v889_v26 = vsel %vm656_vm3, %v640_v40, %v470_v22  ;;  %v5533_v35 = vld [vmem:[%s5109_s24 + $0x330] sm:$0xff] }
  0xd6   : > { %1102 = vst [vmem:[#allocation1 + $0x21] ss:$4 sm:$0xff] %v847_v44  ;;  %v883_v44 = vrot.slane %v882_v39, 6  ;;  %v888_v38 = vrot.slane %v887_v19, 4  ;;  %v472_v39 = vld [vmem:[%s5109_s24 + $0x2f0] sm:$0x3] }
  0xd7   : > { %1103 = vst [vmem:[#allocation1 + $0x22] ss:$4 sm:$0xff] %v849_v45  ;;  %v1271_v45 = vpack.c.bf16 %v5352_v20, %v5345_v11  ;;  %v638_v11 = vrot.slane %v467_v51, 6  ;;  %v474_v20 = vld [vmem:[%s5109_s24 + $0x300] sm:$0xff]  ;;  %v484_v42 = vld [vmem:[%s5109_s24 + $0x350] sm:$0x3] }
  0xd8   : > { %1104 = vst [vmem:[#allocation1 + $0x23] ss:$4 sm:$0xff] %v851_v5  ;;  %v5506_v5 = vpop.f32.mrf.mxu1 }
  0xd9   : > { %1473 = vmatmul.bf16.gmra.mxu0 %v1271_v45 }
  0xda   : > { %v5458_v0 = vld.sshfl [vmem:[#allocation1] sm:$0xff pattern:$0x73625140]  ;;  %v5460_v1 = vld.sshfl [vmem:[#allocation1 + $0x8] sm:$0xff pattern:$0x73625140] }
  0xdb   : > { %1109 = vst [vmem:[#allocation1] ss:$4 sm:$0xff] %v853_v53  ;;  %v872_v53 = vsel %vm653_vm2, %v464_v3, %v637_v2  ;;  %v876_v3 = vsel %vm648_vm0, %v466_v23, %v638_v11  ;;  %v476_v11 = vld [vmem:[%s5109_s24 + $0x310] sm:$0xff]  ;;  %v485_v23 = vld [vmem:[%s5109_s24 + $0x358] sm:$0x3] }
  0xdc   : > { %1110 = vst [vmem:[#allocation1 + $0x1] ss:$4 sm:$0xff] %v854_v59  ;;  %v884_v59 = vsel %vm648_vm0, %v470_v22, %v640_v40  ;;  %v873_v12 = vrot.slane %v872_v53, 4  ;;  %v890_v40 = vrot.slane %v889_v26, 6  ;;  %v477_v22 = vld [vmem:[%s5109_s24 + $0x318] sm:$0xff]  ;;  %v891_v53 = vsel %vm648_vm0, %v472_v39, %v641_v34 }
  0xdd   : > { %1111 = vst [vmem:[#allocation1 + $0x2] ss:$4 sm:$0xff] %v856_v60  ;;  %v642_v60 = vrot.slane %v475_v31, 6  ;;  %v644_v31 = vrot.slane %v479_v25, 6  ;;  %v643_v58 = vrot.slane %v477_v22, 6 }
  0xde   : > { %1112 = vst [vmem:[#allocation1 + $0x3] ss:$4 sm:$0xff] %v858_v61  ;;  %v5504_v61 = vpop.f32.mrf.mxu0  ;;  %v5587_v26 = vld [vmem:[%s6866_s3] ss:$0 sm:$0xff] }
  0xdf   : > { %v5478_v27 = vld.sshfl [vmem:[#allocation1 + $0x20] sm:$0xff pattern:$0x73625140]  ;;  %v5481_v29 = vld.sshfl [vmem:[#allocation1 + $0x28] sm:$0xff pattern:$0x73625140]  ;;  %v893_v2 = vsel %vm650_vm1, %v474_v20, %v642_v60  ;;  %v895_v7 = vsel %vm653_vm2, %v474_v20, %v642_v60  ;;  %v897_v8 = vsel %vm656_vm3, %v642_v60, %v474_v20  ;;  %v892_v13 = vsel %vm648_vm0, %v474_v20, %v642_v60 }
  0xe0   : > { %1113 = vst [vmem:[#allocation1 + $0x20] ss:$4 sm:$0xff] %v860_v24  ;;  %v896_v48 = vrot.slane %v895_v7, 4  ;;  %v1281_v20 = vpack.c.bf16 %v5447_v43, %v5438_v36  ;;  %v1548_v36 = vadd.f32 %v5506_v5, %v5504_v61  ;;  %v900_v43 = vsel %vm650_vm1, %v476_v11, %v643_v58 }
  0xe1   : > { %1114 = vst [vmem:[#allocation1 + $0x21] ss:$4 sm:$0xff] %v861_v28  ;;  %v899_v61 = vsel %vm648_vm0, %v476_v11, %v643_v58  ;;  %v901_v5 = vrot.slane %v900_v43, 2 }
  0xe2   : > { %1115 = vst [vmem:[#allocation1 + $0x22] ss:$4 sm:$0xff] %v862_v32  ;;  %v886_v32 = vrot.slane %v885_v63, 2  ;;  %1498 = vmatmul.bf16.gmra.mxu2 %v1281_v20  ;;  %v1274_v63 = vpack.c.bf16 %v5380_v50, %v5372_v21  ;;  %v1283_v20 = vpack.c.bf16 %v5478_v27, %v5458_v0 }
  0xe3   : > { %1116 = vst [vmem:[#allocation1 + $0x23] ss:$4 sm:$0xff] %v864_v33 }
  0xe4   : > { %1591 = vmatmul.bf16.gmra.mxu1 %v1274_v63 }
  0xe5   : > { %v5472_v17 = vld.sshfl [vmem:[#allocation1] sm:$0xff pattern:$0x73625140]  ;;  %v5474_v18 = vld.sshfl [vmem:[#allocation1 + $0x8] sm:$0xff pattern:$0x73625140] }
  0xe6   : > { %1121 = vst [vmem:[#allocation1] ss:$4 sm:$0xff] %v866_v10  ;;  %v481_v10 = vld [vmem:[%s5109_s24 + $0x338] sm:$0xff]  ;;  %v5530_v33 = vpop.f32.mrf.mxu0 }
  0xe7   : > { %1122 = vst [vmem:[#allocation1 + $0x1] ss:$4 sm:$0xff] %v868_v14  ;;  %v894_v14 = vrot.slane %v893_v2, 2  ;;  %v5528_v28 = vrot.slane %v481_v10, 6  ;;  %v902_v10 = vsel %vm653_vm2, %v476_v11, %v643_v58 }
  0xe8   : > { %1123 = vst [vmem:[#allocation1 + $0x2] ss:$4 sm:$0xff] %v869_v16 }
  0xe9   : > { %1124 = vst [vmem:[#allocation1 + $0x3] ss:$4 sm:$0xff] %v871_v62  ;;  %v898_v62 = vrot.slane %v897_v8, 6  ;;  %v908_v46 = vsel %vm650_vm1, %v5533_v35, %v5528_v28  ;;  %v910_v51 = vsel %vm653_vm2, %v5533_v35, %v5528_v28  ;;  %1478 = vmatmul.bf16.gmra.mxu0 %v1273_v49 }
  0xea   : > { %v5508_v55 = vld.sshfl [vmem:[#allocation1 + $0x20] sm:$0xff pattern:$0x73625140]  ;;  %v5512_v6 = vld.sshfl [vmem:[#allocation1 + $0x28] sm:$0xff pattern:$0x73625140] }
  0xeb   : > { %1125 = vst [vmem:[#allocation1 + $0x20] ss:$4 sm:$0xff] %v873_v12  ;;  %v1282_v12 = vpack.c.bf16 %v5452_v52, %v5440_v37  ;;  %v909_v2 = vrot.slane %v908_v46, 2  ;;  %v5571_v37 = vld [vmem:[%s6865_s2] ss:$0 sm:$0xff]  ;;  %v912_v46 = vsel %vm656_vm3, %v5528_v28, %v5533_v35 }
  0xec   : > { %1126 = vst [vmem:[#allocation1 + $0x21] ss:$4 sm:$0xff] %v875_v4  ;;  %v907_v4 = vsel %vm648_vm0, %v5533_v35, %v5528_v28  ;;  %v482_v52 = vld [vmem:[%s5109_s24 + $0x340] sm:$0xff]  ;;  %v1655_v25 = vmul.f32 %v5571_v37, %v1548_v36 }
  0xed   : > { %1127 = vst [vmem:[#allocation1 + $0x22] ss:$4 sm:$0xff] %v876_v3  ;;  %v911_v3 = vrot.slane %v910_v51, 4  ;;  %1611 = vmatmul.bf16.gmra.mxu3 %v1282_v12  ;;  %v1284_v12 = vpack.c.bf16 %v5481_v29, %v5460_v1 }
  0xee   : > { %1128 = vst [vmem:[#allocation1 + $0x23] ss:$4 sm:$0xff] %v877_v9  ;;  %v1700_v47 = vadd.f32 %v5587_v26, %v1655_v25 }
  0xf0   : > { %v5496_v54 = vld.sshfl [vmem:[#allocation1] sm:$0xff pattern:$0x73625140]  ;;  %v5498_v57 = vld.sshfl [vmem:[#allocation1 + $0x8] sm:$0xff pattern:$0x73625140] }
  0xf1   : > { %1133 = vst [vmem:[#allocation1] ss:$4 sm:$0xff] %v879_v41  ;;  %v5536_v41 = vpop.f32.mrf.mxu1 }
  0xf2   : > { %1134 = vst [vmem:[#allocation1 + $0x1] ss:$4 sm:$0xff] %v881_v30  ;;  %v478_v30 = vld [vmem:[%s5109_s24 + $0x320] sm:$0x3]  ;;  %1503 = vmatmul.bf16.gmra.mxu2 %v1283_v20 }
  0xf3   : > { %1135 = vst [vmem:[#allocation1 + $0x2] ss:$4 sm:$0xff] %v883_v44  ;;  %v906_v60 = vsel %vm648_vm0, %v478_v30, %v644_v31 }
  0xf4   : > { %1136 = vst [vmem:[#allocation1 + $0x3] ss:$4 sm:$0xff] %v884_v59  ;;  %v483_v59 = vld [vmem:[%s5109_s24 + $0x348] sm:$0xff] }
  0xf5   : > { %v5540_v44 = vld.sshfl [vmem:[#allocation1 + $0x20] sm:$0xff pattern:$0x73625140]  ;;  %v5542_v45 = vld.sshfl [vmem:[#allocation1 + $0x28] sm:$0xff pattern:$0x73625140] }
  0xf6   : > { %1137 = vst [vmem:[#allocation1 + $0x20] ss:$4 sm:$0xff] %v886_v32  ;;  %v646_v9 = vrot.slane %v483_v59, 6  ;;  %v903_v32 = vrot.slane %v902_v10, 4  ;;  %v1276_v10 = vpack.c.bf16 %v5399_v15, %v5390_v56 }
  0xf7   : > { %1138 = vst [vmem:[#allocation1 + $0x21] ss:$4 sm:$0xff] %v888_v38 }
  0xf8   : > { %1139 = vst [vmem:[#allocation1 + $0x22] ss:$4 sm:$0xff] %v890_v40  ;;  %v919_v19 = vsel %vm656_vm3, %v646_v9, %v482_v52  ;;  %v914_v35 = vsel %vm648_vm0, %v482_v52, %v646_v9  ;;  %v917_v0 = vsel %vm653_vm2, %v482_v52, %v646_v9  ;;  %1596 = vmatmul.bf16.gmra.mxu1 %v1276_v10 }
  0xf9   : > { %1140 = vst [vmem:[#allocation1 + $0x23] ss:$4 sm:$0xff] %v891_v53  ;;  %v920_v21 = vrot.slane %v919_v19, 6 }
  0xfb   : > { %v5521_v16 = vld.sshfl [vmem:[#allocation1] sm:$0xff pattern:$0x73625140]  ;;  %v5523_v24 = vld.sshfl [vmem:[#allocation1 + $0x8] sm:$0xff pattern:$0x73625140] }
  0xfc   : > { %1145 = vst [vmem:[#allocation1] ss:$4 sm:$0xff] %v892_v13  ;;  %v904_v13 = vsel %vm656_vm3, %v643_v58, %v476_v11  ;;  %v1741_v58 = vmax.f32 %v1700_v47, 0.0  ;;  %v1550_v11 = vadd.f32 %v5536_v41, %v5530_v33  ;;  %v915_v33 = vsel %vm650_vm1, %v482_v52, %v646_v9 }
  0xfd   : > { %1146 = vst [vmem:[#allocation1 + $0x1] ss:$4 sm:$0xff] %v894_v14  ;;  %v1439_v14 = vpop.f32.mrf.mxu0  ;;  %v905_v34 = vrot.slane %v904_v13, 6  ;;  %1616 = vmatmul.bf16.gmra.mxu3 %v1284_v12  ;;  %v916_v9 = vrot.slane %v915_v33, 2  ;;  %v1285_v47 = vpack.c.bf16 %v5508_v55, %v5472_v17 }
  0xfe   : > { %1147 = vst [vmem:[#allocation1 + $0x2] ss:$4 sm:$0xff] %v896_v48  ;;  %v1552_v48 = vpop.f32.mrf.mxu1  ;;  %v1656_v1 = vmul.f32 %v5571_v37, %v1550_v11 }
  0xff   : > { %1148 = vst [vmem:[#allocation1 + $0x3] ss:$4 sm:$0xff] %v898_v62  ;;  %v647_v62 = vrot.slane %v485_v23, 6  ;;  %v1553_v51 = vadd.f32 %v1552_v48, %v1439_v14  ;;  %v1824_v48 = vrot.slane %v1741_v58, 4 }
 0x100   : > { %v5589_v38 = vld.sshfl [vmem:[#allocation1 + $0x20] sm:$0xff pattern:$0x73625140]  ;;  %v5591_v39 = vld.sshfl [vmem:[#allocation1 + $0x28] sm:$0xff pattern:$0x73625140] }
 0x101   : > { %1149 = vst [vmem:[#allocation1 + $0x20] ss:$4 sm:$0xff] %v899_v61  ;;  %v921_v50 = vsel %vm648_vm0, %v484_v42, %v647_v62  ;;  %v1657_v23 = vmul.f32 %v5571_v37, %v1553_v51  ;;  %v1825_v62 = vrot.slane %v1741_v58, 6  ;;  %v918_v61 = vrot.slane %v917_v0, 4 }
 0x102   : > { %1150 = vst [vmem:[#allocation1 + $0x21] ss:$4 sm:$0xff] %v901_v5  ;;  %v1701_v5 = vadd.f32 %v5587_v26, %v1656_v1  ;;  %1508 = vmatmul.bf16.gmra.mxu2 %v1285_v47 }
 0x103   : > { %1151 = vst [vmem:[#allocation1 + $0x22] ss:$4 sm:$0xff] %v903_v32  ;;  %v1702_v41 = vadd.f32 %v5587_v26, %v1657_v23  ;;  %v1944_v23 = vlaneseq }
 0x104   : > { %1152 = vst [vmem:[#allocation1 + $0x23] ss:$4 sm:$0xff] %v905_v34  ;;  %v1742_v34 = vmax.f32 %v1701_v5, 0.0 }
 0x105   : > { %v1441_v30 = vpop.f32.mrf.mxu0  ;;  %v1743_v49 = vmax.f32 %v1702_v41, 0.0 }
 0x106   : > { %v5562_v7 = vld.sshfl [vmem:[#allocation1] sm:$0xff pattern:$0x73625140]  ;;  %v5564_v8 = vld.sshfl [vmem:[#allocation1 + $0x8] sm:$0xff pattern:$0x73625140]  ;;  %v1554_v31 = vpop.f32.mrf.mxu1 }
 0x107   : > { %1157 = vst [vmem:[#allocation1] ss:$4 sm:$0xff] %v906_v60  ;;  %v1555_v53 = vadd.f32 %v1554_v31, %v1441_v30  ;;  %v913_v60 = vrot.slane %v912_v46, 6  ;;  %v1826_v31 = vrot.slane %v1742_v34, 2  ;;  %v1827_v46 = vrot.slane %v1742_v34, 4 }
 0x108   : > { %1158 = vst [vmem:[#allocation1 + $0x1] ss:$4 sm:$0xff] %v907_v4  ;;  %v1828_v51 = vrot.slane %v1742_v34, 6  ;;  %v1829_v17 = vrot.slane %v1743_v49, 2  ;;  %v1831_v11 = vrot.slane %v1743_v49, 6 }
 0x109   : > { %1159 = vst [vmem:[#allocation1 + $0x2] ss:$4 sm:$0xff] %v909_v2  ;;  %v1658_v59 = vmul.f32 %v5571_v37, %v1555_v53 }
 0x10a   : > { %1160 = vst [vmem:[#allocation1 + $0x3] ss:$4 sm:$0xff] %v911_v3  ;;  %v1823_v3 = vrot.slane %v1741_v58, 2 }
 0x10b   : > { %v1703_v28 = vadd.f32 %v5587_v26, %v1658_v59  ;;  %v5613_v4 = vld.sshfl [vmem:[#allocation1 + $0x20] sm:$0xff pattern:$0x73625140]  ;;  %v5615_v2 = vld.sshfl [vmem:[#allocation1 + $0x28] sm:$0xff pattern:$0x73625140] }
 0x10c   : > { %1161 = vst [vmem:[#allocation1 + $0x20] ss:$4 sm:$0xff] %v913_v60 }
 0x10d   : > { %v1444_v27 = vpop.f32.mrf.mxu0  ;;  %1162 = vst [vmem:[#allocation1 + $0x21] ss:$4 sm:$0xff] %v914_v35  ;;  %v1744_v36 = vmax.f32 %v1703_v28, 0.0 }
 0x10e   : > { %v1557_v29 = vpop.f32.mrf.mxu1  ;;  %1163 = vst [vmem:[#allocation1 + $0x22] ss:$4 sm:$0xff] %v916_v9  ;;  %v1288_v9 = vpack.c.bf16 %v5542_v45, %v5498_v57 }
 0x10f   : > { %v1558_v43 = vadd.f32 %v1557_v29, %v1444_v27  ;;  %v1832_v56 = vrot.slane %v1744_v36, 2  ;;  %v1833_v15 = vrot.slane %v1744_v36, 4  ;;  %1164 = vst [vmem:[#allocation1 + $0x23] ss:$4 sm:$0xff] %v918_v61  ;;  %v1834_v19 = vrot.slane %v1744_v36, 6 }
 0x110   : > { %v5642_v29 = vshrl.u32 %v1944_v23, 7 }
 0x111   : > { %v5596_v40 = vld.sshfl [vmem:[#allocation1] sm:$0xff pattern:$0x73625140]  ;;  %v5598_v22 = vld.sshfl [vmem:[#allocation1 + $0x8] sm:$0xff pattern:$0x73625140]  ;;  %v1659_v52 = vmul.f32 %v5571_v37, %v1558_v43 }
 0x112   : > { %1169 = vst [vmem:[#allocation1] ss:$4 sm:$0xff] %v920_v21  ;;  %vm1948_vm5 = vcmp.ge.s32.totalorder %v5642_v29, 1 }
 0x113   : > { %1170 = vst [vmem:[#allocation1 + $0x1] ss:$4 sm:$0xff] %v921_v50  ;;  %v1704_v63 = vadd.f32 %v5587_v26, %v1659_v52  ;;  %v1286_v50 = vpack.c.bf16 %v5512_v6, %v5474_v18  ;;  %v1830_v6 = vrot.slane %v1743_v49, 4 }
 0x115   : > { %v1446_v25 = vpop.f32.mrf.mxu0  ;;  %v1745_v42 = vmax.f32 %v1704_v63, 0.0  ;;  %1621 = vmatmul.bf16.gmra.mxu3 %v1286_v50 }
 0x116   : > { %v1559_v32 = vpop.f32.mrf.mxu1  ;;  %v5635_v53 = vld.sshfl [vmem:[#allocation1 + $0x20] sm:$0xff pattern:$0x73625140] }
 0x117   : > { %v1560_v21 = vadd.f32 %v1559_v32, %v1446_v25  ;;  %v1836_v35 = vrot.slane %v1745_v42, 4  ;;  %v1835_v43 = vrot.slane %v1745_v42, 2  ;;  %v5664_v32 = vadd.s32 16, %v5642_v29 }
 0x119   : > { %v1660_v30 = vmul.f32 %v5571_v37, %v1560_v21  ;;  %vm1959_vm6 = vcmp.le.s32.totalorder %v5664_v32, 16 }
 0x11a   : > { %v5623_v13 = vld.sshfl [vmem:[#allocation1] sm:$0xff pattern:$0x73625140]  ;;  %v5625_v14 = vld.sshfl [vmem:[#allocation1 + $0x8] sm:$0xff pattern:$0x73625140] }
 0x11b   : > { %1966 = vst [vmem:[#allocation1] ss:$4 sm:$0xff] %v1741_v58  ;;  %v5637_v58 = vld.sshfl [vmem:[#allocation1 + $0x28] sm:$0xff pattern:$0x73625140]  ;;  %v1705_v59 = vadd.f32 %v5587_v26, %v1660_v30 }
 0x11c   : > { %1968 = vst [vmem:[#allocation1 + $0x1] ss:$4 sm:$0xff] %v1823_v3  ;;  %v1837_v3 = vrot.slane %v1745_v42, 6 }
 0x11d   : > { %1970 = vst [vmem:[#allocation1 + $0x2] ss:$4 sm:$0xff] %v1824_v48  ;;  %v1449_v55 = vpop.f32.mrf.mxu0  ;;  %v1746_v20 = vmax.f32 %v1705_v59, 0.0 }
 0x11e   : > { %1972 = vst [vmem:[#allocation1 + $0x3] ss:$4 sm:$0xff] %v1825_v62  ;;  %v1562_v18 = vpop.f32.mrf.mxu1 }
 0x11f   : > { %1983 = vst [vmem:[#allocation1] ss:$4 sm:$0xff] %v1743_v49  ;;  %v1563_v60 = vadd.f32 %v1562_v18, %v1449_v55  ;;  %v1838_v33 = vrot.slane %v1746_v20, 2  ;;  %v1839_v45 = vrot.slane %v1746_v20, 4  ;;  %v1290_v55 = vpack.c.bf16 %v5591_v39, %v5523_v24 }
 0x120   : > { %1990 = vst [vmem:[#allocation1] ss:$4 sm:$0xff] %v1832_v56 }
 0x121   : > { %1991 = vst [vmem:[#allocation1 + $0x1] ss:$4 sm:$0xff] %v1833_v15  ;;  %v1661_v12 = vmul.f32 %v5571_v37, %v1563_v60 }
 0x122   : > { %1992 = vst [vmem:[#allocation1 + $0x2] ss:$4 sm:$0xff] %v1834_v19  ;;  %v1840_v19 = vrot.slane %v1746_v20, 6 }
 0x123   : > { %1993 = vst [vmem:[#allocation1 + $0x3] ss:$4 sm:$0xff] %v1745_v42  ;;  %v1706_v0 = vadd.f32 %v5587_v26, %v1661_v12 }
 0x124   : > { %1974 = vst [vmem:[#allocation1 + $0x20] ss:$4 sm:$0xff] %v1742_v34 }
 0x125   : > { %1976 = vst [vmem:[#allocation1 + $0x21] ss:$4 sm:$0xff] %v1826_v31  ;;  %v1451_v1 = vpop.f32.mrf.mxu0  ;;  %v5644_v10 = vmax.f32 %v1706_v0, 0.0  ;;  %1626 = vmatmul.bf16.gmra.mxu3 %v1288_v9  ;;  %v1292_v9 = vpack.c.bf16 %v5615_v2, %v5564_v8 }
 0x126   : > { %1978 = vst [vmem:[#allocation1 + $0x22] ss:$4 sm:$0xff] %v1827_v46  ;;  %v1564_v27 = vpop.f32.mrf.mxu1 }
 0x127   : > { %1980 = vst [vmem:[#allocation1 + $0x23] ss:$4 sm:$0xff] %v1828_v51  ;;  %v1565_v41 = vadd.f32 %v1564_v27, %v1451_v1  ;;  %v1842_v62 = vrot.slane %v5644_v10, 4  ;;  %v1841_v42 = vrot.slane %v5644_v10, 2 }
 0x128   : > { %1985 = vst [vmem:[#allocation1 + $0x20] ss:$4 sm:$0xff] %v1829_v17  ;;  %v1289_v17 = vpack.c.bf16 %v5589_v38, %v5521_v16  ;;  %v1843_v16 = vrot.slane %v5644_v10, 6 }
 0x129   : > { %1986 = vst [vmem:[#allocation1 + $0x21] ss:$4 sm:$0xff] %v1830_v6  ;;  %v1662_v48 = vmul.f32 %v5571_v37, %v1565_v41 }
 0x12a   : > { %v1995_v28 = vld.sshfl [vmem:[#allocation1] sm:$0xff pattern:$0x73625140]  ;;  %1987 = vst [vmem:[#allocation1 + $0x22] ss:$4 sm:$0xff] %v1831_v11 }
 0x12b   : > { %1988 = vst [vmem:[#allocation1 + $0x23] ss:$4 sm:$0xff] %v1744_v36  ;;  %v1287_v36 = vpack.c.bf16 %v5540_v44, %v5496_v54  ;;  %v1707_v61 = vadd.f32 %v5587_v26, %v1662_v48 }
 0x12c   : > { %1997 = vst [vmem:[#allocation1] ss:$4 sm:$0xff] %v1836_v35 }
 0x12d   : > { %1998 = vst [vmem:[#allocation1 + $0x1] ss:$4 sm:$0xff] %v1837_v3  ;;  %1513 = vmatmul.bf16.gmra.mxu2 %v1287_v36  ;;  %v1454_v49 = vpop.f32.mrf.mxu0  ;;  %v1748_v63 = vmax.f32 %v1707_v61, 0.0  ;;  %v1291_v36 = vpack.c.bf16 %v5613_v4, %v5562_v7 }
 0x12e   : > { %1999 = vst [vmem:[#allocation1 + $0x2] ss:$4 sm:$0xff] %v1746_v20  ;;  %v1567_v54 = vpop.f32.mrf.mxu1 }
 0x12f   : > { %2000 = vst [vmem:[#allocation1 + $0x3] ss:$4 sm:$0xff] %v1838_v33  ;;  %v1568_v57 = vadd.f32 %v1567_v54, %v1454_v49  ;;  %v1846_v21 = vrot.slane %v1748_v63, 6  ;;  %v1844_v24 = vrot.slane %v1748_v63, 2  ;;  %v1845_v12 = vrot.slane %v1748_v63, 4 }
 0x130   : > { %2303 = vst.msk [vmem:[#allocation2 + $0x20] sm:$0xff] %vm2297_vm4, %v1995_v28 }
 0x131   : > { %v1663_v56 = vmul.f32 %v5571_v37, %v1568_v57 }
 0x132   : > { %v1989_v52 = vld.sshfl [vmem:[#allocation1 + $0x20] sm:$0xff pattern:$0x73625140] }
 0x133   : > { %1994 = vst [vmem:[#allocation1 + $0x20] ss:$4 sm:$0xff] %v1835_v43  ;;  %v2246_v5 = vsel %vm1948_vm5, %v1989_v52, 0.0  ;;  %v1708_v25 = vadd.f32 %v5587_v26, %v1663_v56 }
 0x134   : > { %2302 = vst.msk [vmem:[#allocation2 + $0x18] sm:$0xff] %vm2297_vm4, %v2246_v5 }
 0x135   : > { %v1749_v47 = vmax.f32 %v1708_v25, 0.0  ;;  %v1456_v50 = vpop.f32.mrf.mxu0  ;;  %1631 = vmatmul.bf16.gmra.mxu3 %v1290_v55  ;;  %v1293_v55 = vpack.c.bf16 %v5635_v53, %v5596_v40 }
 0x136   : > { %v2005_v44 = vld.sshfl [vmem:[#allocation1] sm:$0xff pattern:$0x73625140]  ;;  %v1569_v30 = vpop.f32.mrf.mxu1 }
 0x137   : > { %2007 = vst [vmem:[#allocation1] ss:$4 sm:$0xff] %v1842_v62  ;;  %v2249_v15 = vsel %vm1948_vm5, %v2005_v44, 0.0  ;;  %v1847_v31 = vrot.slane %v1749_v47, 2  ;;  %v1570_v46 = vadd.f32 %v1569_v30, %v1456_v50  ;;  %v1848_v59 = vrot.slane %v1749_v47, 4  ;;  %v5691_v62 = vpop.f32.mrf.mxu2 }
 0x138   : > { %2305 = vst.msk [vmem:[#allocation2 + $0x30] sm:$0xff] %vm2297_vm4, %v2249_v15  ;;  %v1849_v43 = vrot.slane %v1749_v47, 6 }
 0x139   : > { %v1664_v18 = vmul.f32 %v5571_v37, %v1570_v46 }
 0x13a   : > { %v1996_v34 = vld.sshfl [vmem:[#allocation1 + $0x20] sm:$0xff pattern:$0x73625140] }
 0x13b   : > { %2001 = vst [vmem:[#allocation1 + $0x20] ss:$4 sm:$0xff] %v1839_v45  ;;  %v2248_v6 = vsel %vm1959_vm6, %v1996_v34, 0.0  ;;  %v1709_v60 = vadd.f32 %v5587_v26, %v1664_v18  ;;  %v1294_v18 = vpack.c.bf16 %v5637_v58, %v5598_v22 }
 0x13c   : > { %2002 = vst [vmem:[#allocation1 + $0x21] ss:$4 sm:$0xff] %v1840_v19 }
 0x13d   : > { %2003 = vst [vmem:[#allocation1 + $0x22] ss:$4 sm:$0xff] %v5644_v10  ;;  %1518 = vmatmul.bf16.gmra.mxu2 %v1289_v17  ;;  %v1459_v38 = vpop.f32.mrf.mxu0  ;;  %v1750_v23 = vmax.f32 %v1709_v60, 0.0 }
 0x13e   : > { %2004 = vst [vmem:[#allocation1 + $0x23] ss:$4 sm:$0xff] %v1841_v42  ;;  %v2008_v51 = vld.sshfl [vmem:[#allocation1] sm:$0xff pattern:$0x73625140]  ;;  %v1572_v39 = vpop.f32.mrf.mxu1 }
 0x13f   : > { %2014 = vst [vmem:[#allocation1] ss:$4 sm:$0xff] %v1846_v21  ;;  %v2251_v11 = vsel %vm1959_vm6, %v2008_v51, 0.0  ;;  %v1573_v28 = vadd.f32 %v1572_v39, %v1459_v38  ;;  %v1850_v3 = vrot.slane %v1750_v23, 2  ;;  %v1851_v33 = vrot.slane %v1750_v23, 4  ;;  %v5698_v56 = vpop.f32.mrf.mxu2 }
 0x140   : > { %2015 = vst [vmem:[#allocation1 + $0x1] ss:$4 sm:$0xff] %v1749_v47  ;;  %v1852_v1 = vrot.slane %v1750_v23, 6 }
 0x141   : > { %2016 = vst [vmem:[#allocation1 + $0x2] ss:$4 sm:$0xff] %v1847_v31  ;;  %v1665_v0 = vmul.f32 %v5571_v37, %v1573_v28 }
 0x142   : > { %2017 = vst [vmem:[#allocation1 + $0x3] ss:$4 sm:$0xff] %v1848_v59  ;;  %v5706_v59 = vpop.f32.mrf.mxu3 }
 0x143   : > { %2304 = vst.msk [vmem:[#allocation2 + $0x28] sm:$0x3] %vm2300_vm7, %v2248_v6  ;;  %v1710_v48 = vadd.f32 %v5587_v26, %v1665_v0 }
 0x144   : > { %2307 = vst.msk [vmem:[#allocation2 + $0x40] sm:$0x3] %vm2300_vm7, %v2251_v11 }
 0x145   : > { %v2006_v20 = vld.sshfl [vmem:[#allocation1 + $0x20] sm:$0xff pattern:$0x73625140]  ;;  %v1461_v27 = vpop.f32.mrf.mxu0  ;;  %v1751_v54 = vmax.f32 %v1710_v48, 0.0  ;;  %1636 = vmatmul.bf16.gmra.mxu3 %v1292_v9 }
 0x146   : > { %2009 = vst [vmem:[#allocation1 + $0x20] ss:$4 sm:$0xff] %v1843_v16  ;;  %v1574_v41 = vpop.f32.mrf.mxu1 }
 0x147   : > { %2010 = vst [vmem:[#allocation1 + $0x21] ss:$4 sm:$0xff] %v1748_v63  ;;  %v1575_v10 = vadd.f32 %v1574_v41, %v1461_v27  ;;  %v1853_v44 = vrot.slane %v1751_v54, 2  ;;  %v1854_v45 = vrot.slane %v1751_v54, 4  ;;  %v1855_v25 = vrot.slane %v1751_v54, 6  ;;  %v5714_v60 = vpop.f32.mrf.mxu2 }
 0x148   : > { %2011 = vst [vmem:[#allocation1 + $0x22] ss:$4 sm:$0xff] %v1844_v24  ;;  %v1295_v41 = vpack.c.bf16 %v5623_v13, %v5623_v13 }
 0x149   : > { %2012 = vst [vmem:[#allocation1 + $0x23] ss:$4 sm:$0xff] %v1845_v12  ;;  %v2019_v35 = vld.sshfl [vmem:[#allocation1] sm:$0xff pattern:$0x73625140]  ;;  %v1666_v52 = vmul.f32 %v5571_v37, %v1575_v10 }
 0x14a   : > { %2306 = vst.msk [vmem:[#allocation2 + $0x38] sm:$0xff] %vm2297_vm4, %v2006_v20  ;;  %v5724_v28 = vpop.f32.mrf.mxu3 }
 0x14b   : > { %2309 = vst.msk [vmem:[#allocation2 + $0x50] sm:$0xff] %vm2297_vm4, %v2019_v35  ;;  %v1711_v5 = vadd.f32 %v5587_v26, %v1666_v52 }
 0x14c   : > { %2021 = vst [vmem:[#allocation1] ss:$4 sm:$0xff] %v1750_v23 }
 0x14d   : > { %2022 = vst [vmem:[#allocation1 + $0x1] ss:$4 sm:$0xff] %v1850_v3  ;;  %1523 = vmatmul.bf16.gmra.mxu2 %v1291_v36  ;;  %v1752_v7 = vmax.f32 %v1711_v5, 0.0  ;;  %v1464_v4 = vpop.f32.mrf.mxu0 }
 0x14e   : > { %2023 = vst [vmem:[#allocation1 + $0x2] ss:$4 sm:$0xff] %v1851_v33  ;;  %v1577_v8 = vpop.f32.mrf.mxu1 }
 0x14f   : > { %2024 = vst [vmem:[#allocation1 + $0x3] ss:$4 sm:$0xff] %v1852_v1  ;;  %v1578_v2 = vadd.f32 %v1577_v8, %v1464_v4  ;;  %v1856_v16 = vrot.slane %v1752_v7, 2  ;;  %v1857_v38 = vrot.slane %v1752_v7, 4  ;;  %v1858_v22 = vrot.slane %v1752_v7, 6  ;;  %v5722_v23 = vpop.f32.mrf.mxu2 }
 0x150   : > { %v2013_v61 = vld.sshfl [vmem:[#allocation1 + $0x20] sm:$0xff pattern:$0x73625140] }
 0x151   : > { %2018 = vst [vmem:[#allocation1 + $0x20] ss:$4 sm:$0xff] %v1849_v43  ;;  %v2252_v49 = vsel %vm1948_vm5, %v2013_v61, 0.0  ;;  %v1667_v63 = vmul.f32 %v5571_v37, %v1578_v2  ;;  %v1296_v43 = vpack.c.bf16 %v5625_v14, %v5625_v14 }
 0x152   : > { %2308 = vst.msk [vmem:[#allocation2 + $0x48] sm:$0xff] %vm2297_vm4, %v2252_v49 }
 0x153   : > { %v1712_v34 = vadd.f32 %v5587_v26, %v1667_v63 }
 0x155   : > { %v1753_v21 = vmax.f32 %v1712_v34, 0.0  ;;  %v1466_v47 = vpop.f32.mrf.mxu0  ;;  %1641 = vmatmul.bf16.gmra.mxu3 %v1294_v18 }
 0x156   : > { %v2029_v57 = vld.sshfl [vmem:[#allocation1] sm:$0xff pattern:$0x73625140]  ;;  %v1579_v50 = vpop.f32.mrf.mxu1 }
 0x157   : > { %2031 = vst [vmem:[#allocation1] ss:$4 sm:$0xff] %v1752_v7  ;;  %v2255_v15 = vsel %vm1948_vm5, %v2029_v57, 0.0  ;;  %v1859_v30 = vrot.slane %v1753_v21, 2  ;;  %v1860_v31 = vrot.slane %v1753_v21, 4  ;;  %v1861_v46 = vrot.slane %v1753_v21, 6  ;;  %v5733_v49 = vpop.f32.mrf.mxu2 }
 0x158   : > { %v2020_v19 = vld.sshfl [vmem:[#allocation1 + $0x20] sm:$0xff pattern:$0x73625140]  ;;  %2311 = vst.msk [vmem:[#allocation2 + $0x60] sm:$0xff] %vm2297_vm4, %v2255_v15  ;;  %v1580_v51 = vadd.f32 %v1579_v50, %v1466_v47 }
 0x159   : > { %2025 = vst [vmem:[#allocation1 + $0x20] ss:$4 sm:$0xff] %v1751_v54  ;;  %v2254_v42 = vsel %vm1959_vm6, %v2020_v19, 0.0  ;;  %v5735_v54 = vpop.f32.mrf.mxu3 }
 0x15a   : > { %2026 = vst [vmem:[#allocation1 + $0x21] ss:$4 sm:$0xff] %v1853_v44  ;;  %v1668_v6 = vmul.f32 %v5571_v37, %v1580_v51 }
 0x15b   : > { %2027 = vst [vmem:[#allocation1 + $0x22] ss:$4 sm:$0xff] %v1854_v45 }
 0x15c   : > { %2028 = vst [vmem:[#allocation1 + $0x23] ss:$4 sm:$0xff] %v1855_v25  ;;  %v1713_v24 = vadd.f32 %v5587_v26, %v1668_v6 }
 0x15d   : > { %2310 = vst.msk [vmem:[#allocation2 + $0x58] sm:$0x3] %vm2300_vm7, %v2254_v42  ;;  %1528 = vmatmul.bf16.gmra.mxu2 %v1293_v55  ;;  %v1469_v53 = vpop.f32.mrf.mxu0 }
 0x15e   : > { %v2032_v17 = vld.sshfl [vmem:[#allocation1] sm:$0xff pattern:$0x73625140]  ;;  %v1582_v58 = vpop.f32.mrf.mxu1  ;;  %v1754_v39 = vmax.f32 %v1713_v24, 0.0 }
 0x15f   : > { %2038 = vst [vmem:[#allocation1] ss:$4 sm:$0xff] %v1859_v30  ;;  %v2257_v11 = vsel %vm1959_vm6, %v2032_v17, 0.0  ;;  %v1583_v20 = vadd.f32 %v1582_v58, %v1469_v53  ;;  %v5745_v34 = vpop.f32.mrf.mxu2 }
 0x160   : > { %2039 = vst [vmem:[#allocation1 + $0x1] ss:$4 sm:$0xff] %v1860_v31  ;;  %v1862_v3 = vrot.slane %v1754_v39, 2  ;;  %v1863_v48 = vrot.slane %v1754_v39, 4  ;;  %v1864_v9 = vrot.slane %v1754_v39, 6 }
 0x161   : > { %2040 = vst [vmem:[#allocation1 + $0x2] ss:$4 sm:$0xff] %v1861_v46  ;;  %v1669_v12 = vmul.f32 %v5571_v37, %v1583_v20  ;;  %v5747_v42 = vpop.f32.mrf.mxu3 }
 0x162   : > { %2313 = vst.msk [vmem:[#allocation2 + $0x70] sm:$0x3] %vm2300_vm7, %v2257_v11 }
 0x163   : > { %v2030_v40 = vld.sshfl [vmem:[#allocation1 + $0x20] sm:$0xff pattern:$0x73625140]  ;;  %2041 = vst [vmem:[#allocation1 + $0x3] ss:$4 sm:$0xff] %v1754_v39  ;;  %v1714_v35 = vadd.f32 %v5587_v26, %v1669_v12 }
 0x164   : > { %2312 = vst.msk [vmem:[#allocation2 + $0x68] sm:$0xff] %vm2297_vm4, %v2030_v40 }
 0x165   : > { %2033 = vst [vmem:[#allocation1 + $0x20] ss:$4 sm:$0xff] %v1856_v16  ;;  %v1471_v33 = vpop.f32.mrf.mxu0  ;;  %v1755_v1 = vmax.f32 %v1714_v35, 0.0  ;;  %1646 = vmatmul.bf16.gmra.mxu3 %v1296_v43 }
 0x166   : > { %2034 = vst [vmem:[#allocation1 + $0x21] ss:$4 sm:$0xff] %v1857_v38  ;;  %v1584_v0 = vpop.f32.mrf.mxu1 }
 0x167   : > { %2035 = vst [vmem:[#allocation1 + $0x22] ss:$4 sm:$0xff] %v1858_v22  ;;  %v1585_v27 = vadd.f32 %v1584_v0, %v1471_v33  ;;  %v1865_v61 = vrot.slane %v1755_v1, 2  ;;  %v1866_v7 = vrot.slane %v1755_v1, 4  ;;  %v1867_v2 = vrot.slane %v1755_v1, 6  ;;  %v5756_v39 = vpop.f32.mrf.mxu2 }
 0x168   : > { %2036 = vst [vmem:[#allocation1 + $0x23] ss:$4 sm:$0xff] %v1753_v21 }
 0x169   : > { %v1670_v36 = vmul.f32 %v5571_v37, %v1585_v27 }
 0x16a   : > { %v2043_v52 = vld.sshfl [vmem:[#allocation1] sm:$0xff pattern:$0x73625140] }
 0x16b   : > { %2045 = vst [vmem:[#allocation1] ss:$4 sm:$0xff] %v1863_v48  ;;  %v1715_v5 = vadd.f32 %v5587_v26, %v1670_v36 }
 0x16c   : > { %2046 = vst [vmem:[#allocation1 + $0x1] ss:$4 sm:$0xff] %v1864_v9 }
 0x16d   : > { %1533 = vmatmul.bf16.gmra.mxu2 %v1295_v41  ;;  %2315 = vst.msk [vmem:[#allocation2 + $0x80] sm:$0xff] %vm2297_vm4, %v2043_v52  ;;  %v1756_v13 = vmax.f32 %v1715_v5, 0.0  ;;  %v1474_v4 = vpop.f32.mrf.mxu0 }
 0x16e   : > { %2047 = vst [vmem:[#allocation1 + $0x2] ss:$4 sm:$0xff] %v1755_v1  ;;  %v1587_v8 = vpop.f32.mrf.mxu1 }
 0x16f   : > { %v2037_v10 = vld.sshfl [vmem:[#allocation1 + $0x20] sm:$0xff pattern:$0x73625140]  ;;  %2048 = vst [vmem:[#allocation1 + $0x3] ss:$4 sm:$0xff] %v1865_v61  ;;  %v1588_v57 = vadd.f32 %v1587_v8, %v1474_v4  ;;  %v1868_v45 = vrot.slane %v1756_v13, 2  ;;  %v5765_v48 = vpop.f32.mrf.mxu2 }
 0x170   : > { %2042 = vst [vmem:[#allocation1 + $0x20] ss:$4 sm:$0xff] %v1862_v3  ;;  %v2258_v14 = vsel %vm1948_vm5, %v2037_v10, 0.0  ;;  %v1869_v15 = vrot.slane %v1756_v13, 4  ;;  %v1870_v17 = vrot.slane %v1756_v13, 6  ;;  %v5758_v20 = vpop.f32.mrf.mxu3 }
 0x171   : > { %2314 = vst.msk [vmem:[#allocation2 + $0x78] sm:$0xff] %vm2297_vm4, %v2258_v14  ;;  %v1671_v63 = vmul.f32 %v5571_v37, %v1588_v57 }
 0x173   : > { %v1716_v25 = vadd.f32 %v5587_v26, %v1671_v63 }
 0x175   : > { %v1476_v47 = vpop.f32.mrf.mxu0  ;;  %v1757_v31 = vmax.f32 %v1716_v25, 0.0 }
 0x176   : > { %v2053_v21 = vld.sshfl [vmem:[#allocation1] sm:$0xff pattern:$0x73625140]  ;;  %v1589_v50 = vpop.f32.mrf.mxu1 }
 0x177   : > { %v2044_v44 = vld.sshfl [vmem:[#allocation1 + $0x20] sm:$0xff pattern:$0x73625140]  ;;  %2055 = vst [vmem:[#allocation1] ss:$4 sm:$0xff] %v1869_v15  ;;  %v2261_v30 = vsel %vm1948_vm5, %v2053_v21, 0.0  ;;  %v1590_v46 = vadd.f32 %v1589_v50, %v1476_v47  ;;  %v1603_v21 = vadd.f32 %v5706_v59, %v5714_v60 }
 0x178   : > { %2049 = vst [vmem:[#allocation1 + $0x20] ss:$4 sm:$0xff] %v1866_v7  ;;  %v2260_v19 = vsel %vm1959_vm6, %v2044_v44, 0.0  ;;  %v1871_v18 = vrot.slane %v1757_v31, 2  ;;  %v1872_v11 = vrot.slane %v1757_v31, 4  ;;  %v1873_v16 = vrot.slane %v1757_v31, 6  ;;  %v5767_v36 = vpop.f32.mrf.mxu3 }
 0x179   : > { %2050 = vst [vmem:[#allocation1 + $0x21] ss:$4 sm:$0xff] %v1867_v2  ;;  %v1672_v51 = vmul.f32 %v5571_v37, %v1590_v46 }
 0x17a   : > { %2051 = vst [vmem:[#allocation1 + $0x22] ss:$4 sm:$0xff] %v1756_v13 }
 0x17b   : > { %2052 = vst [vmem:[#allocation1 + $0x23] ss:$4 sm:$0xff] %v1868_v45  ;;  %v1717_v6 = vadd.f32 %v5587_v26, %v1672_v51  ;;  %v5776_v45 = vpop.f32.mrf.mxu2 }
 0x17c   : > { %2316 = vst.msk [vmem:[#allocation2 + $0x88] sm:$0x3] %vm2300_vm7, %v2260_v19 }
 0x17d   : > { %2317 = vst.msk [vmem:[#allocation2 + $0x90] sm:$0xff] %vm2297_vm4, %v2261_v30  ;;  %v1758_v24 = vmax.f32 %v1717_v6, 0.0  ;;  %v1479_v40 = vpop.f32.mrf.mxu0  ;;  %v1677_v30 = vmul.f32 %v5571_v37, %v1603_v21 }
 0x17e   : > { %v2056_v38 = vld.sshfl [vmem:[#allocation1] sm:$0xff pattern:$0x73625140]  ;;  %v1592_v22 = vpop.f32.mrf.mxu1 }
 0x17f   : > { %v1874_v53 = vrot.slane %v1758_v24, 2  ;;  %v1593_v58 = vadd.f32 %v1592_v22, %v1479_v40  ;;  %v1875_v12 = vrot.slane %v1758_v24, 4  ;;  %2062 = vst [vmem:[#allocation1] ss:$4 sm:$0xff] %v1873_v16  ;;  %v2263_v3 = vsel %vm1959_vm6, %v2056_v38, 0.0 }
 0x180   : > { %2063 = vst [vmem:[#allocation1 + $0x1] ss:$4 sm:$0xff] %v1758_v24  ;;  %v1876_v0 = vrot.slane %v1758_v24, 6  ;;  %v5778_v63 = vpop.f32.mrf.mxu3  ;;  %v1722_v6 = vadd.f32 %v5587_v26, %v1677_v30  ;;  %v1605_v38 = vadd.f32 %v5724_v28, %v5722_v23  ;;  %v1608_v23 = vadd.f32 %v5735_v54, %v5733_v49 }
 0x181   : > { %v1673_v35 = vmul.f32 %v5571_v37, %v1593_v58  ;;  %2064 = vst [vmem:[#allocation1 + $0x2] ss:$4 sm:$0xff] %v1874_v53 }
 0x182   : > { %v2054_v55 = vld.sshfl [vmem:[#allocation1 + $0x20] sm:$0xff pattern:$0x73625140]  ;;  %2065 = vst [vmem:[#allocation1 + $0x3] ss:$4 sm:$0xff] %v1875_v12  ;;  %v1763_v22 = vmax.f32 %v1722_v6, 0.0  ;;  %v1615_v6 = vadd.f32 %v5767_v36, %v5765_v48 }
 0x183   : > { %2057 = vst [vmem:[#allocation1 + $0x20] ss:$4 sm:$0xff] %v1870_v17  ;;  %v1718_v33 = vadd.f32 %v5587_v26, %v1673_v35  ;;  %v5789_v17 = vpop.f32.mrf.mxu2 }
 0x184   : > { %2318 = vst.msk [vmem:[#allocation2 + $0x98] sm:$0xff] %vm2297_vm4, %v2054_v55  ;;  %v1890_v54 = vrot.slane %v1763_v22, 4 }
 0x185   : > { %2058 = vst [vmem:[#allocation1 + $0x21] ss:$4 sm:$0xff] %v1757_v31  ;;  %v1759_v1 = vmax.f32 %v1718_v33, 0.0  ;;  %v1481_v27 = vpop.f32.mrf.mxu0 }
 0x186   : > { %2059 = vst [vmem:[#allocation1 + $0x22] ss:$4 sm:$0xff] %v1871_v18  ;;  %v1594_v41 = vpop.f32.mrf.mxu1 }
 0x187   : > { %2060 = vst [vmem:[#allocation1 + $0x23] ss:$4 sm:$0xff] %v1872_v11  ;;  %v1595_v10 = vadd.f32 %v1594_v41, %v1481_v27  ;;  %v1877_v61 = vrot.slane %v1759_v1, 2  ;;  %v1878_v13 = vrot.slane %v1759_v1, 4  ;;  %v1879_v7 = vrot.slane %v1759_v1, 6 }
 0x188   : > { %2319 = vst.msk [vmem:[#allocation2 + $0xa0] sm:$0x3] %vm2300_vm7, %v2263_v3  ;;  %v5791_v59 = vpop.f32.mrf.mxu3  ;;  %v1679_v27 = vmul.f32 %v5571_v37, %v1608_v23  ;;  %v1889_v41 = vrot.slane %v1763_v22, 2 }
 0x189   : > { %v1674_v52 = vmul.f32 %v5571_v37, %v1595_v10  ;;  %v2067_v5 = vld.sshfl [vmem:[#allocation1] sm:$0xff pattern:$0x73625140] }
 0x18a   : > { %2321 = vst.msk [vmem:[#allocation2 + $0xb0] sm:$0xff] %vm2297_vm4, %v2067_v5  ;;  %v1891_v5 = vrot.slane %v1763_v22, 6 }
 0x18b   : > { %v1719_v14 = vadd.f32 %v5587_v26, %v1674_v52  ;;  %2069 = vst [vmem:[#allocation1] ss:$4 sm:$0xff] %v1759_v1  ;;  %v5802_v12 = vpop.f32.mrf.mxu2 }
 0x18c   : > { %2070 = vst [vmem:[#allocation1 + $0x1] ss:$4 sm:$0xff] %v1877_v61  ;;  %v1724_v61 = vadd.f32 %v5587_v26, %v1679_v27 }
 0x18d   : > { %v1760_v4 = vmax.f32 %v1719_v14, 0.0  ;;  %2071 = vst [vmem:[#allocation1 + $0x2] ss:$4 sm:$0xff] %v1878_v13  ;;  %v1610_v14 = vadd.f32 %v5747_v42, %v5745_v34 }
 0x18e   : > { %v2061_v43 = vld.sshfl [vmem:[#allocation1 + $0x20] sm:$0xff pattern:$0x73625140]  ;;  %v1597_v8 = vpop.f32.mrf.mxu1  ;;  %2072 = vst [vmem:[#allocation1 + $0x3] ss:$4 sm:$0xff] %v1879_v7 }
 0x18f   : > { %v2264_v9 = vsel %vm1948_vm5, %v2061_v43, 0.0  ;;  %2066 = vst [vmem:[#allocation1 + $0x20] ss:$4 sm:$0xff] %v1876_v0  ;;  %v1880_v57 = vrot.slane %v1760_v4, 2  ;;  %v1598_v44 = vadd.f32 %v1597_v8, %v5691_v62  ;;  %v1881_v15 = vrot.slane %v1760_v4, 4 }
 0x190   : > { %2320 = vst.msk [vmem:[#allocation2 + $0xa8] sm:$0xff] %vm2297_vm4, %v2264_v9  ;;  %v1882_v19 = vrot.slane %v1760_v4, 6  ;;  %v1678_v0 = vmul.f32 %v5571_v37, %v1605_v38  ;;  %v5854_v38 = vld [vmem:[%s6865_s2] ss:$0 sm:$0xff] }
 0x191   : > { %v1675_v25 = vmul.f32 %v5571_v37, %v1598_v44 }
 0x192   : > { %v1723_v1 = vadd.f32 %v5587_v26, %v1678_v0 }
 0x193   : > { %v1720_v62 = vadd.f32 %v5587_v26, %v1675_v25  ;;  %v5814_v43 = vpop.f32.mrf.mxu2 }
 0x194   : > { %v1764_v52 = vmax.f32 %v1723_v1, 0.0  ;;  %v1620_v1 = vadd.f32 %v5791_v59, %v5789_v17 }
 0x195   : > { %v1761_v50 = vmax.f32 %v1720_v62, 0.0  ;;  %v2077_v46 = vld.sshfl [vmem:[#allocation1] sm:$0xff pattern:$0x73625140] }
 0x196   : > { %v2068_v2 = vld.sshfl [vmem:[#allocation1 + $0x20] sm:$0xff pattern:$0x73625140]  ;;  %v1599_v31 = vpop.f32.mrf.mxu1  ;;  %v2267_v60 = vsel %vm1948_vm5, %v2077_v46, 0.0  ;;  %v1892_v7 = vrot.slane %v1764_v52, 2  ;;  %v1893_v8 = vrot.slane %v1764_v52, 4 }
 0x197   : > { %2073 = vst [vmem:[#allocation1 + $0x20] ss:$4 sm:$0xff] %v1760_v4  ;;  %v2266_v47 = vsel %vm1959_vm6, %v2068_v2, 0.0  ;;  %v1600_v51 = vadd.f32 %v1599_v31, %v5698_v56  ;;  %v1883_v55 = vrot.slane %v1761_v50, 2  ;;  %v1884_v11 = vrot.slane %v1761_v50, 4 }
 0x198   : > { %2074 = vst [vmem:[#allocation1 + $0x21] ss:$4 sm:$0xff] %v1880_v57  ;;  %v1885_v24 = vrot.slane %v1761_v50, 6  ;;  %v5804_v35 = vpop.f32.mrf.mxu3  ;;  %v1765_v4 = vmax.f32 %v1724_v61, 0.0  ;;  %v1894_v44 = vrot.slane %v1764_v52, 6 }
 0x199   : > { %2075 = vst [vmem:[#allocation1 + $0x22] ss:$4 sm:$0xff] %v1881_v15  ;;  %v1676_v18 = vmul.f32 %v5571_v37, %v1600_v51  ;;  %v1680_v15 = vmul.f32 %v5571_v37, %v1610_v14 }
 0x19a   : > { %2076 = vst [vmem:[#allocation1 + $0x23] ss:$4 sm:$0xff] %v1882_v19  ;;  %v1613_v19 = vadd.f32 %v5758_v20, %v5756_v39  ;;  %v1895_v34 = vrot.slane %v1765_v4, 2  ;;  %v1896_v62 = vrot.slane %v1765_v4, 4  ;;  %v1897_v51 = vrot.slane %v1765_v4, 6 }
 0x19b   : > { %2322 = vst.msk [vmem:[#allocation2 + $0xb8] sm:$0x3] %vm2300_vm7, %v2266_v47  ;;  %v1721_v56 = vadd.f32 %v5587_v26, %v1676_v18  ;;  %v1725_v21 = vadd.f32 %v5587_v26, %v1680_v15 }
 0x19c   : > { %2079 = vst [vmem:[#allocation1] ss:$4 sm:$0xff] %v1761_v50  ;;  %v1681_v47 = vmul.f32 %v5571_v37, %v1613_v19  ;;  %v4972_v37 = vmov 0.0  }
 0x19d   : > { %2323 = vst.msk [vmem:[#allocation2 + $0xc0] sm:$0xff] %vm2297_vm4, %v2267_v60  ;;  %v1762_v40 = vmax.f32 %v1721_v56, 0.0  ;;  %v1766_v31 = vmax.f32 %v1725_v21, 0.0 }
 0x19e   : > { %v1726_v46 = vadd.f32 %v5587_v26, %v1681_v47  ;;  %2298 = vst.msk [vmem:[#allocation2] sm:$0xff] %vm2297_vm4, %v4972_v37  ;;  %v1618_v26 = vadd.f32 %v5778_v63, %v5776_v45 }
 0x19f   : > { %v1886_v58 = vrot.slane %v1762_v40, 2  ;;  %v1887_v3 = vrot.slane %v1762_v40, 4  ;;  %v1888_v33 = vrot.slane %v1762_v40, 6  ;;  %2299 = vst.msk [vmem:[#allocation2 + $0x8] sm:$0xff] %vm2297_vm4, %v4972_v37 }
 0x1a0   : > { %v5816_v10 = vpop.f32.mrf.mxu3  ;;  %v1767_v18 = vmax.f32 %v1726_v46, 0.0  ;;  %v1683_v45 = vmul.f32 %v5854_v38, %v1618_v26  ;;  %2301 = vst.msk [vmem:[#allocation2 + $0x10] sm:$0x3] %vm2300_vm7, %v4972_v37 }
 0x1a1   : > { %v2078_v16 = vld.sshfl [vmem:[#allocation1 + $0x20] sm:$0xff pattern:$0x73625140]  ;;  %2350 = vst.msk [vmem:[#allocation2 + $0x198] sm:$0xff] %vm2297_vm4, %v4972_v37  ;;  %v1625_v21 = vadd.f32 %v5816_v10, %v5814_v43 }
 0x1a2   : > { %2324 = vst.msk [vmem:[#allocation2 + $0xc8] sm:$0xff] %vm2297_vm4, %v2078_v16  ;;  %v1900_v16 = vrot.slane %v1766_v31, 6  ;;  %v1901_v56 = vrot.slane %v1767_v18, 2  ;;  %v1902_v48 = vrot.slane %v1767_v18, 4 }
 0x1a3   : > { %2081 = vst [vmem:[#allocation1 + $0x20] ss:$4 sm:$0xff] %v1883_v55  ;;  %v2080_v53 = vld.sshfl [vmem:[#allocation1] sm:$0xff pattern:$0x73625140]  ;;  %v1898_v55 = vrot.slane %v1766_v31, 2 }
 0x1a4   : > { %2082 = vst [vmem:[#allocation1 + $0x21] ss:$4 sm:$0xff] %v1884_v11  ;;  %v2269_v28 = vsel %vm1959_vm6, %v2080_v53, 0.0  ;;  %v1899_v11 = vrot.slane %v1766_v31, 4  ;;  %v5867_v53 = vld [vmem:[%s6866_s3] ss:$0 sm:$0xff] }
 0x1a5   : > { %2083 = vst [vmem:[#allocation1 + $0x22] ss:$4 sm:$0xff] %v1885_v24 }
 0x1a6   : > { %2089 = vst [vmem:[#allocation1 + $0x3] ss:$4 sm:$0xff] %v1763_v22 }
 0x1a7   : > { %2084 = vst [vmem:[#allocation1 + $0x23] ss:$4 sm:$0xff] %v1762_v40  ;;  %v1682_v40 = vmul.f32 %v5854_v38, %v1615_v6 }
 0x1a8   : > { %2086 = vst [vmem:[#allocation1] ss:$4 sm:$0xff] %v1886_v58  ;;  %v5826_v57 = vpop.f32.mrf.mxu3 }
 0x1a9   : > { %2087 = vst [vmem:[#allocation1 + $0x1] ss:$4 sm:$0xff] %v1887_v3  ;;  %v1727_v58 = vadd.f32 %v5867_v53, %v1682_v40  ;;  %v1903_v3 = vrot.slane %v1767_v18, 6 }
 0x1aa   : > { %2088 = vst [vmem:[#allocation1 + $0x2] ss:$4 sm:$0xff] %v1888_v33  ;;  %v1728_v33 = vadd.f32 %v5867_v53, %v1683_v45 }
 0x1ab   : > { %2325 = vst.msk [vmem:[#allocation2 + $0xd0] sm:$0x3] %vm2300_vm7, %v2269_v28  ;;  %v1768_v28 = vmax.f32 %v1727_v58, 0.0 }
 0x1ac   : > { %v1769_v27 = vmax.f32 %v1728_v33, 0.0  ;;  %2351 = vst.msk [vmem:[#allocation2 + $0x1a0] sm:$0xff] %vm2297_vm4, %v4972_v37 }
 0x1ad   : > { %2352 = vst.msk [vmem:[#allocation2 + $0x1a8] sm:$0x3] %vm2300_vm7, %v4972_v37 }
 0x1ae   : > { %v2085_v9 = vld.sshfl [vmem:[#allocation1 + $0x20] sm:$0xff pattern:$0x73625140]  ;;  %v1907_v61 = vrot.slane %v1769_v27, 2  ;;  %v1908_v17 = vrot.slane %v1769_v27, 4  ;;  %v1909_v59 = vrot.slane %v1769_v27, 6 }
 0x1af   : > { %2090 = vst [vmem:[#allocation1 + $0x20] ss:$4 sm:$0xff] %v1889_v41  ;;  %v2270_v49 = vsel %vm1948_vm5, %v2085_v9, 0.0 }
 0x1b0   : > { %2326 = vst.msk [vmem:[#allocation2 + $0xd8] sm:$0xff] %vm2297_vm4, %v2270_v49  ;;  %v5824_v2 = vpop.f32.mrf.mxu2  ;;  %v5841_v30 = vpop.f32.mrf.mxu3  ;;  %v1904_v49 = vrot.slane %v1768_v28, 2 }
 0x1b1   : > { %v2091_v13 = vld.sshfl [vmem:[#allocation1] sm:$0xff pattern:$0x73625140]  ;;  %v1628_v6 = vadd.f32 %v5826_v57, %v5824_v2 }
 0x1b2   : > { %2093 = vst [vmem:[#allocation1] ss:$4 sm:$0xff] %v1890_v54  ;;  %v1684_v54 = vmul.f32 %v5854_v38, %v1620_v1 }
 0x1b3   : > { %2094 = vst [vmem:[#allocation1 + $0x1] ss:$4 sm:$0xff] %v1891_v5 }
 0x1b4   : > { %2095 = vst [vmem:[#allocation1 + $0x2] ss:$4 sm:$0xff] %v1764_v52  ;;  %v1729_v14 = vadd.f32 %v5867_v53, %v1684_v54 }
 0x1b5   : > { %2096 = vst [vmem:[#allocation1 + $0x3] ss:$4 sm:$0xff] %v1892_v7  ;;  %v1905_v7 = vrot.slane %v1768_v28, 4 }
 0x1b6   : > { %v2092_v25 = vld.sshfl [vmem:[#allocation1 + $0x20] sm:$0xff pattern:$0x73625140]  ;;  %2327 = vst.msk [vmem:[#allocation2 + $0xe0] sm:$0xff] %vm2297_vm4, %v2091_v13 }
 0x1b7   : > { %2097 = vst [vmem:[#allocation1 + $0x20] ss:$4 sm:$0xff] %v1893_v8  ;;  %v2272_v42 = vsel %vm1959_vm6, %v2092_v25, 0.0  ;;  %v1906_v8 = vrot.slane %v1768_v28, 6 }
 0x1b8   : > { %2098 = vst [vmem:[#allocation1 + $0x21] ss:$4 sm:$0xff] %v1894_v44  ;;  %v5839_v20 = vpop.f32.mrf.mxu2  ;;  %v5859_v22 = vpop.f32.mrf.mxu3  ;;  %v1770_v44 = vmax.f32 %v1729_v14, 0.0 }
 0x1b9   : > { %2099 = vst [vmem:[#allocation1 + $0x22] ss:$4 sm:$0xff] %v1765_v4  ;;  %v1623_v4 = vadd.f32 %v5804_v35, %v5802_v12  ;;  %v1630_v2 = vadd.f32 %v5841_v30, %v5839_v20 }
 0x1ba   : > { %2100 = vst [vmem:[#allocation1 + $0x23] ss:$4 sm:$0xff] %v1895_v34  ;;  %v1911_v12 = vrot.slane %v1770_v44, 4  ;;  %v1912_v47 = vrot.slane %v1770_v44, 6 }
 0x1bb   : > { %2328 = vst.msk [vmem:[#allocation2 + $0xe8] sm:$0x3] %vm2300_vm7, %v2272_v42  ;;  %v1685_v25 = vmul.f32 %v5854_v38, %v1623_v4  ;;  %v1910_v42 = vrot.slane %v1770_v44, 2  ;;  %v1688_v45 = vmul.f32 %v5854_v38, %v1630_v2 }
 0x1bc   : > { %v2101_v50 = vld.sshfl [vmem:[#allocation1] sm:$0xff pattern:$0x73625140] }
 0x1bd   : > { %2103 = vst [vmem:[#allocation1] ss:$4 sm:$0xff] %v1896_v62  ;;  %v2273_v39 = vsel %vm1948_vm5, %v2101_v50, 0.0  ;;  %v1730_v35 = vadd.f32 %v5867_v53, %v1685_v25 }
 0x1be   : > { %2329 = vst.msk [vmem:[#allocation2 + $0xf0] sm:$0xff] %vm2297_vm4, %v2273_v39  ;;  %v1686_v39 = vmul.f32 %v5854_v38, %v1625_v21 }
 0x1c0   : > { %v5857_v36 = vpop.f32.mrf.mxu2  ;;  %v5884_v52 = vpop.f32.mrf.mxu3  ;;  %v1731_v46 = vadd.f32 %v5867_v53, %v1686_v39 }
 0x1c1   : > { %v2102_v60 = vld.sshfl [vmem:[#allocation1 + $0x20] sm:$0xff pattern:$0x73625140]  ;;  %v1633_v30 = vadd.f32 %v5859_v22, %v5857_v36 }
 0x1c2   : > { %2105 = vst [vmem:[#allocation1 + $0x20] ss:$4 sm:$0xff] %v1897_v51 }
 0x1c3   : > { %2106 = vst [vmem:[#allocation1 + $0x21] ss:$4 sm:$0xff] %v1766_v31  ;;  %v1771_v31 = vmax.f32 %v1730_v35, 0.0 }
 0x1c4   : > { %v2104_v24 = vld.sshfl [vmem:[#allocation1] sm:$0xff pattern:$0x73625140]  ;;  %2107 = vst [vmem:[#allocation1 + $0x22] ss:$4 sm:$0xff] %v1898_v55 }
 0x1c5   : > { %2108 = vst [vmem:[#allocation1 + $0x23] ss:$4 sm:$0xff] %v1899_v11  ;;  %v2275_v63 = vsel %vm1959_vm6, %v2104_v24, 0.0  ;;  %v1913_v51 = vrot.slane %v1771_v31, 2  ;;  %v1914_v55 = vrot.slane %v1771_v31, 4  ;;  %v1915_v11 = vrot.slane %v1771_v31, 6 }
 0x1c6   : > { %2110 = vst [vmem:[#allocation1] ss:$4 sm:$0xff] %v1900_v16 }
 0x1c7   : > { %2111 = vst [vmem:[#allocation1 + $0x1] ss:$4 sm:$0xff] %v1767_v18  ;;  %v1772_v18 = vmax.f32 %v1731_v46, 0.0 }
 0x1c8   : > { %2112 = vst [vmem:[#allocation1 + $0x2] ss:$4 sm:$0xff] %v1901_v56  ;;  %v5882_v9 = vpop.f32.mrf.mxu2  ;;  %v5896_v19 = vpop.f32.mrf.mxu3 }
 0x1c9   : > { %2113 = vst [vmem:[#allocation1 + $0x3] ss:$4 sm:$0xff] %v1902_v48  ;;  %v1916_v40 = vrot.slane %v1772_v18, 2  ;;  %v1687_v48 = vmul.f32 %v5854_v38, %v1628_v6  ;;  %v1918_v58 = vrot.slane %v1772_v18, 6 }
 0x1ca   : > { %2330 = vst.msk [vmem:[#allocation2 + $0xf8] sm:$0xff] %vm2297_vm4, %v2102_v60 }
 0x1cb   : > { %2331 = vst.msk [vmem:[#allocation2 + $0x100] sm:$0x3] %vm2300_vm7, %v2275_v63  ;;  %v1732_v57 = vadd.f32 %v5867_v53, %v1687_v48  ;;  %v1917_v63 = vrot.slane %v1772_v18, 4 }
 0x1cc   : > { %v2109_v0 = vld.sshfl [vmem:[#allocation1 + $0x20] sm:$0xff pattern:$0x73625140] }
 0x1cd   : > { %2114 = vst [vmem:[#allocation1 + $0x20] ss:$4 sm:$0xff] %v1903_v3  ;;  %v2276_v23 = vsel %vm1948_vm5, %v2109_v0, 0.0  ;;  %v1773_v33 = vmax.f32 %v1732_v57, 0.0  ;;  %v1733_v0 = vadd.f32 %v5867_v53, %v1688_v45 }
 0x1ce   : > { %2332 = vst.msk [vmem:[#allocation2 + $0x108] sm:$0xff] %vm2297_vm4, %v2276_v23 }
 0x1cf   : > { %v1921_v54 = vrot.slane %v1773_v33, 6 }
 0x1d0   : > { %v2115_v41 = vld.sshfl [vmem:[#allocation1] sm:$0xff pattern:$0x73625140]  ;;  %v5894_v15 = vpop.f32.mrf.mxu2  ;;  %v5909_v10 = vpop.f32.mrf.mxu3 }
 0x1d1   : > { %2333 = vst.msk [vmem:[#allocation2 + $0x110] sm:$0xff] %vm2297_vm4, %v2115_v41  ;;  %v1774_v41 = vmax.f32 %v1733_v0, 0.0  ;;  %v1638_v21 = vadd.f32 %v5896_v19, %v5894_v15 }
 0x1d2   : > { %2117 = vst [vmem:[#allocation1] ss:$4 sm:$0xff] %v1768_v28 }
 0x1d3   : > { %2118 = vst [vmem:[#allocation1 + $0x1] ss:$4 sm:$0xff] %v1904_v49  ;;  %v1920_v49 = vrot.slane %v1773_v33, 4  ;;  %v1691_v39 = vmul.f32 %v5854_v38, %v1638_v21 }
 0x1d4   : > { %v2116_v5 = vld.sshfl [vmem:[#allocation1 + $0x20] sm:$0xff pattern:$0x73625140]  ;;  %2119 = vst [vmem:[#allocation1 + $0x2] ss:$4 sm:$0xff] %v1905_v7 }
 0x1d5   : > { %2121 = vst [vmem:[#allocation1 + $0x20] ss:$4 sm:$0xff] %v1769_v27  ;;  %v2278_v13 = vsel %vm1959_vm6, %v2116_v5, 0.0  ;;  %v1919_v27 = vrot.slane %v1773_v33, 2  ;;  %v1922_v5 = vrot.slane %v1774_v41, 2  ;;  %v1736_v19 = vadd.f32 %v5867_v53, %v1691_v39 }
 0x1d6   : > { %2122 = vst [vmem:[#allocation1 + $0x21] ss:$4 sm:$0xff] %v1907_v61  ;;  %v1689_v61 = vmul.f32 %v5854_v38, %v1633_v30 }
 0x1d7   : > { %2123 = vst [vmem:[#allocation1 + $0x22] ss:$4 sm:$0xff] %v1908_v17  ;;  %v1635_v17 = vadd.f32 %v5884_v52, %v5882_v9  ;;  %v1924_v9 = vrot.slane %v1774_v41, 6 }
 0x1d8   : > { %2124 = vst [vmem:[#allocation1 + $0x23] ss:$4 sm:$0xff] %v1909_v59  ;;  %v5907_v43 = vpop.f32.mrf.mxu2  ;;  %v5919_v24 = vpop.f32.mrf.mxu3  ;;  %v1734_v22 = vadd.f32 %v5867_v53, %v1689_v61 }
 0x1d9   : > { %2334 = vst.msk [vmem:[#allocation2 + $0x118] sm:$0x3] %vm2300_vm7, %v2278_v13  ;;  %v1923_v13 = vrot.slane %v1774_v41, 4  ;;  %v1690_v14 = vmul.f32 %v5854_v38, %v1635_v17  ;;  %v1640_v46 = vadd.f32 %v5909_v10, %v5907_v43 }
 0x1da   : > { %2120 = vst [vmem:[#allocation1 + $0x3] ss:$4 sm:$0xff] %v1906_v8  ;;  %v1775_v8 = vmax.f32 %v1734_v22, 0.0 }
 0x1db   : > { %v1735_v52 = vadd.f32 %v5867_v53, %v1690_v14 }
 0x1dd   : > { %v1776_v35 = vmax.f32 %v1735_v52, 0.0 }
 0x1df   : > { %v2126_v34 = vld.sshfl [vmem:[#allocation1 + $0x20] sm:$0xff pattern:$0x73625140]  ;;  %v1929_v15 = vrot.slane %v1776_v35, 4 }
 0x1e0   : > { %2336 = vst.msk [vmem:[#allocation2 + $0x128] sm:$0xff] %vm2297_vm4, %v2126_v34  ;;  %v5917_v26 = vpop.f32.mrf.mxu2  ;;  %v5932_v28 = vpop.f32.mrf.mxu3 }
 0x1e1   : > { %2129 = vst [vmem:[#allocation1 + $0x20] ss:$4 sm:$0xff] %v1910_v42  ;;  %v2125_v62 = vld.sshfl [vmem:[#allocation1] sm:$0xff pattern:$0x73625140]  ;;  %v1925_v42 = vrot.slane %v1775_v8, 2  ;;  %v1643_v10 = vadd.f32 %v5919_v24, %v5917_v26 }
 0x1e2   : > { %2130 = vst [vmem:[#allocation1 + $0x21] ss:$4 sm:$0xff] %v1911_v12  ;;  %v2279_v50 = vsel %vm1948_vm5, %v2125_v62, 0.0  ;;  %v1926_v12 = vrot.slane %v1775_v8, 4 }
 0x1e3   : > { %2127 = vst [vmem:[#allocation1] ss:$4 sm:$0xff] %v1770_v44  ;;  %v1693_v57 = vmul.f32 %v5854_v38, %v1643_v10 }
 0x1e4   : > { %2131 = vst [vmem:[#allocation1 + $0x22] ss:$4 sm:$0xff] %v1912_v47 }
 0x1e5   : > { %2335 = vst.msk [vmem:[#allocation2 + $0x120] sm:$0xff] %vm2297_vm4, %v2279_v50  ;;  %v1927_v50 = vrot.slane %v1775_v8, 6 }
 0x1e6   : > { %2132 = vst [vmem:[#allocation1 + $0x23] ss:$4 sm:$0xff] %v1771_v31  ;;  %v1928_v31 = vrot.slane %v1776_v35, 2 }
 0x1e8   : > { %v5930_v23 = vpop.f32.mrf.mxu2  ;;  %v5945_v36 = vpop.f32.mrf.mxu3 }
 0x1e9   : > { %v1645_v26 = vadd.f32 %v5932_v28, %v5930_v23 }
 0x1ea   : > { %v2128_v37 = vld.sshfl [vmem:[#allocation1] sm:$0xff pattern:$0x73625140] }
 0x1eb   : > { %v2281_v60 = vsel %vm1959_vm6, %v2128_v37, 0.0  ;;  %2134 = vst [vmem:[#allocation1] ss:$4 sm:$0xff] %v1913_v51  ;;  %v1930_v51 = vrot.slane %v1776_v35, 6  ;;  %v1692_v37 = vmul.f32 %v5854_v38, %v1640_v46 }
 0x1ec   : > { %2337 = vst.msk [vmem:[#allocation2 + $0x130] sm:$0x3] %vm2300_vm7, %v2281_v60 }
 0x1ed   : > { %v2133_v16 = vld.sshfl [vmem:[#allocation1 + $0x20] sm:$0xff pattern:$0x73625140]  ;;  %2135 = vst [vmem:[#allocation1 + $0x1] ss:$4 sm:$0xff] %v1914_v55  ;;  %v1737_v6 = vadd.f32 %v5867_v53, %v1692_v37 }
 0x1ee   : > { %2136 = vst [vmem:[#allocation1 + $0x2] ss:$4 sm:$0xff] %v1915_v11  ;;  %v2282_v56 = vsel %vm1948_vm5, %v2133_v16, 0.0 }
 0x1ef   : > { %2338 = vst.msk [vmem:[#allocation2 + $0x138] sm:$0xff] %vm2297_vm4, %v2282_v56  ;;  %v1778_v56 = vmax.f32 %v1737_v6, 0.0 }
 0x1f0   : > { %2137 = vst [vmem:[#allocation1 + $0x3] ss:$4 sm:$0xff] %v1772_v18  ;;  %v5943_v59 = vpop.f32.mrf.mxu2  ;;  %v1649_v34 = vpop.f32.mrf.mxu3  ;;  %v1777_v18 = vmax.f32 %v1736_v19, 0.0 }
 0x1f1   : > { %2138 = vst [vmem:[#allocation1 + $0x20] ss:$4 sm:$0xff] %v1916_v40  ;;  %v1934_v45 = vrot.slane %v1778_v56, 2  ;;  %v1935_v24 = vrot.slane %v1778_v56, 4 }
 0x1f2   : > { %v1931_v11 = vrot.slane %v1777_v18, 2  ;;  %v1932_v16 = vrot.slane %v1777_v18, 4  ;;  %v1933_v2 = vrot.slane %v1777_v18, 6 }
 0x1f7   : > { %v2139_v3 = vld.sshfl [vmem:[#allocation1] sm:$0xff pattern:$0x73625140] }
 0x1f8   : > { %v2140_v1 = vld.sshfl [vmem:[#allocation1 + $0x20] sm:$0xff pattern:$0x73625140]  ;;  %2141 = vst [vmem:[#allocation1] ss:$4 sm:$0xff] %v1917_v63  ;;  %v1536_v25 = vpop.f32.mrf.mxu2  ;;  %v1936_v63 = vrot.slane %v1778_v56, 6 }
 0x1f9   : > { %2142 = vst [vmem:[#allocation1 + $0x1] ss:$4 sm:$0xff] %v1918_v58  ;;  %v2284_v20 = vsel %vm1959_vm6, %v2140_v1, 0.0  ;;  %v1738_v58 = vadd.f32 %v5867_v53, %v1693_v57 }
 0x1fa   : > { %2339 = vst.msk [vmem:[#allocation2 + $0x140] sm:$0xff] %vm2297_vm4, %v2139_v3  ;;  %v1648_v3 = vadd.f32 %v5945_v36, %v5943_v59 }
 0x1fb   : > { %2340 = vst.msk [vmem:[#allocation2 + $0x148] sm:$0x3] %vm2300_vm7, %v2284_v20  ;;  %v1779_v0 = vmax.f32 %v1738_v58, 0.0 }
 0x1fc   : > { %2143 = vst [vmem:[#allocation1 + $0x2] ss:$4 sm:$0xff] %v1773_v33  ;;  %v1694_v33 = vmul.f32 %v5854_v38, %v1645_v26  ;;  %v1695_v1 = vmul.f32 %v5854_v38, %v1648_v3 }
 0x1fd   : > { %2144 = vst [vmem:[#allocation1 + $0x3] ss:$4 sm:$0xff] %v1919_v27  ;;  %v1939_v61 = vrot.slane %v1779_v0, 6 }
 0x1fe   : > { %2145 = vst [vmem:[#allocation1 + $0x20] ss:$4 sm:$0xff] %v1920_v49  ;;  %v1739_v28 = vadd.f32 %v5867_v53, %v1694_v33  ;;  %v1740_v30 = vadd.f32 %v5867_v53, %v1695_v1  ;;  %v1938_v49 = vrot.slane %v1779_v0, 4 }
 0x1ff   : > { %2146 = vst [vmem:[#allocation1 + $0x21] ss:$4 sm:$0xff] %v1921_v54 }
 0x200   : > { %2147 = vst [vmem:[#allocation1 + $0x22] ss:$4 sm:$0xff] %v1774_v41  ;;  %v1937_v41 = vrot.slane %v1779_v0, 2  ;;  %v1780_v54 = vmax.f32 %v1739_v28, 0.0  ;;  %v1781_v38 = vmax.f32 %v1740_v30, 0.0 }
 0x201   : > { %2148 = vst [vmem:[#allocation1 + $0x23] ss:$4 sm:$0xff] %v1922_v5 }
 0x202   : > { %v1940_v17 = vrot.slane %v1780_v54, 2  ;;  %v1941_v53 = vrot.slane %v1780_v54, 4  ;;  %v1942_v59 = vrot.slane %v1780_v54, 6  ;;  %v1943_v36 = vrot.slane %v1781_v38, 2 }
 0x204   : > { %v2149_v7 = vld.sshfl [vmem:[#allocation1] sm:$0xff pattern:$0x73625140] }
 0x205   : > { %v2285_v4 = vsel %vm1948_vm5, %v2149_v7, 0.0  ;;  %2151 = vst [vmem:[#allocation1] ss:$4 sm:$0xff] %v1923_v13 }
 0x206   : > { %2341 = vst.msk [vmem:[#allocation2 + $0x150] sm:$0xff] %vm2297_vm4, %v2285_v4 }
 0x208   : > { %v2150_v44 = vld.sshfl [vmem:[#allocation1 + $0x20] sm:$0xff pattern:$0x73625140] }
 0x209   : > { %2153 = vst [vmem:[#allocation1 + $0x20] ss:$4 sm:$0xff] %v1924_v9 }
 0x20a   : > { %2342 = vst.msk [vmem:[#allocation2 + $0x158] sm:$0xff] %vm2297_vm4, %v2150_v44 }
 0x20b   : > { %2154 = vst [vmem:[#allocation1 + $0x21] ss:$4 sm:$0xff] %v1775_v8 }
 0x20c   : > { %v2152_v47 = vld.sshfl [vmem:[#allocation1] sm:$0xff pattern:$0x73625140]  ;;  %2155 = vst [vmem:[#allocation1 + $0x22] ss:$4 sm:$0xff] %v1925_v42 }
 0x20d   : > { %v2287_v62 = vsel %vm1959_vm6, %v2152_v47, 0.0  ;;  %2156 = vst [vmem:[#allocation1 + $0x23] ss:$4 sm:$0xff] %v1926_v12 }
 0x20e   : > { %2343 = vst.msk [vmem:[#allocation2 + $0x160] sm:$0x3] %vm2300_vm7, %v2287_v62 }
 0x20f   : > { %2158 = vst [vmem:[#allocation1] ss:$4 sm:$0xff] %v1927_v50 }
 0x210   : > { %2159 = vst [vmem:[#allocation1 + $0x1] ss:$4 sm:$0xff] %v1776_v35 }
 0x211   : > { %2160 = vst [vmem:[#allocation1 + $0x2] ss:$4 sm:$0xff] %v1928_v31 }
 0x212   : > { %2161 = vst [vmem:[#allocation1 + $0x3] ss:$4 sm:$0xff] %v1929_v15 }
 0x214   : > { %v2157_v60 = vld.sshfl [vmem:[#allocation1 + $0x20] sm:$0xff pattern:$0x73625140] }
 0x215   : > { %v2288_v55 = vsel %vm1948_vm5, %v2157_v60, 0.0  ;;  %2162 = vst [vmem:[#allocation1 + $0x20] ss:$4 sm:$0xff] %v1930_v51 }
 0x216   : > { %2344 = vst.msk [vmem:[#allocation2 + $0x168] sm:$0xff] %vm2297_vm4, %v2288_v55 }
 0x219   : > { %v2163_v43 = vld.sshfl [vmem:[#allocation1] sm:$0xff pattern:$0x73625140] }
 0x21a   : > { %2345 = vst.msk [vmem:[#allocation2 + $0x170] sm:$0xff] %vm2297_vm4, %v2163_v43 }
 0x21b   : > { %2165 = vst [vmem:[#allocation1] ss:$4 sm:$0xff] %v1777_v18 }
 0x21c   : > { %v2164_v40 = vld.sshfl [vmem:[#allocation1 + $0x20] sm:$0xff pattern:$0x73625140]  ;;  %2166 = vst [vmem:[#allocation1 + $0x1] ss:$4 sm:$0xff] %v1931_v11 }
 0x21d   : > { %v2290_v48 = vsel %vm1959_vm6, %v2164_v40, 0.0  ;;  %2167 = vst [vmem:[#allocation1 + $0x2] ss:$4 sm:$0xff] %v1932_v16 }
 0x21e   : > { %2346 = vst.msk [vmem:[#allocation2 + $0x178] sm:$0x3] %vm2300_vm7, %v2290_v48 }
 0x21f   : > { %2168 = vst [vmem:[#allocation1 + $0x3] ss:$4 sm:$0xff] %v1933_v2 }
 0x220   : > { %2169 = vst [vmem:[#allocation1 + $0x20] ss:$4 sm:$0xff] %v1778_v56 }
 0x221   : > { %2170 = vst [vmem:[#allocation1 + $0x21] ss:$4 sm:$0xff] %v1934_v45 }
 0x222   : > { %2171 = vst [vmem:[#allocation1 + $0x22] ss:$4 sm:$0xff] %v1935_v24 }
 0x223   : > { %2172 = vst [vmem:[#allocation1 + $0x23] ss:$4 sm:$0xff] %v1936_v63 }
 0x226   : > { %v2173_v20 = vld.sshfl [vmem:[#allocation1] sm:$0xff pattern:$0x73625140] }
 0x227   : > { %v2291_v23 = vsel %vm1948_vm5, %v2173_v20, 0.0  ;;  %2175 = vst [vmem:[#allocation1] ss:$4 sm:$0xff] %v1779_v0 }
 0x228   : > { %2347 = vst.msk [vmem:[#allocation2 + $0x180] sm:$0xff] %vm2297_vm4, %v2291_v23 }
 0x22a   : > { %v2174_v27 = vld.sshfl [vmem:[#allocation1 + $0x20] sm:$0xff pattern:$0x73625140] }
 0x22b   : > { %2348 = vst.msk [vmem:[#allocation2 + $0x188] sm:$0xff] %vm2297_vm4, %v2174_v27 }
 0x22c   : > { %2177 = vst [vmem:[#allocation1 + $0x20] ss:$4 sm:$0xff] %v1937_v41 }
 0x22d   : > { %2178 = vst [vmem:[#allocation1 + $0x21] ss:$4 sm:$0xff] %v1938_v49 }
 0x22e   : > { %v2176_v5 = vld.sshfl [vmem:[#allocation1] sm:$0xff pattern:$0x73625140]  ;;  %2179 = vst [vmem:[#allocation1 + $0x22] ss:$4 sm:$0xff] %v1939_v61 }
 0x22f   : > { %v2293_v29 = vsel %vm1959_vm6, %v2176_v5, 0.0  ;;  %2180 = vst [vmem:[#allocation1 + $0x23] ss:$4 sm:$0xff] %v1780_v54 }
 0x230   : > { %2349 = vst.msk [vmem:[#allocation2 + $0x190] sm:$0x3] %vm2300_vm7, %v2293_v29 }
 0x231   : > { %2182 = vst [vmem:[#allocation1] ss:$4 sm:$0xff] %v1940_v17 }
 0x232   : > { %2183 = vst [vmem:[#allocation1 + $0x1] ss:$4 sm:$0xff] %v1941_v53 }
 0x233   : > { %2184 = vst [vmem:[#allocation1 + $0x2] ss:$4 sm:$0xff] %v1942_v59 }
 0x234   : > { %2185 = vst [vmem:[#allocation1 + $0x3] ss:$4 sm:$0xff] %v1781_v38 }
 0x235   : > { %2186 = vst [vmem:[#allocation1 + $0x20] ss:$4 sm:$0xff] %v1943_v36 }
 0x236 PF: > { %v4729_v22 = vld [vmem:[%s6867_s4 + $0x38] sm:$0xff]  ;;  %s4320_s28 = smul.u32 192, %s4954_s16  ;;  %v4728_v14 = vld [vmem:[%s6867_s4 + $0x30] sm:$0xff]  ;;  %vm2426_vm8 = vcmask 1046528   ;;  %v4727_v21 = vld [vmem:[%s6867_s4 + $0x28] sm:$0xff]  ;;  %vm2695_vm9 = vcmask 1045504  }
 0x237   : > { %v4725_v32 = vld [vmem:[%s6867_s4 + $0x18] sm:$0xff]  ;;  %2553 = vmatpush.bf16.msra.mxu0 %v4729_v22  ;;  %4783 = vmatpush.bf16.msra.mxu3 %v4729_v22  ;;  %v4724_v7 = vld [vmem:[%s6867_s4 + $0x10] sm:$0xff]  ;;  %v4723_v50 = vld [vmem:[%s6867_s4 + $0x8] sm:$0xff]  ;;  %vm2524_vm10 = vcmask 523264   ;;  %s4650_s22 = smul.u32 384, %s4954_s16  ;;  %s4702_s18 = sshll.u32 %s4958_s17, 6 }
 0x238   : > { %v6000_v13 = vld [vmem:[%s6867_s4 + $0x58] sm:$0xff]  ;;  %2650 = vmatpush.bf16.msra.mxu1 %v4725_v32  ;;  %v6013_v4 = vld [vmem:[%s6867_s4 + $0x50] sm:$0xff]  ;;  %s6015_s12 = scalar_lea.vmem [#allocation2], %s4320_s28  ;;  %v6041_v39 = vld [vmem:[%s6867_s4 + $0x48] sm:$0xff] }
 0x239   : > { %2821 = vmatpush.bf16.msra.mxu2 %v6000_v13  ;;  %v2356_v8 = vld [vmem:[%s6015_s12] sm:$0xff]  ;;  %v2357_v9 = vld [vmem:[%s6015_s12 + $0x8] sm:$0xff]  ;;  %v2358_v52 = vld [vmem:[%s6015_s12 + $0x10] sm:$0x3]  ;;  %s6625_s28 = scalar_lea.vmem %s5109_s24, %s4650_s22  ;;  %s4766_s24 = sshll.u32 %s4954_s16, 5 }
 0x23a   : > { %v2427_v44 = vrot.slane %v2356_v8, 1  ;;  %v2428_v25 = vrot.slane %v2357_v9, 1  ;;  %v6021_v34 = vld [vmem:[%s6015_s12 + $0x90] sm:$0xff]  ;;  %v6024_v42 = vld [vmem:[%s6015_s12 + $0x98] sm:$0xff]  ;;  %v2430_v12 = vrot.slane %v2358_v52, 1  ;;  %v2696_v46 = vrot.slane %v2356_v8, 2  ;;  %s4159_s23 = sadd.s32 %s4766_s24, %s4702_s18 }
 0x23b   : > { %2554 = vmatpush.bf16.msra.mxu0 %v4728_v14  ;;  %4784 = vmatpush.bf16.msra.mxu3 %v4728_v14  ;;  %v6030_v35 = vld [vmem:[%s6015_s12 + $0xa0] sm:$0x3]  ;;  %v2457_v47 = vrot.slane %v6021_v34, 1  ;;  %v2458_v62 = vrot.slane %v6024_v42, 1  ;;  %v2697_v15 = vrot.slane %v2357_v9, 2  ;;  %v2699_v51 = vrot.slane %v2358_v52, 2 }
 0x23c   : > { %2651 = vmatpush.bf16.msra.mxu1 %v4724_v7  ;;  %v2460_v31 = vrot.slane %v6030_v35, 1  ;;  %v2429_v19 = vsel %vm2426_vm8, %v2427_v44, %v2428_v25  ;;  %v4726_v37 = vld [vmem:[%s6867_s4 + $0x20] sm:$0xff]  ;;  %v2431_v60 = vsel %vm2426_vm8, %v2428_v25, %v2430_v12  ;;  %v4741_v16 = vld [vmem:[%s6867_s4 + $0x98] sm:$0xff]  ;;  %v2386_v48 = vpack.c.bf16 %v2357_v9, %v2356_v8  ;;  %v2361_v26 = vld [vmem:[%s6015_s12 + $0x28] sm:$0x3]  ;;  %s4703_s16 = sshll.u32 %s4159_s23, 3 }
 0x23d   : > { %2822 = vmatpush.bf16.msra.mxu2 %v6013_v4  ;;  %v2459_v55 = vsel %vm2426_vm8, %v2457_v47, %v2458_v62  ;;  %v4722_v6 = vld [vmem:[%s6867_s4] sm:$0xff]  ;;  %v2698_v10 = vsel %vm2695_vm9, %v2696_v46, %v2697_v15  ;;  %v2700_v11 = vsel %vm2695_vm9, %v2697_v15, %v2699_v51  ;;  %v2483_v56 = vpack.c.bf16 %v2431_v60, %v2429_v19  ;;  %v2359_v57 = vld [vmem:[%s6015_s12 + $0x18] sm:$0xff]  ;;  %v4740_v24 = vld [vmem:[%s6867_s4 + $0x90] sm:$0xff]  ;;  %s4161_s21 = scalar_lea.hbm %s6873_s10, %s4703_s16  ;;  %s4896_s18 = scalar_lea.hbm %s6873_s10, 1024 }
 0x23e   : > { %v2461_v18 = vsel %vm2426_vm8, %v2458_v62, %v2460_v31  ;;  %v6058_v43 = vld [vmem:[%s6867_s4 + $0x40] sm:$0xff]  ;;  %v2752_v2 = vpack.c.bf16 %v2700_v11, %v2698_v10  ;;  %v6080_v63 = vld [vmem:[%s6015_s12 + $0xa8] sm:$0xff]  ;;  %v6083_v58 = vld [vmem:[%s6015_s12 + $0xb0] sm:$0xff]  ;;  %v2432_v33 = vrot.slane %v2359_v57, 1  ;;  %v2435_v1 = vrot.slane %v2361_v26, 1  ;;  %s4164_s22 = sshll.u32 %s4161_s21, 4  ;;  %s4165_s22 = int_to_ptr.hbm [resolvable:$true] %s4164_s22 }
 0x23f   : > { %2555 = vmatpush.bf16.msra.mxu0 %v4727_v21  ;;  %4785 = vmatpush.bf16.msra.mxu3 %v4727_v21  ;;  %v6065_v40 = vpack.c.bf16 %v2461_v18, %v2459_v55  ;;  %v2360_v45 = vld [vmem:[%s6015_s12 + $0x20] sm:$0xff]  ;;  %v6086_v3 = vld [vmem:[%s6015_s12 + $0xb8] sm:$0x3]  ;;  %v2462_v20 = vrot.slane %v6080_v63, 1  ;;  %v2463_v23 = vrot.slane %v6083_v58, 1  ;;  %v2701_v30 = vrot.slane %v2359_v57, 2 }
 0x240   : > { %2652 = vmatpush.bf16.msra.mxu1 %v4723_v50  ;;  %v2433_v0 = vrot.slane %v2360_v45, 1  ;;  %v2465_v28 = vrot.slane %v6086_v3, 1  ;;  %v2702_v27 = vrot.slane %v2360_v45, 2  ;;  %v2704_v41 = vrot.slane %v2361_v26, 2  ;;  %v4739_v22 = vld [vmem:[%s6867_s4 + $0x88] sm:$0xff]  ;;  %v2366_v60 = vld [vmem:[%s6015_s12 + $0x50] sm:$0xff] }
 0x241   : > { %2823 = vmatpush.bf16.msra.mxu2 %v6041_v39  ;;  %v2464_v61 = vsel %vm2426_vm8, %v2462_v20, %v2463_v23  ;;  %v6102_v59 = vpack.c.bf16 %v2360_v45, %v2359_v57  ;;  %v2364_v14 = vld [vmem:[%s6015_s12 + $0x40] sm:$0x3]  ;;  %v2726_v21 = vrot.slane %v6021_v34, 2  ;;  %v2727_v62 = vrot.slane %v6024_v42, 2  ;;  %v2367_v55 = vld [vmem:[%s6015_s12 + $0x58] sm:$0x3] }
 0x242   : > { %v2434_v49 = vsel %vm2426_vm8, %v2432_v33, %v2433_v0  ;;  %v2436_v54 = vsel %vm2426_vm8, %v2433_v0, %v2435_v1  ;;  %v2466_v38 = vsel %vm2426_vm8, %v2463_v23, %v2465_v28  ;;  %v2703_v5 = vsel %vm2695_vm9, %v2701_v30, %v2702_v27  ;;  %v4736_v18 = vld [vmem:[%s6867_s4 + $0x70] sm:$0xff]  ;;  %s4890_s1 = sshra.s32 %s4165_s22, 4  ;;  %s4891_s1 = int_to_ptr.hbm [resolvable:$true] %s4890_s1 }
 0x243   : > { %2556 = vmatpush.bf16.msra.mxu0 %v4726_v37  ;;  %4786 = vmatpush.bf16.msra.mxu3 %v4726_v37  ;;  %v2705_v29 = vsel %vm2695_vm9, %v2702_v27, %v2704_v41  ;;  %v6097_v17 = vpack.c.bf16 %v2436_v54, %v2434_v49  ;;  %v6099_v53 = vpack.c.bf16 %v2466_v38, %v2464_v61  ;;  %v2440_v9 = vrot.slane %v2364_v14, 1  ;;  %v4749_v41 = vld [vmem:[%s6867_s4 + $0xd8] sm:$0xff]  ;;  %v2369_v49 = vld [vmem:[%s6015_s12 + $0x68] sm:$0xff]  ;;  %v2370_v54 = vld [vmem:[%s6015_s12 + $0x70] sm:$0x3]  ;;  %s4892_s29 = scalar_lea.hbm %s4891_s1, 256  ;;  %p4897_p4 = scmp.lt.s32.totalorder %s4891_s1, %s6873_s10 }
 0x244   : > { %2653 = vmatpush.bf16.msra.mxu1 %v4722_v6  ;;  %v6104_v36 = vpack.c.bf16 %v2705_v29, %v2703_v5  ;;  %v2709_v25 = vrot.slane %v2364_v14, 2  ;;  %v6134_v46 = vpack.c.bf16 %v6024_v42, %v6021_v34  ;;  %v4737_v34 = vld [vmem:[%s6867_s4 + $0x78] sm:$0xff]  ;;  %v2365_v42 = vld [vmem:[%s6015_s12 + $0x48] sm:$0xff]  ;;  %v2445_v10 = vrot.slane %v2367_v55, 1  ;;  %v4734_v38 = vld [vmem:[%s6867_s4 + $0x60] sm:$0xff]  ;;  %p4893_p0 = scmp.ne.s32.totalorder %s4891_s1, %s4892_s29  ;;  %p4898_p5 = scmp.lt.s32.totalorder %s4896_s18, %s4892_s29 }
 0x245   : > { %2824 = vmatpush.bf16.msra.mxu2 %v6058_v43  ;;  %v2711_v11 = vrot.slane %v2365_v42, 2  ;;  %v2731_v33 = vrot.slane %v6080_v63, 2  ;;  %v6172_v0 = vpack.c.bf16 %v2366_v60, %v2365_v42  ;;  %v2732_v20 = vrot.slane %v6083_v58, 2  ;;  %v4745_v61 = vld [vmem:[%s6867_s4 + $0xb8] sm:$0xff]  ;;  %v4748_v5 = vld [vmem:[%s6867_s4 + $0xd0] sm:$0xff] }
 0x246   : > { %4345 = vmatmul.msk.bf16.vlgmr.msra.gmra.mxu0 %vm2524_vm10, %v2483_v56  ;;  %4351 = vmatmul.msk.bf16.vlgmr.msra.gmra.mxu3 %vm2524_vm10, %v6065_v40  ;;  %v2714_v56 = vrot.slane %v2367_v55, 2  ;;  %v2734_v23 = vrot.slane %v6086_v3, 2  ;;  %v4738_v3 = vld [vmem:[%s6867_s4 + $0x80] sm:$0xff]  ;;  %v4744_v29 = vld [vmem:[%s6867_s4 + $0xb0] sm:$0xff]  ;;  %p4894_p1 = pnand %p4893_p0, %p5081_p3  ;;  %p4899_p6 = por %p4898_p5, %p4897_p4 }
 0x247   : > { %4787 = vmatpush.bf16.msrb.mxu3 %v4725_v32  ;;  %3035 = vmatpush.bf16.msrb.mxu0 %v4741_v16  ;;  %v2362_v32 = vld [vmem:[%s6015_s12 + $0x30] sm:$0xff]  ;;  %v2712_v16 = vrot.slane %v2366_v60, 2  ;;  %v2733_v28 = vsel %vm2695_vm9, %v2731_v33, %v2732_v20 }
 0x248   : > { %4369 = vmatmul.msk.bf16.vlgmr.msra.gmra.mxu1 %vm2524_vm10, %v2386_v48  ;;  %4401 = vmatmul.msk.bf16.vlgmr.msra.gmra.mxu2 %vm2524_vm10, %v2752_v2  ;;  %v2706_v52 = vrot.slane %v2362_v32, 2  ;;  %v2735_v30 = vsel %vm2695_vm9, %v2732_v20, %v2734_v23  ;;  %v4752_v20 = vld [vmem:[%s6867_s4 + $0xf0] sm:$0xff]  ;;  %p4895_p2 = pneg %p4894_p1 }
 0x249   : > { %v2713_v57 = vsel %vm2695_vm9, %v2711_v11, %v2712_v16  ;;  %v2715_v45 = vsel %vm2695_vm9, %v2712_v16, %v2714_v56  ;;  %v6185_v27 = vpack.c.bf16 %v2735_v30, %v2733_v28  ;;  %3246 = vmatpush.bf16.msrb.mxu2 %v4749_v41  ;;  %3144 = vmatpush.bf16.msrb.mxu1 %v4745_v61  ;;  %v4756_v23 = vld [vmem:[%s6867_s4 + $0x110] sm:$0xff]  ;;  %v4755_v41 = vld [vmem:[%s6867_s4 + $0x108] sm:$0xff] }
 0x24a   : > { %v6174_v1 = vpack.c.bf16 %v2715_v45, %v2713_v57  ;;  %p4900_p7 = pnand %p4899_p6, %p4895_p2 }
 0x24b   : > { %4788 = vmatpush.bf16.msrb.mxu3 %v4724_v7  ;;  %3036 = vmatpush.bf16.msrb.mxu0 %v4740_v24  ;;  %v2437_v7 = vrot.slane %v2362_v32, 1  ;;  %v6169_v24 = vpack.c.bf16 %v6083_v58, %v6080_v63  ;;  %v2368_v63 = vld [vmem:[%s6015_s12 + $0x60] sm:$0xff]  ;;  %v4735_v58 = vld [vmem:[%s6867_s4 + $0x68] sm:$0xff] }
 0x24c   : > { %v2716_v14 = vrot.slane %v2368_v63, 2 }
 0x24d   : > { %3247 = vmatpush.bf16.msrb.mxu2 %v4748_v5  ;;  %3145 = vmatpush.bf16.msrb.mxu1 %v4744_v29 }
 0x24f   : > { %4789 = vmatpush.bf16.msrb.mxu3 %v4723_v50  ;;  %3037 = vmatpush.bf16.msrb.mxu0 %v4739_v22  ;;  %v2729_v50 = vrot.slane %v6030_v35, 2  ;;  %v2728_v35 = vsel %vm2695_vm9, %v2726_v21, %v2727_v62  ;;  %v2447_v22 = vrot.slane %v2368_v63, 1 }
 0x251   : > { %v2730_v51 = vsel %vm2695_vm9, %v2727_v62, %v2729_v50  ;;  %v4753_v50 = vld [vmem:[%s6867_s4 + $0xf8] sm:$0xff] }
 0x252   : > { %v6142_v37 = vpack.c.bf16 %v2730_v51, %v2728_v35  ;;  %v2371_v35 = vld [vmem:[%s6015_s12 + $0x78] sm:$0xff] }
 0x253   : > { %4790 = vmatpush.bf16.msrb.mxu3 %v4722_v6  ;;  %v2442_v6 = vrot.slane %v2365_v42, 1  ;;  %3038 = vmatpush.bf16.msrb.mxu0 %v4738_v3  ;;  %v4757_v51 = vld [vmem:[%s6867_s4 + $0x118] sm:$0xff]  ;;  %v2373_v42 = vld [vmem:[%s6015_s12 + $0x88] sm:$0x3]  ;;  %v2452_v55 = vrot.slane %v2371_v35, 1 }
 0x254   : > { %v2724_v11 = vrot.slane %v2373_v42, 2 }
 0x256   : > { %4346 = vmatmul.msk.bf16.gmra.mxu0 %vm2524_vm10, %v6097_v17  ;;  %4352 = vmatmul.msk.bf16.gmra.mxu3 %vm2524_vm10, %v6099_v53 }
 0x257   : > { %4791 = vmatpush.bf16.msra.mxu3 %v6000_v13  ;;  %v2363_v13 = vld [vmem:[%s6015_s12 + $0x38] sm:$0xff]  ;;  %3467 = vmatpush.bf16.msra.mxu0 %v4757_v51 }
 0x258   : > { %4370 = vmatmul.msk.bf16.gmra.mxu1 %vm2524_vm10, %v6102_v59  ;;  %4402 = vmatmul.msk.bf16.gmra.mxu2 %vm2524_vm10, %v6104_v36  ;;  %v2438_v8 = vrot.slane %v2363_v13, 1  ;;  %v2707_v44 = vrot.slane %v2363_v13, 2  ;;  %v6136_v15 = vpack.c.bf16 %v2363_v13, %v2362_v32  ;;  %v2448_v32 = vrot.slane %v2369_v49, 1 }
 0x259   : > { %v2450_v13 = vrot.slane %v2370_v54, 1 }
 0x25a   : > { %v2439_v12 = vsel %vm2426_vm8, %v2437_v7, %v2438_v8  ;;  %v2441_v47 = vsel %vm2426_vm8, %v2438_v8, %v2440_v9  ;;  %v2710_v31 = vsel %vm2695_vm9, %v2707_v44, %v2709_v25  ;;  %v2717_v7 = vrot.slane %v2369_v49, 2  ;;  %v4747_v9 = vld [vmem:[%s6867_s4 + $0xc8] sm:$0xff] }
 0x25b   : > { %4792 = vmatpush.bf16.msra.mxu3 %v6013_v4  ;;  %v2708_v4 = vsel %vm2695_vm9, %v2706_v52, %v2707_v44  ;;  %v2719_v8 = vrot.slane %v2370_v54, 2  ;;  %v2449_v52 = vsel %vm2426_vm8, %v2447_v22, %v2448_v32  ;;  %v2451_v44 = vsel %vm2426_vm8, %v2448_v32, %v2450_v13  ;;  %3248 = vmatpush.bf16.msrb.mxu2 %v4747_v9 }
 0x25c   : > { %v6138_v19 = vpack.c.bf16 %v2710_v31, %v2708_v4  ;;  %v2718_v25 = vsel %vm2695_vm9, %v2716_v14, %v2717_v7  ;;  %v4743_v4 = vld [vmem:[%s6867_s4 + $0xa8] sm:$0xff]  ;;  %v4746_v31 = vld [vmem:[%s6867_s4 + $0xc0] sm:$0xff]  ;;  %3468 = vmatpush.bf16.msra.mxu0 %v4756_v23 }
 0x25d   : > { %v2720_v21 = vsel %vm2695_vm9, %v2717_v7, %v2719_v8  ;;  %3146 = vmatpush.bf16.msrb.mxu1 %v4743_v4  ;;  %v2381_v23 = vld [vmem:[%s6015_s12 + $0xc8] sm:$0xff] }
 0x25e   : > { %v6225_v62 = vpack.c.bf16 %v2720_v21, %v2718_v25 }
 0x25f   : > { %4793 = vmatpush.bf16.msra.mxu3 %v6041_v39  ;;  %v6130_v39 = vpack.c.bf16 %v2441_v47, %v2439_v12  ;;  %v6221_v12 = vpack.c.bf16 %v2451_v44, %v2449_v52  ;;  %v6223_v47 = vpack.c.bf16 %v2369_v49, %v2368_v63  ;;  %3249 = vmatpush.bf16.msrb.mxu2 %v4746_v31 }
 0x260   : > { %3469 = vmatpush.bf16.msra.mxu0 %v4755_v41 }
 0x263   : > { %4794 = vmatpush.bf16.msra.mxu3 %v6058_v43  ;;  %v2443_v43 = vrot.slane %v2366_v60, 1  ;;  %v4742_v60 = vld [vmem:[%s6867_s4 + $0xa0] sm:$0xff] }
 0x264   : > { %3147 = vmatpush.bf16.msrb.mxu1 %v4742_v60  ;;  %v4754_v60 = vld [vmem:[%s6867_s4 + $0x100] sm:$0xff] }
 0x265   : > { %v2444_v48 = vsel %vm2426_vm8, %v2442_v6, %v2443_v43  ;;  %v2446_v2 = vsel %vm2426_vm8, %v2443_v43, %v2445_v10  ;;  %v2455_v6 = vrot.slane %v2373_v42, 1  ;;  %v2721_v43 = vrot.slane %v2371_v35, 2  ;;  %3470 = vmatpush.bf16.msra.mxu0 %v4754_v60 }
 0x266   : > { %4347 = vmatmul.msk.bf16.gmra.mxu0 %vm2524_vm10, %v6130_v39  ;;  %4375 = vmatmul.msk.bf16.vlgmr.msrb.gmra.mxu3 %vm2524_vm10, %v6134_v46  ;;  %v6165_v26 = vpack.c.bf16 %v2446_v2, %v2444_v48 }
 0x267   : > { %2923 = vmatpush.bf16.msrb.mxu3 %v4737_v34  ;;  %v2372_v34 = vld [vmem:[%s6015_s12 + $0x80] sm:$0xff] }
 0x268   : > { %4371 = vmatmul.msk.bf16.gmra.mxu1 %vm2524_vm10, %v6136_v15  ;;  %4403 = vmatmul.msk.bf16.gmra.mxu2 %vm2524_vm10, %v6138_v19  ;;  %v2722_v10 = vrot.slane %v2372_v34, 2  ;;  %v2391_v45 = vpack.c.bf16 %v2372_v34, %v2371_v35 }
 0x26a   : > { %v2723_v48 = vsel %vm2695_vm9, %v2721_v43, %v2722_v10  ;;  %v2725_v2 = vsel %vm2695_vm9, %v2722_v10, %v2724_v11 }
 0x26b   : > { %2924 = vmatpush.bf16.msrb.mxu3 %v4736_v18  ;;  %v2453_v18 = vrot.slane %v2372_v34, 1  ;;  %v6259_v33 = vpack.c.bf16 %v2725_v2, %v2723_v48 }
 0x26d   : > { %v2454_v16 = vsel %vm2426_vm8, %v2452_v55, %v2453_v18  ;;  %v2456_v56 = vsel %vm2426_vm8, %v2453_v18, %v2455_v6 }
 0x26e   : > { %v6257_v57 = vpack.c.bf16 %v2456_v56, %v2454_v16 }
 0x26f   : > { %2925 = vmatpush.bf16.msrb.mxu3 %v4735_v58 }
 0x273   : > { %2926 = vmatpush.bf16.msrb.mxu3 %v4734_v38 }
 0x276   : > { %4348 = vmatmul.msk.bf16.gmra.mxu0 %vm2524_vm10, %v6165_v26  ;;  %4376 = vmatmul.msk.bf16.gmra.mxu3 %vm2524_vm10, %v6169_v24 }
 0x278   : > { %4372 = vmatmul.msk.bf16.gmra.mxu1 %vm2524_vm10, %v6172_v0  ;;  %4404 = vmatmul.msk.bf16.gmra.mxu2 %vm2524_vm10, %v6174_v1 }
 0x286   : > { %4349 = vmatmul.msk.bf16.gmra.mxu0 %vm2524_vm10, %v6221_v12  ;;  %4407 = vmatmul.msk.bf16.vlgmr.msra.gmra.mxu3 %vm2524_vm10, %v6142_v37 }
 0x287   : > { %3358 = vmatpush.bf16.msra.mxu3 %v4753_v50  ;;  %v4750_v50 = vld [vmem:[%s6867_s4 + $0xe0] sm:$0xff] }
 0x288   : > { %4373 = vmatmul.msk.bf16.gmra.mxu1 %vm2524_vm10, %v6223_v47  ;;  %4405 = vmatmul.msk.bf16.gmra.mxu2 %vm2524_vm10, %v6225_v62 }
 0x28b   : > { %3359 = vmatpush.bf16.msra.mxu3 %v4752_v20 }
 0x296   : > { %4350 = vmatmul.msk.bf16.gmra.mxu0 %vm2524_vm10, %v6257_v57  ;;  %4408 = vmatmul.msk.bf16.gmra.mxu3 %vm2524_vm10, %v6185_v27 }
 0x298   : > { %4374 = vmatmul.msk.bf16.gmra.mxu1 %vm2524_vm10, %v2391_v45  ;;  %4406 = vmatmul.msk.bf16.gmra.mxu2 %vm2524_vm10, %v6259_v33 }
 0x2a6   : > { %4433 = vmatmul.msk.bf16.vlgmr.msrb.gmra.mxu3 %vm2524_vm10, %v6102_v59  ;;  %4465 = vmatmul.msk.bf16.vlgmr.msrb.gmra.mxu0 %vm2524_vm10, %v6097_v17 }
 0x2a8   : > { %4529 = vmatmul.msk.bf16.vlgmr.msrb.gmra.mxu2 %vm2524_vm10, %v6136_v15  ;;  %4497 = vmatmul.msk.bf16.vlgmr.msrb.gmra.mxu1 %vm2524_vm10, %v6104_v36 }
 0x2b6   : > { %4434 = vmatmul.msk.bf16.gmra.mxu3 %vm2524_vm10, %v6136_v15  ;;  %4466 = vmatmul.msk.bf16.gmra.mxu0 %vm2524_vm10, %v6130_v39  ;;  %v4751_v15 = vld [vmem:[%s6867_s4 + $0xe8] sm:$0xff] }
 0x2b7   : > { %3360 = vmatpush.bf16.msra.mxu3 %v4751_v15 }
 0x2b8   : > { %4530 = vmatmul.msk.bf16.gmra.mxu2 %vm2524_vm10, %v6172_v0  ;;  %4498 = vmatmul.msk.bf16.gmra.mxu1 %vm2524_vm10, %v6138_v19 }
 0x2bb   : > { %3361 = vmatpush.bf16.msra.mxu3 %v4750_v50 }
 0x2c3   : > { %v2558_v17 = vpop.f32.mrf.mxu0 }
 0x2c5   : > { %v2655_v59 = vpop.f32.mrf.mxu1 }
 0x2c6   : > { %v2656_v36 = vadd.f32 %v2655_v59, %v2558_v17  ;;  %4435 = vmatmul.msk.bf16.gmra.mxu3 %vm2524_vm10, %v6172_v0  ;;  %4467 = vmatmul.msk.bf16.gmra.mxu0 %vm2524_vm10, %v6165_v26 }
 0x2c8   : > { %4531 = vmatmul.msk.bf16.gmra.mxu2 %vm2524_vm10, %v6223_v47  ;;  %4499 = vmatmul.msk.bf16.gmra.mxu1 %vm2524_vm10, %v6174_v1 }
 0x2c9   : > { %v2588_v28 = vpop.f32.mrf.mxu3 }
 0x2cb   : > { %v2826_v30 = vpop.f32.mrf.mxu2  ;;  %v2560_v58 = vpop.f32.mrf.mxu0 }
 0x2cc   : > { %v6301_v63 = vadd.f32 %v2826_v30, %v2656_v36 }
 0x2cd   : > { %v2657_v0 = vpop.f32.mrf.mxu1 }
 0x2ce   : > { %v2658_v3 = vadd.f32 %v2657_v0, %v2560_v58  ;;  %v2382_v0 = vld [vmem:[%s6015_s12 + $0xd0] sm:$0x3] }
 0x2d1   : > { %v2590_v49 = vpop.f32.mrf.mxu3 }
 0x2d3   : > { %v2828_v54 = vpop.f32.mrf.mxu2  ;;  %v2563_v38 = vpop.f32.mrf.mxu0 }
 0x2d4   : > { %v6306_v61 = vadd.f32 %v2828_v54, %v2658_v3 }
 0x2d5   : > { %v2660_v5 = vpop.f32.mrf.mxu1 }
 0x2d6   : > { %v2661_v29 = vadd.f32 %v2660_v5, %v2563_v38  ;;  %4436 = vmatmul.msk.bf16.gmra.mxu3 %vm2524_vm10, %v6223_v47  ;;  %4468 = vmatmul.msk.bf16.gmra.mxu0 %vm2524_vm10, %v6221_v12  ;;  %v2988_v5 = vrot.slane %v2381_v23, 1 }
 0x2d8   : > { %4532 = vmatmul.msk.bf16.gmra.mxu2 %vm2524_vm10, %v2391_v45  ;;  %4500 = vmatmul.msk.bf16.gmra.mxu1 %vm2524_vm10, %v6225_v62 }
 0x2d9   : > { %v2593_v22 = vpop.f32.mrf.mxu3 }
 0x2db   : > { %v2831_v32 = vpop.f32.mrf.mxu2  ;;  %v2565_v14 = vpop.f32.mrf.mxu0 }
 0x2dc   : > { %v6315_v13 = vadd.f32 %v2831_v32, %v2661_v29  ;;  %v2990_v29 = vrot.slane %v2382_v0, 1 }
 0x2dd   : > { %v2662_v7 = vpop.f32.mrf.mxu1 }
 0x2de   : > { %v2663_v8 = vadd.f32 %v2662_v7, %v2565_v14  ;;  %v3097_v14 = vrot.slane %v2381_v23, 2  ;;  %v3099_v7 = vrot.slane %v2382_v0, 2 }
 0x2e1   : > { %v2595_v9 = vpop.f32.mrf.mxu3 }
 0x2e3   : > { %v2833_v52 = vpop.f32.mrf.mxu2  ;;  %v2568_v25 = vpop.f32.mrf.mxu0 }
 0x2e4   : > { %v6317_v44 = vadd.f32 %v2833_v52, %v2663_v8  ;;  %v6377_v52 = vld [vmem:[%s6015_s12 + $0xd8] sm:$0xff] }
 0x2e5   : > { %v2665_v21 = vpop.f32.mrf.mxu1 }
 0x2e6   : > { %v2666_v47 = vadd.f32 %v2665_v21, %v2568_v25  ;;  %4437 = vmatmul.msk.bf16.gmra.mxu3 %vm2524_vm10, %v2391_v45  ;;  %4469 = vmatmul.msk.bf16.gmra.mxu0 %vm2524_vm10, %v6257_v57  ;;  %v6380_v25 = vld [vmem:[%s6015_s12 + $0xe0] sm:$0xff] }
 0x2e8   : > { %4533 = vmatmul.msk.bf16.gmra.mxu2 %vm2524_vm10, %v6134_v46  ;;  %4501 = vmatmul.msk.bf16.gmra.mxu1 %vm2524_vm10, %v6259_v33 }
 0x2e9   : > { %v2685_v4 = vpop.f32.mrf.mxu3 }
 0x2ea   : > { %v2686_v31 = vadd.f32 %v2685_v4, %v2588_v28 }
 0x2eb   : > { %v2836_v35 = vpop.f32.mrf.mxu2  ;;  %v6331_v34 = vpop.f32.mrf.mxu0 }
 0x2ec   : > { %v6329_v51 = vadd.f32 %v2836_v35, %v2666_v47  ;;  %v3100_v47 = vsel %vm2695_vm9, %v3097_v14, %v3099_v7 }
 0x2ed   : > { %v6333_v42 = vpop.f32.mrf.mxu1 }
 0x2f1   : > { %v2687_v55 = vpop.f32.mrf.mxu3 }
 0x2f2   : > { %v2688_v18 = vadd.f32 %v2687_v55, %v2590_v49  ;;  %v3205_v55 = vpack.c.bf16 %v6380_v25, %v6377_v52 }
 0x2f3   : > { %v6338_v6 = vpop.f32.mrf.mxu2  ;;  %v2573_v43 = vpop.f32.mrf.mxu0 }
 0x2f5   : > { %v2670_v10 = vpop.f32.mrf.mxu1 }
 0x2f6   : > { %v2671_v11 = vadd.f32 %v2670_v10, %v2573_v43  ;;  %4438 = vmatmul.msk.bf16.gmra.mxu3 %vm2524_vm10, %v6134_v46  ;;  %4470 = vmatmul.msk.bf16.gmra.mxu0 %vm2524_vm10, %v6065_v40  ;;  %v2380_v46 = vld [vmem:[%s6015_s12 + $0xc0] sm:$0xff] }
 0x2f7   : > { %v2882_v28 = vpack.c.bf16 %v2381_v23, %v2380_v46  ;;  %v3096_v32 = vrot.slane %v2380_v46, 2 }
 0x2f8   : > { %4534 = vmatmul.msk.bf16.gmra.mxu2 %vm2524_vm10, %v6169_v24  ;;  %4502 = vmatmul.msk.bf16.gmra.mxu1 %vm2524_vm10, %v6142_v37 }
 0x2f9   : > { %v2690_v16 = vpop.f32.mrf.mxu3  ;;  %v3098_v21 = vsel %vm2695_vm9, %v3096_v32, %v3097_v14 }
 0x2fa   : > { %v2691_v56 = vadd.f32 %v2690_v16, %v2593_v22  ;;  %v6392_v43 = vpack.c.bf16 %v3100_v47, %v3098_v21  ;;  %v4762_v21 = vld [vmem:[%s6870_s7 + $0x24] sm:$0xf] }
 0x2fb   : > { %v2841_v48 = vpop.f32.mrf.mxu2  ;;  %v6350_v45 = vpop.f32.mrf.mxu0 }
 0x2fc   : > { %v6348_v2 = vadd.f32 %v2841_v48, %v2671_v11 }
 0x2fd   : > { %v6352_v20 = vpop.f32.mrf.mxu1 }
 0x301   : > { %v2692_v17 = vpop.f32.mrf.mxu3 }
 0x302   : > { %v2693_v59 = vadd.f32 %v2692_v17, %v2595_v9  ;;  %v2991_v9 = vsel %vm2426_vm8, %v2988_v5, %v2990_v29  ;;  %v4764_v17 = vld [vmem:[%s6870_s7 + $0x34] sm:$0xf] }
 0x303   : > { %v6356_v36 = vpop.f32.mrf.mxu2  ;;  %v2578_v15 = vpop.f32.mrf.mxu0 }
 0x305   : > { %v2675_v30 = vpop.f32.mrf.mxu1 }
 0x306   : > { %v2676_v58 = vadd.f32 %v2675_v30, %v2578_v15  ;;  %4439 = vmatmul.msk.bf16.gmra.mxu3 %vm2524_vm10, %v6169_v24  ;;  %4471 = vmatmul.msk.bf16.gmra.mxu0 %vm2524_vm10, %v6099_v53  ;;  %v2987_v24 = vrot.slane %v2380_v46, 1  ;;  %v4629_v15 = vld [vmem:[%s6870_s7 + $0x38] sm:$0xf0] }
 0x308   : > { %4535 = vmatmul.msk.bf16.gmra.mxu2 %vm2524_vm10, %v2882_v28  ;;  %4503 = vmatmul.msk.bf16.gmra.mxu1 %vm2524_vm10, %v6185_v27  ;;  %v2989_v8 = vsel %vm2426_vm8, %v2987_v24, %v2988_v5 }
 0x309   : > { %v2856_v3 = vpop.f32.mrf.mxu3  ;;  %v6388_v35 = vpack.c.bf16 %v2991_v9, %v2989_v8 }
 0x30a   : > { %v6366_v49 = vadd.f32 %v2856_v3, %v2686_v31  ;;  %v4765_v3 = vld [vmem:[%s6870_s7 + $0x34] sm:$0xf0] }
 0x30b   : > { %v2846_v41 = vpop.f32.mrf.mxu2  ;;  %v6370_v38 = vpop.f32.mrf.mxu0 }
 0x30c   : > { %v6368_v54 = vadd.f32 %v2846_v41, %v2676_v58 }
 0x30d   : > { %v6372_v22 = vpop.f32.mrf.mxu1 }
 0x311   : > { %v2858_v50 = vpop.f32.mrf.mxu3 }
 0x312   : > { %v6386_v31 = vadd.f32 %v2858_v50, %v2688_v18 }
 0x313   : > { %v6384_v4 = vpop.f32.mrf.mxu2  ;;  %v2583_v60 = vpop.f32.mrf.mxu0 }
 0x315   : > { %v2680_v10 = vpop.f32.mrf.mxu1 }
 0x316   : > { %v2681_v11 = vadd.f32 %v2680_v10, %v2583_v60  ;;  %4440 = vmatmul.msk.bf16.gmra.mxu3 %vm2524_vm10, %v2882_v28  ;;  %4472 = vmatmul.msk.bf16.gmra.mxu0 %vm2524_vm10, %v6388_v35  ;;  %v4632_v28 = vor.u32 %v4764_v17, %v4629_v15  ;;  %v4763_v60 = vld [vmem:[%s6870_s7 + $0x24] sm:$0xf0]  ;;  %v2668_v17 = vadd.f32 %v6333_v42, %v6331_v34  ;;  %v4760_v42 = vld [vmem:[%s6870_s7 + $0x14] sm:$0xf] }
 0x317   : > { %v2673_v34 = vadd.f32 %v6352_v20, %v6350_v45  ;;  %v4761_v45 = vld [vmem:[%s6870_s7 + $0x14] sm:$0xf0] }
 0x318   : > { %4536 = vmatmul.msk.bf16.gmra.mxu2 %vm2524_vm10, %v3205_v55  ;;  %4504 = vmatmul.msk.bf16.gmra.mxu1 %vm2524_vm10, %v6392_v43  ;;  %v2871_v15 = vadd.f32 %v6338_v6, %v2668_v17 }
 0x319   : > { %v2861_v18 = vpop.f32.mrf.mxu3  ;;  %3717 = vmatpush.bf16.msra.mxu2 %v4632_v28 }
 0x31a   : > { %v6400_v48 = vadd.f32 %v2861_v18, %v2691_v56  ;;  %v4627_v56 = vld [vmem:[%s6870_s7 + $0x30] sm:$0xf] }
 0x31b   : > { %v2851_v16 = vpop.f32.mrf.mxu2  ;;  %v6404_v23 = vpop.f32.mrf.mxu0  ;;  %v4628_v41 = vor.u32 %v4765_v3, %v4627_v56 }
 0x31c   : > { %v6402_v46 = vadd.f32 %v2851_v16, %v2681_v11 }
 0x31d   : > { %3668 = vmatpush.bf16.msra.mxu1 %v4628_v41 }
 0x321   : > { %v2863_v30 = vpop.f32.mrf.mxu3 }
 0x322   : > { %v6412_v58 = vadd.f32 %v2863_v30, %v2693_v59 }
 0x323   : > { %v3040_v0 = vpop.f32.mrf.mxu0 }
 0x326   : > { %4561 = vmatmul.msk.bf16.vlgmr.msra.gmra.mxu3 %vm2524_vm10, %v6130_v39  ;;  %4593 = vmatmul.msk.bf16.vlgmr.msra.gmra.mxu0 %vm2524_vm10, %v6138_v19 }
 0x329   : > { %v2928_v24 = vpop.f32.mrf.mxu3 }
 0x32a   : > { %v2968_v59 = vadd.f32 %v2928_v24, %v6301_v63 }
 0x32b   : > { %v3042_v5 = vpop.f32.mrf.mxu0 }
 0x32c   : > { %v6425_v29 = vadd.f32 %v3040_v0, %v2968_v59  ;;  %v4611_v59 = vld [vmem:[%s6870_s7 + $0x10] sm:$0xf] }
 0x331   : > { %v2930_v32 = vpop.f32.mrf.mxu3 }
 0x332   : > { %v2969_v14 = vadd.f32 %v2930_v32, %v6306_v61  ;;  %v4621_v61 = vld [vmem:[%s6870_s7 + $0x28] sm:$0xf0] }
 0x333   : > { %v3045_v7 = vpop.f32.mrf.mxu0  ;;  %v4624_v47 = vor.u32 %v4762_v21, %v4621_v61  ;;  %v3311_v21 = vrot.slane %v6380_v25, 1 }
 0x334   : > { %v6428_v8 = vadd.f32 %v3042_v5, %v2969_v14  ;;  %v4612_v5 = vor.u32 %v4761_v45, %v4611_v59 }
 0x335   : > { %3718 = vmatpush.bf16.msra.mxu2 %v4624_v47  ;;  %v2385_v47 = vld [vmem:[%s6015_s12 + $0xe8] sm:$0x3]  ;;  %s4162_s12 = sshll.u32 %s5111_s25, 4  ;;  %s4163_s12 = int_to_ptr.vmem [resolvable:$true] %s4162_s12 }
 0x336   : > { %4562 = vmatmul.msk.bf16.gmra.mxu3 %vm2524_vm10, %v6165_v26  ;;  %4594 = vmatmul.msk.bf16.gmra.mxu0 %vm2524_vm10, %v6174_v1 }
 0x339   : > { %v2933_v39 = vpop.f32.mrf.mxu3 }
 0x33a   : > { %v2970_v19 = vadd.f32 %v2933_v39, %v6315_v13  ;;  %v4619_v13 = vld [vmem:[%s6870_s7 + $0x20] sm:$0xf]  ;;  %v2678_v39 = vadd.f32 %v6372_v22, %v6370_v38 }
 0x33b   : > { %v3047_v9 = vpop.f32.mrf.mxu0  ;;  %v4620_v10 = vor.u32 %v4763_v60, %v4619_v13 }
 0x33c   : > { %v6435_v63 = vadd.f32 %v3045_v7, %v2970_v19  ;;  %v3310_v19 = vrot.slane %v6377_v52, 1 }
 0x33d   : > { %3669 = vmatpush.bf16.msra.mxu1 %v4620_v10 }
 0x33e   : > { %v3312_v38 = vsel %vm2426_vm8, %v3310_v19, %v3311_v21 }
 0x341   : > { %v2935_v50 = vpop.f32.mrf.mxu3  ;;  %3670 = vmatpush.bf16.msra.mxu1 %v4612_v5 }
 0x342   : > { %v2971_v26 = vadd.f32 %v2935_v50, %v6317_v44 }
 0x343   : > { %v3050_v1 = vpop.f32.mrf.mxu0 }
 0x344   : > { %v6450_v55 = vadd.f32 %v3047_v9, %v2971_v26  ;;  %v2875_v9 = vadd.f32 %v6384_v4, %v2678_v39  ;;  %v3422_v26 = vrot.slane %v2385_v47, 2 }
 0x346   : > { %4563 = vmatmul.msk.bf16.gmra.mxu3 %vm2524_vm10, %v6221_v12  ;;  %4595 = vmatmul.msk.bf16.gmra.mxu0 %vm2524_vm10, %v6225_v62 }
 0x349   : > { %v2938_v44 = vpop.f32.mrf.mxu3 }
 0x34a   : > { %v2972_v11 = vadd.f32 %v2938_v44, %v6329_v51  ;;  %v2682_v44 = vpop.f32.mrf.mxu1 }
 0x34b   : > { %v3052_v18 = vpop.f32.mrf.mxu0 }
 0x34c   : > { %v6457_v16 = vadd.f32 %v3050_v1, %v2972_v11 }
 0x351   : > { %v2940_v28 = vpop.f32.mrf.mxu3 }
 0x352   : > { %v2973_v30 = vadd.f32 %v2940_v28, %v2871_v15  ;;  %v2853_v15 = vpop.f32.mrf.mxu2  ;;  %v2683_v28 = vadd.f32 %v2682_v44, %v6404_v23  ;;  %v4759_v23 = vld [vmem:[%s6870_s7 + $0x4] sm:$0xf0] }
 0x353   : > { %v3055_v0 = vpop.f32.mrf.mxu0 }
 0x354   : > { %v6462_v56 = vadd.f32 %v3052_v18, %v2973_v30  ;;  %v4758_v30 = vld [vmem:[%s6870_s7 + $0x4] sm:$0xf] }
 0x356   : > { %4564 = vmatmul.msk.bf16.gmra.mxu3 %vm2524_vm10, %v6257_v57  ;;  %4596 = vmatmul.msk.bf16.gmra.mxu0 %vm2524_vm10, %v6259_v33  ;;  %v4613_v57 = vld [vmem:[%s6870_s7 + $0x18] sm:$0xf0]  ;;  %v2873_v33 = vadd.f32 %v6356_v36, %v2673_v34  ;;  %v4603_v34 = vld [vmem:[%s6870_s7] sm:$0xf] }
 0x357   : > { %v4616_v6 = vor.u32 %v4760_v42, %v4613_v57  ;;  %v4604_v57 = vor.u32 %v4759_v23, %v4603_v34 }
 0x359   : > { %v2943_v12 = vpop.f32.mrf.mxu3  ;;  %3719 = vmatpush.bf16.msra.mxu2 %v4616_v6  ;;  %3671 = vmatpush.bf16.msra.mxu1 %v4604_v57 }
 0x35a   : > { %v2974_v62 = vadd.f32 %v2943_v12, %v6348_v2  ;;  %v3251_v6 = vpop.f32.mrf.mxu2 }
 0x35b   : > { %v3057_v51 = vpop.f32.mrf.mxu0 }
 0x35c   : > { %v6469_v3 = vadd.f32 %v3055_v0, %v2974_v62  ;;  %v2877_v0 = vadd.f32 %v2853_v15, %v2683_v28  ;;  %v3149_v62 = vpop.f32.mrf.mxu1 }
 0x361   : > { %v2945_v41 = vpop.f32.mrf.mxu3 }
 0x362   : > { %v2975_v2 = vadd.f32 %v2945_v41, %v2873_v33  ;;  %v3253_v45 = vpop.f32.mrf.mxu2 }
 0x363   : > { %v3060_v24 = vpop.f32.mrf.mxu0 }
 0x364   : > { %v6486_v20 = vadd.f32 %v3057_v51, %v2975_v2 }
 0x366   : > { %4565 = vmatmul.msk.bf16.gmra.mxu3 %vm2524_vm10, %v6065_v40  ;;  %4597 = vmatmul.msk.bf16.gmra.mxu0 %vm2524_vm10, %v6142_v37  ;;  %v3419_v40 = vrot.slane %v6377_v52, 2  ;;  %v3420_v37 = vrot.slane %v6380_v25, 2 }
 0x368   : > { %v3421_v4 = vsel %vm2695_vm9, %v3419_v40, %v3420_v37  ;;  %v3423_v10 = vsel %vm2695_vm9, %v3420_v37, %v3422_v26 }
 0x369   : > { %v2948_v36 = vpop.f32.mrf.mxu3  ;;  %v3426_v52 = vpack.c.bf16 %v3423_v10, %v3421_v4 }
 0x36a   : > { %v2976_v32 = vadd.f32 %v2948_v36, %v6368_v54  ;;  %v3313_v54 = vrot.slane %v2385_v47, 1 }
 0x36b   : > { %v3062_v14 = vpop.f32.mrf.mxu0 }
 0x36c   : > { %v6493_v7 = vadd.f32 %v3060_v24, %v2976_v32  ;;  %v3314_v22 = vsel %vm2426_vm8, %v3311_v21, %v3313_v54  ;;  %v3151_v24 = vpop.f32.mrf.mxu1 }
 0x36d   : > { %v3317_v60 = vpack.c.bf16 %v3314_v22, %v3312_v38 }
 0x371   : > { %v2950_v61 = vpop.f32.mrf.mxu3 }
 0x372   : > { %v2977_v50 = vadd.f32 %v2950_v61, %v2875_v9  ;;  %v3189_v61 = vadd.f32 %v3149_v62, %v6425_v29 }
 0x373   : > { %v3065_v1 = vpop.f32.mrf.mxu0 }
 0x374   : > { %v6503_v13 = vadd.f32 %v3062_v14, %v2977_v50  ;;  %v3291_v54 = vadd.f32 %v3251_v6, %v3189_v61 }
 0x376   : > { %4566 = vmatmul.msk.bf16.gmra.mxu3 %vm2524_vm10, %v6099_v53  ;;  %4598 = vmatmul.msk.bf16.gmra.mxu0 %vm2524_vm10, %v6185_v27  ;;  %v4605_v53 = vld [vmem:[%s6870_s7 + $0x8] sm:$0xf0] }
 0x377   : > { %v4608_v27 = vor.u32 %v4758_v30, %v4605_v53 }
 0x379   : > { %v2953_v25 = vpop.f32.mrf.mxu3  ;;  %3720 = vmatpush.bf16.msra.mxu2 %v4608_v27 }
 0x37a   : > { %v2978_v11 = vadd.f32 %v2953_v25, %v6402_v46  ;;  %v6560_v25 = vld [vmem:[%s6869_s6] ss:$0 sm:$0xff] }
 0x37b   : > { %v3067_v18 = vpop.f32.mrf.mxu0 }
 0x37c   : > { %v6514_v17 = vadd.f32 %v3065_v1, %v2978_v11 }
 0x381   : > { %v2955_v12 = vpop.f32.mrf.mxu3 }
 0x382   : > { %v2979_v46 = vadd.f32 %v2955_v12, %v2877_v0 }
 0x383   : > { %v3070_v51 = vpop.f32.mrf.mxu0 }
 0x384   : > { %v6529_v42 = vadd.f32 %v3067_v18, %v2979_v46 }
 0x386   : > { %4567 = vmatmul.msk.bf16.gmra.mxu3 %vm2524_vm10, %v6388_v35  ;;  %4599 = vmatmul.msk.bf16.gmra.mxu0 %vm2524_vm10, %v6392_v43  ;;  %v3154_v35 = vpop.f32.mrf.mxu1 }
 0x389   : > { %v2958_v33 = vpop.f32.mrf.mxu3 }
 0x38a   : > { %v2980_v41 = vadd.f32 %v2958_v33, %v6366_v49  ;;  %v3256_v49 = vpop.f32.mrf.mxu2 }
 0x38b   : > { %v3072_v2 = vpop.f32.mrf.mxu0 }
 0x38c   : > { %v6536_v59 = vadd.f32 %v3070_v51, %v2980_v41 }
 0x38e   : > { %v3156_v21 = vpop.f32.mrf.mxu1 }
 0x38f   : > { %v3192_v23 = vadd.f32 %v3156_v21, %v6450_v55 }
 0x391   : > { %v2960_v5 = vpop.f32.mrf.mxu3 }
 0x392   : > { %v2981_v36 = vadd.f32 %v2960_v5, %v6386_v31  ;;  %v3258_v50 = vpop.f32.mrf.mxu2 }
 0x393   : > { %v3075_v32 = vpop.f32.mrf.mxu0  ;;  %v3294_v33 = vadd.f32 %v3258_v50, %v3192_v23 }
 0x394   : > { %v6539_v14 = vadd.f32 %v3072_v2, %v2981_v36 }
 0x396   : > { %4568 = vmatmul.msk.bf16.gmra.mxu3 %vm2524_vm10, %v3317_v60  ;;  %4600 = vmatmul.msk.bf16.gmra.mxu0 %vm2524_vm10, %v3426_v52  ;;  %v3159_v1 = vpop.f32.mrf.mxu1  ;;  %v6554_v60 = vld [vmem:[%s6868_s5] ss:$0 sm:$0xff] }
 0x397   : > { %v3193_v36 = vadd.f32 %v3159_v1, %v6457_v16 }
 0x399   : > { %v2963_v43 = vpop.f32.mrf.mxu3 }
 0x39a   : > { %v2982_v39 = vadd.f32 %v2963_v43, %v6400_v48  ;;  %v3190_v48 = vadd.f32 %v3151_v24, %v6428_v8  ;;  %v3191_v8 = vadd.f32 %v3154_v35, %v6435_v63 }
 0x39b   : > { %v3077_v19 = vpop.f32.mrf.mxu0 }
 0x39c   : > { %v6544_v9 = vadd.f32 %v3075_v32, %v2982_v39  ;;  %v3292_v10 = vadd.f32 %v3253_v45, %v3190_v48  ;;  %v3293_v53 = vadd.f32 %v3256_v49, %v3191_v8 }
 0x39e   : > { %v3161_v18 = vpop.f32.mrf.mxu1 }
 0x39f   : > { %v3194_v61 = vadd.f32 %v3161_v18, %v6462_v56 }
 0x3a1   : > { %v2965_v40 = vpop.f32.mrf.mxu3 }
 0x3a2   : > { %v2983_v37 = vadd.f32 %v2965_v40, %v6412_v58  ;;  %v3261_v58 = vpop.f32.mrf.mxu2 }
 0x3a3   : > { %v3472_v31 = vpop.f32.mrf.mxu0  ;;  %v3295_v43 = vadd.f32 %v3261_v58, %v3193_v36 }
 0x3a4   : > { %v6548_v47 = vadd.f32 %v3077_v19, %v2983_v37 }
 0x3a6   : > { %v3164_v6 = vpop.f32.mrf.mxu1 }
 0x3a7   : > { %v3195_v58 = vadd.f32 %v3164_v6, %v6469_v3 }
 0x3a9   : > { %v3363_v26 = vpop.f32.mrf.mxu3 }
 0x3aa   : > { %v3403_v38 = vadd.f32 %v3363_v26, %v3291_v54  ;;  %v3263_v0 = vpop.f32.mrf.mxu2 }
 0x3ab   : > { %v3474_v22 = vpop.f32.mrf.mxu0  ;;  %v3296_v16 = vadd.f32 %v3263_v0, %v3194_v61 }
 0x3ac   : > { %v3512_v4 = vadd.f32 %v3472_v31, %v3403_v38 }
 0x3ae   : > { %v3532_v29 = vmul.f32 %v6554_v60, %v3512_v4  ;;  %v3166_v39 = vpop.f32.mrf.mxu1 }
 0x3b0   : > { %v3552_v28 = vadd.f32 %v6560_v25, %v3532_v29 }
 0x3b1   : > { %v3365_v52 = vpop.f32.mrf.mxu3 }
 0x3b2   : > { %v3404_v44 = vadd.f32 %v3365_v52, %v3292_v10  ;;  %v3568_v62 = vmax.f32 %v3552_v28, 0.0  ;;  %v3266_v45 = vpop.f32.mrf.mxu2 }
 0x3b3   : > { %v3477_v11 = vpop.f32.mrf.mxu0 }
 0x3b4   : > { %v3513_v15 = vadd.f32 %v3474_v22, %v3404_v44  ;;  %v3297_v44 = vadd.f32 %v3266_v45, %v3195_v58 }
 0x3b6   : > { %v3533_v30 = vmul.f32 %v6554_v60, %v3513_v15  ;;  %v3169_v38 = vpop.f32.mrf.mxu1 }
 0x3b8   : > { %v3553_v27 = vadd.f32 %v6560_v25, %v3533_v30 }
 0x3b9   : > { %v3368_v12 = vpop.f32.mrf.mxu3 }
 0x3ba   : > { %v3569_v46 = vmax.f32 %v3553_v27, 0.0  ;;  %v3405_v51 = vadd.f32 %v3368_v12, %v3293_v53  ;;  %v3268_v54 = vpop.f32.mrf.mxu2  ;;  %v3196_v53 = vadd.f32 %v3166_v39, %v6486_v20 }
 0x3bb   : > { %v3479_v34 = vpop.f32.mrf.mxu0 }
 0x3bc   : > { %v3584_v57 = vpack.c.bf16 %v3569_v46, %v3568_v62  ;;  %v3514_v63 = vadd.f32 %v3477_v11, %v3405_v51  ;;  %v3298_v3 = vadd.f32 %v3268_v54, %v3196_v53 }
 0x3be   : > { %4633 = vmatmul.msk.bf16.vlgmr.msra.gmra.mxu1 %vm2524_vm10, %v3584_v57  ;;  %4641 = vmatmul.msk.bf16.vlgmr.msra.gmra.mxu2 %vm2524_vm10, %v3584_v57  ;;  %v3534_v2 = vmul.f32 %v6554_v60, %v3514_v63  ;;  %v3171_v27 = vpop.f32.mrf.mxu1  ;;  %v3197_v57 = vadd.f32 %v3169_v38, %v6493_v7 }
 0x3c0   : > { %v3554_v35 = vadd.f32 %v6560_v25, %v3534_v2 }
 0x3c1   : > { %v3370_v41 = vpop.f32.mrf.mxu3 }
 0x3c2   : > { %v3406_v24 = vadd.f32 %v3370_v41, %v3294_v33  ;;  %v3570_v21 = vmax.f32 %v3554_v35, 0.0  ;;  %v3271_v29 = vpop.f32.mrf.mxu2 }
 0x3c3   : > { %v3482_v5 = vpop.f32.mrf.mxu0  ;;  %v3299_v41 = vadd.f32 %v3271_v29, %v3197_v57 }
 0x3c4   : > { %v3515_v32 = vadd.f32 %v3479_v34, %v3406_v24 }
 0x3c6   : > { %v3535_v55 = vmul.f32 %v6554_v60, %v3515_v32  ;;  %v3174_v63 = vpop.f32.mrf.mxu1 }
 0x3c8   : > { %v3555_v49 = vadd.f32 %v6560_v25, %v3535_v55  ;;  %v3198_v55 = vadd.f32 %v3171_v27, %v6503_v13 }
 0x3c9   : > { %v3373_v19 = vpop.f32.mrf.mxu3 }
 0x3ca   : > { %v3571_v40 = vmax.f32 %v3555_v49, 0.0  ;;  %v3407_v37 = vadd.f32 %v3373_v19, %v3295_v43  ;;  %v3273_v62 = vpop.f32.mrf.mxu2 }
 0x3cb   : > { %v3484_v31 = vpop.f32.mrf.mxu0  ;;  %v3300_v7 = vadd.f32 %v3273_v62, %v3198_v55 }
 0x3cc   : > { %v3585_v50 = vpack.c.bf16 %v3571_v40, %v3570_v21  ;;  %v3516_v26 = vadd.f32 %v3482_v5, %v3407_v37 }
 0x3ce   : > { %4634 = vmatmul.msk.bf16.gmra.mxu1 %vm2524_vm10, %v3585_v50  ;;  %4642 = vmatmul.msk.bf16.gmra.mxu2 %vm2524_vm10, %v3585_v50  ;;  %v3536_v22 = vmul.f32 %v6554_v60, %v3516_v26  ;;  %v3176_v49 = vpop.f32.mrf.mxu1 }
 0x3d0   : > { %v3556_v52 = vadd.f32 %v6560_v25, %v3536_v22 }
 0x3d1   : > { %v3375_v1 = vpop.f32.mrf.mxu3 }
 0x3d2   : > { %v3408_v48 = vadd.f32 %v3375_v1, %v3296_v16  ;;  %v3572_v18 = vmax.f32 %v3556_v52, 0.0  ;;  %v3276_v32 = vpop.f32.mrf.mxu2 }
 0x3d3   : > { %v3487_v4 = vpop.f32.mrf.mxu0 }
 0x3d4   : > { %v3517_v10 = vadd.f32 %v3484_v31, %v3408_v48  ;;  %v3199_v31 = vadd.f32 %v3174_v63, %v6514_v17 }
 0x3d6   : > { %v3537_v56 = vmul.f32 %v6554_v60, %v3517_v10  ;;  %v3301_v26 = vadd.f32 %v3276_v32, %v3199_v31  ;;  %v3179_v38 = vpop.f32.mrf.mxu1  ;;  %v3200_v10 = vadd.f32 %v3176_v49, %v6529_v42 }
 0x3d8   : > { %v3557_v11 = vadd.f32 %v6560_v25, %v3537_v56 }
 0x3d9   : > { %v3378_v8 = vpop.f32.mrf.mxu3 }
 0x3da   : > { %v3573_v15 = vmax.f32 %v3557_v11, 0.0  ;;  %v3409_v28 = vadd.f32 %v3378_v8, %v3297_v44  ;;  %v3278_v50 = vpop.f32.mrf.mxu2 }
 0x3db   : > { %v3489_v30 = vpop.f32.mrf.mxu0  ;;  %v3302_v29 = vadd.f32 %v3278_v50, %v3200_v10 }
 0x3dc   : > { %v3586_v0 = vpack.c.bf16 %v3573_v15, %v3572_v18  ;;  %v3518_v12 = vadd.f32 %v3487_v4, %v3409_v28  ;;  %v3201_v18 = vadd.f32 %v3179_v38, %v6536_v59 }
 0x3de   : > { %4635 = vmatmul.msk.bf16.gmra.mxu1 %vm2524_vm10, %v3586_v0  ;;  %4643 = vmatmul.msk.bf16.gmra.mxu2 %vm2524_vm10, %v3586_v0  ;;  %v3538_v51 = vmul.f32 %v6554_v60, %v3518_v12  ;;  %v3181_v15 = vpop.f32.mrf.mxu1 }
 0x3e0   : > { %v3558_v20 = vadd.f32 %v6560_v25, %v3538_v51 }
 0x3e1   : > { %v3380_v46 = vpop.f32.mrf.mxu3 }
 0x3e2   : > { %v3410_v34 = vadd.f32 %v3380_v46, %v3298_v3  ;;  %v3574_v45 = vmax.f32 %v3558_v20, 0.0  ;;  %v3281_v17 = vpop.f32.mrf.mxu2 }
 0x3e3   : > { %v3492_v23 = vpop.f32.mrf.mxu0  ;;  %v3303_v27 = vadd.f32 %v3281_v17, %v3201_v18 }
 0x3e4   : > { %v3519_v6 = vadd.f32 %v3489_v30, %v3410_v34  ;;  %v3202_v34 = vadd.f32 %v3181_v15, %v6539_v14 }
 0x3e6   : > { %v3539_v33 = vmul.f32 %v6554_v60, %v3519_v6  ;;  %v3184_v57 = vpop.f32.mrf.mxu1 }
 0x3e8   : > { %v3559_v2 = vadd.f32 %v6560_v25, %v3539_v33 }
 0x3e9   : > { %v3383_v24 = vpop.f32.mrf.mxu3 }
 0x3ea   : > { %v3575_v5 = vmax.f32 %v3559_v2, 0.0  ;;  %v3411_v36 = vadd.f32 %v3383_v24, %v3299_v41  ;;  %v3283_v12 = vpop.f32.mrf.mxu2  ;;  %v3203_v24 = vadd.f32 %v3184_v57, %v6544_v9  ;;  %v4656_v57 = vld [vmem:[%s6625_s28 + $0x58] sm:$0x3] }
 0x3eb   : > { %v3494_v35 = vpop.f32.mrf.mxu0  ;;  %v3304_v63 = vadd.f32 %v3283_v12, %v3202_v34 }
 0x3ec   : > { %v3587_v43 = vpack.c.bf16 %v3575_v5, %v3574_v45  ;;  %v3520_v39 = vadd.f32 %v3492_v23, %v3411_v36 }
 0x3ee   : > { %4636 = vmatmul.msk.bf16.gmra.mxu1 %vm2524_vm10, %v3587_v43  ;;  %4644 = vmatmul.msk.bf16.gmra.mxu2 %vm2524_vm10, %v3587_v43  ;;  %v3540_v21 = vmul.f32 %v6554_v60, %v3520_v39  ;;  %v3186_v32 = vpop.f32.mrf.mxu1 }
 0x3f0   : > { %v3560_v54 = vadd.f32 %v6560_v25, %v3540_v21 }
 0x3f1   : > { %v3385_v19 = vpop.f32.mrf.mxu3 }
 0x3f2   : > { %v3412_v40 = vadd.f32 %v3385_v19, %v3300_v7  ;;  %v3576_v22 = vmax.f32 %v3560_v54, 0.0  ;;  %v3286_v2 = vpop.f32.mrf.mxu2  ;;  %v3204_v19 = vadd.f32 %v3186_v32, %v6548_v47 }
 0x3f3   : > { %v3497_v37 = vpop.f32.mrf.mxu0  ;;  %v3305_v36 = vadd.f32 %v3286_v2, %v3203_v24 }
 0x3f4   : > { %v3521_v61 = vadd.f32 %v3494_v35, %v3412_v40 }
 0x3f6   : > { %v3541_v13 = vmul.f32 %v6554_v60, %v3521_v61 }
 0x3f8   : > { %v3561_v16 = vadd.f32 %v6560_v25, %v3541_v13 }
 0x3f9   : > { %v3388_v1 = vpop.f32.mrf.mxu3 }
 0x3fa   : > { %v3577_v48 = vmax.f32 %v3561_v16, 0.0  ;;  %v3413_v4 = vadd.f32 %v3388_v1, %v3301_v26  ;;  %v3288_v40 = vpop.f32.mrf.mxu2 }
 0x3fb   : > { %v3499_v58 = vpop.f32.mrf.mxu0  ;;  %v3306_v9 = vadd.f32 %v3288_v40, %v3204_v19 }
 0x3fc   : > { %v3588_v52 = vpack.c.bf16 %v3577_v48, %v3576_v22  ;;  %v3522_v56 = vadd.f32 %v3497_v37, %v3413_v4  ;;  %v4653_v48 = vld [vmem:[%s6625_s28 + $0x40] sm:$0xff] }
 0x3fd   : > { %v4012_v4 = vld [vmem:[%s6872_s9] sm:$0x3] }
 0x3fe   : > { %4637 = vmatmul.msk.bf16.gmra.mxu1 %vm2524_vm10, %v3588_v52  ;;  %4645 = vmatmul.msk.bf16.gmra.mxu2 %vm2524_vm10, %v3588_v52  ;;  %v3542_v11 = vmul.f32 %v6554_v60, %v3522_v56  ;;  %v3863_v52 = vrot.slane %v4653_v48, 1  ;;  %v6637_v56 = vperm.slane %v4012_v4, 0 }
 0x400   : > { %v3562_v53 = vadd.f32 %v6560_v25, %v3542_v11  ;;  %v4654_v11 = vld [vmem:[%s6625_s28 + $0x48] sm:$0xff] }
 0x401   : > { %v3390_v44 = vpop.f32.mrf.mxu3 }
 0x402   : > { %v3414_v8 = vadd.f32 %v3390_v44, %v3302_v29  ;;  %v3578_v62 = vmax.f32 %v3562_v53, 0.0  ;;  %v4652_v44 = vld [vmem:[%s6625_s28 + $0x38] sm:$0xff]  ;;  %v3866_v53 = vrot.slane %v4654_v11, 1 }
 0x403   : > { %v3502_v30 = vpop.f32.mrf.mxu0 }
 0x404   : > { %v3523_v28 = vadd.f32 %v3499_v58, %v3414_v8 }
 0x406   : > { %v3543_v42 = vmul.f32 %v6554_v60, %v3523_v28  ;;  %v4655_v28 = vld [vmem:[%s6625_s28 + $0x50] sm:$0x3] }
 0x407   : > { %v3868_v12 = vrot.slane %v4655_v28, 1 }
 0x408   : > { %v3563_v0 = vadd.f32 %v6560_v25, %v3543_v42 }
 0x409   : > { %v3393_v3 = vpop.f32.mrf.mxu3 }
 0x40a   : > { %v3579_v46 = vmax.f32 %v3563_v0, 0.0  ;;  %v3415_v51 = vadd.f32 %v3393_v3, %v3303_v27  ;;  %v6647_v27 = vperm.slane %v4012_v4, 1 }
 0x40b   : > { %v3504_v6 = vpop.f32.mrf.mxu0 }
 0x40c   : > { %v3589_v23 = vpack.c.bf16 %v3579_v46, %v3578_v62  ;;  %v3524_v59 = vadd.f32 %v3502_v30, %v3415_v51  ;;  %v3865_v30 = vrot.slane %v4652_v44, 1 }
 0x40e   : > { %4638 = vmatmul.msk.bf16.gmra.mxu1 %vm2524_vm10, %v3589_v23  ;;  %4646 = vmatmul.msk.bf16.gmra.mxu2 %vm2524_vm10, %v3589_v23  ;;  %v3544_v33 = vmul.f32 %v6554_v60, %v3524_v59  ;;  %v3867_v46 = vsel %vm2426_vm8, %v3865_v30, %v3866_v53  ;;  %v3869_v59 = vsel %vm2426_vm8, %v3863_v52, %v3868_v12 }
 0x410   : > { %v3564_v5 = vadd.f32 %v6560_v25, %v3544_v33  ;;  %v4659_v33 = vld [vmem:[%s6625_s28 + $0x70] sm:$0xff] }
 0x411   : > { %v3395_v20 = vpop.f32.mrf.mxu3 }
 0x412   : > { %v3416_v41 = vadd.f32 %v3395_v20, %v3304_v63  ;;  %v3580_v39 = vmax.f32 %v3564_v5, 0.0  ;;  %v4657_v20 = vld [vmem:[%s6625_s28 + $0x60] sm:$0xff] }
 0x413   : > { %v3507_v55 = vpop.f32.mrf.mxu0  ;;  %v3872_v5 = vrot.slane %v4657_v20, 1 }
 0x414   : > { %v3525_v45 = vadd.f32 %v3504_v6, %v3416_v41  ;;  %v3870_v41 = vrot.slane %v4656_v57, 1 }
 0x416   : > { %v3545_v14 = vmul.f32 %v6554_v60, %v3525_v45 }
 0x418   : > { %v3565_v35 = vadd.f32 %v6560_v25, %v3545_v14  ;;  %v3873_v14 = vrot.slane %v4659_v33, 1 }
 0x419   : > { %v3398_v43 = vpop.f32.mrf.mxu3 }
 0x41a   : > { %v3581_v7 = vmax.f32 %v3565_v35, 0.0  ;;  %v3417_v49 = vadd.f32 %v3398_v43, %v3305_v36  ;;  %v3871_v35 = vsel %vm2426_vm8, %v3866_v53, %v3870_v41  ;;  %v3874_v19 = vsel %vm2426_vm8, %v3872_v5, %v3873_v14 }
 0x41b   : > { %v3509_v54 = vpop.f32.mrf.mxu0 }
 0x41c   : > { %v3590_v21 = vpack.c.bf16 %v3581_v7, %v3580_v39  ;;  %v3526_v37 = vadd.f32 %v3507_v55, %v3417_v49  ;;  %v4658_v7 = vld [vmem:[%s6625_s28 + $0x68] sm:$0xff]  ;;  %v4660_v49 = vld [vmem:[%s6625_s28 + $0x78] sm:$0xff] }
 0x41e   : > { %4639 = vmatmul.msk.bf16.gmra.mxu1 %vm2524_vm10, %v3590_v21  ;;  %4647 = vmatmul.msk.bf16.gmra.mxu2 %vm2524_vm10, %v3590_v21  ;;  %v3546_v61 = vmul.f32 %v6554_v60, %v3526_v37  ;;  %v4661_v37 = vld [vmem:[%s6625_s28 + $0x80] sm:$0x3] }
 0x420   : > { %v3566_v26 = vadd.f32 %v6560_v25, %v3546_v61 }
 0x421   : > { %v3400_v31 = vpop.f32.mrf.mxu3 }
 0x422   : > { %v3418_v50 = vadd.f32 %v3400_v31, %v3306_v9  ;;  %v3582_v1 = vmax.f32 %v3566_v26, 0.0  ;;  %v3875_v9 = vrot.slane %v4658_v7, 1  ;;  %v3876_v31 = vrot.slane %v4660_v49, 1 }
 0x424   : > { %v3527_v13 = vadd.f32 %v3509_v54, %v3418_v50 }
 0x426   : > { %v3547_v47 = vmul.f32 %v6554_v60, %v3527_v13  ;;  %v3974_v60 = vld [vmem:[%s6871_s8] sm:$0x3]  ;;  %v3878_v13 = vrot.slane %v4661_v37, 1 }
 0x427   : > { %v6635_v58 = vperm.slane %v3974_v60, 0  ;;  %v6644_v15 = vperm.slane %v3974_v60, 1  ;;  %v4662_v60 = vld [vmem:[%s6625_s28 + $0x88] sm:$0x3] }
 0x428   : > { %v3567_v16 = vadd.f32 %v6560_v25, %v3547_v47  ;;  %v4651_v25 = vld [vmem:[%s6625_s28 + $0x30] sm:$0xff] }
 0x429   : > { %v3862_v10 = vrot.slane %v4651_v25, 1  ;;  %v3879_v25 = vsel %vm2426_vm8, %v3873_v14, %v3878_v13 }
 0x42a   : > { %v3583_v38 = vmax.f32 %v3567_v16, 0.0  ;;  %v3877_v16 = vsel %vm2426_vm8, %v3875_v9, %v3876_v31 }
 0x42b   : > { %v3864_v8 = vsel %vm2426_vm8, %v3862_v10, %v3863_v52  ;;  %v4663_v10 = vld [vmem:[%s6625_s28 + $0x90] sm:$0xff]  ;;  %v4665_v52 = vld [vmem:[%s6625_s28 + $0xa0] sm:$0xff] }
 0x42c   : > { %v3591_v22 = vpack.c.bf16 %v3583_v38, %v3582_v1 }
 0x42e   : > { %4640 = vmatmul.msk.bf16.gmra.mxu1 %vm2524_vm10, %v3591_v22  ;;  %4648 = vmatmul.msk.bf16.gmra.mxu2 %vm2524_vm10, %v3591_v22 }
 0x43b   : > { %v3673_v17 = vpop.f32.mrf.mxu1 }
 0x43c   : > { %v3980_v29 = vmul.f32 %v6635_v58, %v3673_v17  ;;  %v3880_v17 = vrot.slane %v4662_v60, 1 }
 0x43e   : > { %v4018_v18 = vadd.f32 %v6637_v56, %v3980_v29  ;;  %v3881_v53 = vsel %vm2426_vm8, %v3876_v31, %v3880_v17 }
 0x440   : > { %v4050_v42 = vadd.f32 %v4018_v18, %v3864_v8  ;;  %v3882_v8 = vrot.slane %v4663_v10, 1  ;;  %v3883_v18 = vrot.slane %v4665_v52, 1 }
 0x441   : > { %v3722_v0 = vpop.f32.mrf.mxu2 }
 0x442   : > { %v4082_v3 = vmax.f32 %v4050_v42, 0.0  ;;  %v3981_v62 = vmul.f32 %v6644_v15, %v3722_v0 }
 0x443   : > { %v3675_v51 = vpop.f32.mrf.mxu1 }
 0x444   : > { %4114 = vst [vmem:[%s5111_s25] sm:$0xff] %v4082_v3  ;;  %v4019_v34 = vadd.f32 %v6647_v27, %v3981_v62  ;;  %v3982_v23 = vmul.f32 %v6635_v58, %v3675_v51  ;;  %v4664_v3 = vld [vmem:[%s6625_s28 + $0x98] sm:$0xff]  ;;  %v4666_v62 = vld [vmem:[%s6625_s28 + $0xa8] sm:$0xff] }
 0x445   : > { %v3885_v57 = vrot.slane %v4664_v3, 1 }
 0x446   : > { %v4051_v6 = vadd.f32 %v4019_v34, %v3867_v46  ;;  %v4020_v63 = vadd.f32 %v6637_v56, %v3982_v23  ;;  %v3884_v46 = vsel %vm2426_vm8, %v3882_v8, %v3883_v18  ;;  %v4667_v23 = vld [vmem:[%s6625_s28 + $0xb0] sm:$0x3] }
 0x447   : > { %v3888_v33 = vrot.slane %v4667_v23, 1 }
 0x448   : > { %v4083_v2 = vmax.f32 %v4051_v6, 0.0  ;;  %v4052_v24 = vadd.f32 %v4020_v63, %v3869_v59  ;;  %v3886_v59 = vrot.slane %v4666_v62, 1 }
 0x449   : > { %v3724_v45 = vpop.f32.mrf.mxu2 }
 0x44a   : > { %4115 = vst [vmem:[%s5111_s25 + $0x8] sm:$0xff] %v4083_v2  ;;  %v4084_v36 = vmax.f32 %v4052_v24, 0.0  ;;  %v3983_v32 = vmul.f32 %v6644_v15, %v3724_v45  ;;  %v3887_v24 = vsel %vm2426_vm8, %v3885_v57, %v3886_v59 }
 0x44b   : > { %v3678_v55 = vpop.f32.mrf.mxu1 }
 0x44c   : > { %4116 = vst [vmem:[%s5111_s25 + $0x10] sm:$0xff] %v4084_v36  ;;  %v4021_v43 = vadd.f32 %v6647_v27, %v3983_v32  ;;  %v3984_v39 = vmul.f32 %v6635_v58, %v3678_v55  ;;  %v4668_v36 = vld [vmem:[%s6625_s28 + $0xb8] sm:$0x3]  ;;  %v3889_v32 = vsel %vm2426_vm8, %v3883_v18, %v3888_v33 }
 0x44d   : > { %v3890_v7 = vrot.slane %v4668_v36, 1 }
 0x44e   : > { %v4053_v21 = vadd.f32 %v4021_v43, %v3871_v35  ;;  %v4022_v40 = vadd.f32 %v6637_v56, %v3984_v39  ;;  %v4669_v43 = vld [vmem:[%s6625_s28 + $0xc0] sm:$0xff]  ;;  %v4671_v39 = vld [vmem:[%s6625_s28 + $0xd0] sm:$0xff] }
 0x44f   : > { %v3893_v37 = vrot.slane %v4671_v39, 1 }
 0x450   : > { %v4085_v61 = vmax.f32 %v4053_v21, 0.0  ;;  %v4054_v50 = vadd.f32 %v4022_v40, %v3874_v19  ;;  %v3892_v40 = vrot.slane %v4669_v43, 1 }
 0x451   : > { %v3727_v54 = vpop.f32.mrf.mxu2 }
 0x452   : > { %4117 = vst [vmem:[%s5111_s25 + $0x18] sm:$0xff] %v4085_v61  ;;  %v4086_v26 = vmax.f32 %v4054_v50, 0.0  ;;  %v3985_v47 = vmul.f32 %v6644_v15, %v3727_v54  ;;  %v3891_v61 = vsel %vm2426_vm8, %v3886_v59, %v3890_v7 }
 0x453   : > { %v3680_v1 = vpop.f32.mrf.mxu1 }
 0x454   : > { %4118 = vst [vmem:[%s5111_s25 + $0x20] sm:$0xff] %v4086_v26  ;;  %v4023_v38 = vadd.f32 %v6647_v27, %v3985_v47  ;;  %v3986_v22 = vmul.f32 %v6635_v58, %v3680_v1  ;;  %v4670_v26 = vld [vmem:[%s6625_s28 + $0xc8] sm:$0xff]  ;;  %v4672_v47 = vld [vmem:[%s6625_s28 + $0xd8] sm:$0xff] }
 0x455   : > { %v3895_v60 = vrot.slane %v4670_v26, 1 }
 0x456   : > { %v4055_v48 = vadd.f32 %v4023_v38, %v3877_v16  ;;  %v4024_v4 = vadd.f32 %v6637_v56, %v3986_v22  ;;  %v3894_v16 = vsel %vm2426_vm8, %v3892_v40, %v3893_v37  ;;  %v4673_v22 = vld [vmem:[%s6625_s28 + $0xe0] sm:$0x3] }
 0x457   : > { %v3898_v52 = vrot.slane %v4673_v22, 1 }
 0x458   : > { %v4087_v29 = vmax.f32 %v4055_v48, 0.0  ;;  %v4056_v44 = vadd.f32 %v4024_v4, %v3879_v25  ;;  %v3896_v25 = vrot.slane %v4672_v47, 1 }
 0x459   : > { %v3729_v11 = vpop.f32.mrf.mxu2 }
 0x45a   : > { %4119 = vst [vmem:[%s5111_s25 + $0x28] sm:$0xff] %v4087_v29  ;;  %v4088_v28 = vmax.f32 %v4056_v44, 0.0  ;;  %v3987_v30 = vmul.f32 %v6644_v15, %v3729_v11  ;;  %v3897_v44 = vsel %vm2426_vm8, %v3895_v60, %v3896_v25 }
 0x45b   : > { %v3683_v42 = vpop.f32.mrf.mxu1 }
 0x45c   : > { %4120 = vst [vmem:[%s5111_s25 + $0x30] sm:$0xff] %v4088_v28  ;;  %v4025_v0 = vadd.f32 %v6647_v27, %v3987_v30  ;;  %v3988_v12 = vmul.f32 %v6635_v58, %v3683_v42  ;;  %v4674_v28 = vld [vmem:[%s6625_s28 + $0xe8] sm:$0x3]  ;;  %v3899_v30 = vsel %vm2426_vm8, %v3893_v37, %v3898_v52 }
 0x45d   : > { %v3900_v3 = vrot.slane %v4674_v28, 1 }
 0x45e   : > { %v4057_v51 = vadd.f32 %v4025_v0, %v3881_v53  ;;  %v4026_v34 = vadd.f32 %v6637_v56, %v3988_v12  ;;  %v4675_v0 = vld [vmem:[%s6625_s28 + $0xf0] sm:$0xff]  ;;  %v4677_v12 = vld [vmem:[%s6625_s28 + $0x100] sm:$0xff] }
 0x45f   : > { %v3903_v23 = vrot.slane %v4677_v12, 1 }
 0x460   : > { %v4089_v6 = vmax.f32 %v4057_v51, 0.0  ;;  %v4058_v63 = vadd.f32 %v4026_v34, %v3884_v46  ;;  %v3902_v34 = vrot.slane %v4675_v0, 1 }
 0x461   : > { %v3732_v20 = vpop.f32.mrf.mxu2 }
 0x462   : > { %4121 = vst [vmem:[%s5111_s25 + $0x38] sm:$0xff] %v4089_v6  ;;  %v4090_v41 = vmax.f32 %v4058_v63, 0.0  ;;  %v3989_v2 = vmul.f32 %v6644_v15, %v3732_v20  ;;  %v3901_v6 = vsel %vm2426_vm8, %v3896_v25, %v3900_v3 }
 0x463   : > { %v3685_v45 = vpop.f32.mrf.mxu1 }
 0x464   : > { %4122 = vst [vmem:[%s5111_s25 + $0x40] sm:$0xff] %v4090_v41  ;;  %v4027_v5 = vadd.f32 %v6647_v27, %v3989_v2  ;;  %v3990_v14 = vmul.f32 %v6635_v58, %v3685_v45  ;;  %v4676_v41 = vld [vmem:[%s6625_s28 + $0xf8] sm:$0xff]  ;;  %v4678_v2 = vld [vmem:[%s6625_s28 + $0x108] sm:$0xff] }
 0x465   : > { %v3905_v36 = vrot.slane %v4676_v41, 1 }
 0x466   : > { %v4059_v35 = vadd.f32 %v4027_v5, %v3887_v24  ;;  %v4028_v55 = vadd.f32 %v6637_v56, %v3990_v14  ;;  %v3904_v24 = vsel %vm2426_vm8, %v3902_v34, %v3903_v23  ;;  %v4679_v14 = vld [vmem:[%s6625_s28 + $0x110] sm:$0x3] }
 0x467   : > { %v3908_v39 = vrot.slane %v4679_v14, 1 }
 0x468   : > { %v4091_v49 = vmax.f32 %v4059_v35, 0.0  ;;  %v4060_v19 = vadd.f32 %v4028_v55, %v3889_v32  ;;  %v3906_v32 = vrot.slane %v4678_v2, 1 }
 0x469   : > { %v3734_v21 = vpop.f32.mrf.mxu2 }
 0x46a   : > { %4123 = vst [vmem:[%s5111_s25 + $0x48] sm:$0xff] %v4091_v49  ;;  %v4092_v9 = vmax.f32 %v4060_v19, 0.0  ;;  %v3991_v31 = vmul.f32 %v6644_v15, %v3734_v21  ;;  %v3907_v19 = vsel %vm2426_vm8, %v3905_v36, %v3906_v32 }
 0x46b   : > { %v3688_v50 = vpop.f32.mrf.mxu1 }
 0x46c   : > { %4124 = vst [vmem:[%s5111_s25 + $0x50] sm:$0xff] %v4092_v9  ;;  %v4029_v54 = vadd.f32 %v6647_v27, %v3991_v31  ;;  %v3992_v13 = vmul.f32 %v6635_v58, %v3688_v50  ;;  %v4680_v9 = vld [vmem:[%s6625_s28 + $0x118] sm:$0x3]  ;;  %v3909_v31 = vsel %vm2426_vm8, %v3903_v23, %v3908_v39 }
 0x46d   : > { %v3910_v26 = vrot.slane %v4680_v9, 1 }
 0x46e   : > { %v4061_v1 = vadd.f32 %v4029_v54, %v3891_v61  ;;  %v4030_v38 = vadd.f32 %v6637_v56, %v3992_v13  ;;  %v4681_v54 = vld [vmem:[%s6625_s28 + $0x120] sm:$0xff]  ;;  %v4683_v13 = vld [vmem:[%s6625_s28 + $0x130] sm:$0xff] }
 0x46f   : > { %v3913_v22 = vrot.slane %v4683_v13, 1 }
 0x470   : > { %v4093_v48 = vmax.f32 %v4061_v1, 0.0  ;;  %v4062_v4 = vadd.f32 %v4030_v38, %v3894_v16  ;;  %v3912_v38 = vrot.slane %v4681_v54, 1 }
 0x471   : > { %v3737_v10 = vpop.f32.mrf.mxu2 }
 0x472   : > { %4125 = vst [vmem:[%s5111_s25 + $0x58] sm:$0xff] %v4093_v48  ;;  %v4094_v17 = vmax.f32 %v4062_v4, 0.0  ;;  %v3993_v29 = vmul.f32 %v6644_v15, %v3737_v10  ;;  %v3911_v48 = vsel %vm2426_vm8, %v3906_v32, %v3910_v26 }
 0x473   : > { %v3690_v11 = vpop.f32.mrf.mxu1 }
 0x474   : > { %4126 = vst [vmem:[%s5111_s25 + $0x60] sm:$0xff] %v4094_v17  ;;  %v4031_v8 = vadd.f32 %v6647_v27, %v3993_v29  ;;  %v3994_v18 = vmul.f32 %v6635_v58, %v3690_v11  ;;  %v4682_v17 = vld [vmem:[%s6625_s28 + $0x128] sm:$0xff]  ;;  %v4684_v29 = vld [vmem:[%s6625_s28 + $0x138] sm:$0xff] }
 0x475   : > { %v3915_v28 = vrot.slane %v4682_v17, 1 }
 0x476   : > { %v4063_v53 = vadd.f32 %v4031_v8, %v3897_v44  ;;  %v4032_v42 = vadd.f32 %v6637_v56, %v3994_v18  ;;  %v3914_v44 = vsel %vm2426_vm8, %v3912_v38, %v3913_v22  ;;  %v4685_v18 = vld [vmem:[%s6625_s28 + $0x140] sm:$0x3] }
 0x477   : > { %v3918_v12 = vrot.slane %v4685_v18, 1 }
 0x478   : > { %v4095_v62 = vmax.f32 %v4063_v53, 0.0  ;;  %v4064_v46 = vadd.f32 %v4032_v42, %v3899_v30  ;;  %v3916_v30 = vrot.slane %v4684_v29, 1 }
 0x479   : > { %v3739_v51 = vpop.f32.mrf.mxu2 }
 0x47a   : > { %4127 = vst [vmem:[%s5111_s25 + $0x68] sm:$0xff] %v4095_v62  ;;  %v4096_v57 = vmax.f32 %v4064_v46, 0.0  ;;  %v3995_v59 = vmul.f32 %v6644_v15, %v3739_v51  ;;  %v3917_v46 = vsel %vm2426_vm8, %v3915_v28, %v3916_v30 }
 0x47b   : > { %v3693_v63 = vpop.f32.mrf.mxu1 }
 0x47c   : > { %4128 = vst [vmem:[%s5111_s25 + $0x70] sm:$0xff] %v4096_v57  ;;  %v4033_v20 = vadd.f32 %v6647_v27, %v3995_v59  ;;  %v3996_v33 = vmul.f32 %v6635_v58, %v3693_v63  ;;  %v4686_v57 = vld [vmem:[%s6625_s28 + $0x148] sm:$0x3]  ;;  %v3919_v59 = vsel %vm2426_vm8, %v3913_v22, %v3918_v12 }
 0x47d   : > { %v3920_v41 = vrot.slane %v4686_v57, 1 }
 0x47e   : > { %v4065_v45 = vadd.f32 %v4033_v20, %v3901_v6  ;;  %v4034_v5 = vadd.f32 %v6637_v56, %v3996_v33  ;;  %v4687_v20 = vld [vmem:[%s6625_s28 + $0x150] sm:$0xff]  ;;  %v4689_v33 = vld [vmem:[%s6625_s28 + $0x160] sm:$0xff] }
 0x47f   : > { %v3923_v14 = vrot.slane %v4689_v33, 1 }
 0x480   : > { %v4097_v35 = vmax.f32 %v4065_v45, 0.0  ;;  %v4066_v55 = vadd.f32 %v4034_v5, %v3904_v24  ;;  %v3922_v5 = vrot.slane %v4687_v20, 1 }
 0x481   : > { %v3742_v43 = vpop.f32.mrf.mxu2 }
 0x482   : > { %4129 = vst [vmem:[%s5111_s25 + $0x78] sm:$0xff] %v4097_v35  ;;  %v4098_v7 = vmax.f32 %v4066_v55, 0.0  ;;  %v3997_v49 = vmul.f32 %v6644_v15, %v3742_v43  ;;  %v3921_v35 = vsel %vm2426_vm8, %v3916_v30, %v3920_v41 }
 0x483   : > { %v3695_v21 = vpop.f32.mrf.mxu1 }
 0x484   : > { %4130 = vst [vmem:[%s5111_s25 + $0x80] sm:$0xff] %v4098_v7  ;;  %v4035_v40 = vadd.f32 %v6647_v27, %v3997_v49  ;;  %v3998_v37 = vmul.f32 %v6635_v58, %v3695_v21  ;;  %v4688_v7 = vld [vmem:[%s6625_s28 + $0x158] sm:$0xff]  ;;  %v4690_v49 = vld [vmem:[%s6625_s28 + $0x168] sm:$0xff] }
 0x485   : > { %v3925_v9 = vrot.slane %v4688_v7, 1 }
 0x486   : > { %v4067_v61 = vadd.f32 %v4035_v40, %v3907_v19  ;;  %v4036_v50 = vadd.f32 %v6637_v56, %v3998_v37  ;;  %v3924_v19 = vsel %vm2426_vm8, %v3922_v5, %v3923_v14  ;;  %v4691_v37 = vld [vmem:[%s6625_s28 + $0x170] sm:$0x3] }
 0x487   : > { %v3928_v13 = vrot.slane %v4691_v37, 1 }
 0x488   : > { %v4099_v47 = vmax.f32 %v4067_v61, 0.0  ;;  %v4068_v16 = vadd.f32 %v4036_v50, %v3909_v31  ;;  %v3926_v31 = vrot.slane %v4690_v49, 1 }
 0x489   : > { %v3744_v1 = vpop.f32.mrf.mxu2 }
 0x48a   : > { %4131 = vst [vmem:[%s5111_s25 + $0x88] sm:$0xff] %v4099_v47  ;;  %v4100_v60 = vmax.f32 %v4068_v16, 0.0  ;;  %v3999_v25 = vmul.f32 %v6644_v15, %v3744_v1  ;;  %v3927_v16 = vsel %vm2426_vm8, %v3925_v9, %v3926_v31 }
 0x48b   : > { %v3698_v4 = vpop.f32.mrf.mxu1 }
 0x48c   : > { %4132 = vst [vmem:[%s5111_s25 + $0x90] sm:$0xff] %v4100_v60  ;;  %v4037_v10 = vadd.f32 %v6647_v27, %v3999_v25  ;;  %v4000_v52 = vmul.f32 %v6635_v58, %v3698_v4  ;;  %v4692_v60 = vld [vmem:[%s6625_s28 + $0x178] sm:$0x3]  ;;  %v3929_v25 = vsel %vm2426_vm8, %v3923_v14, %v3928_v13 }
 0x48d   : > { %v3930_v17 = vrot.slane %v4692_v60, 1 }
 0x48e   : > { %v4069_v11 = vadd.f32 %v4037_v10, %v3911_v48  ;;  %v4038_v8 = vadd.f32 %v6637_v56, %v4000_v52  ;;  %v4693_v10 = vld [vmem:[%s6625_s28 + $0x180] sm:$0xff]  ;;  %v4695_v52 = vld [vmem:[%s6625_s28 + $0x190] sm:$0xff] }
 0x48f   : > { %v3933_v18 = vrot.slane %v4695_v52, 1 }
 0x490   : > { %v4101_v53 = vmax.f32 %v4069_v11, 0.0  ;;  %v4070_v42 = vadd.f32 %v4038_v8, %v3914_v44  ;;  %v3932_v8 = vrot.slane %v4693_v10, 1 }
 0x491   : > { %v3747_v0 = vpop.f32.mrf.mxu2 }
 0x492   : > { %4133 = vst [vmem:[%s5111_s25 + $0x98] sm:$0xff] %v4101_v53  ;;  %v4102_v3 = vmax.f32 %v4070_v42, 0.0  ;;  %v4001_v62 = vmul.f32 %v6644_v15, %v3747_v0  ;;  %v3931_v53 = vsel %vm2426_vm8, %v3926_v31, %v3930_v17 }
 0x493   : > { %v3700_v51 = vpop.f32.mrf.mxu1 }
 0x494   : > { %4134 = vst [vmem:[%s5111_s25 + $0xa0] sm:$0xff] %v4102_v3  ;;  %v4039_v34 = vadd.f32 %v6647_v27, %v4001_v62  ;;  %v4002_v23 = vmul.f32 %v6635_v58, %v3700_v51  ;;  %v4694_v3 = vld [vmem:[%s6625_s28 + $0x188] sm:$0xff]  ;;  %v4696_v62 = vld [vmem:[%s6625_s28 + $0x198] sm:$0xff] }
 0x495   : > { %v3935_v57 = vrot.slane %v4694_v3, 1 }
 0x496   : > { %v4071_v6 = vadd.f32 %v4039_v34, %v3917_v46  ;;  %v4040_v63 = vadd.f32 %v6637_v56, %v4002_v23  ;;  %v3934_v46 = vsel %vm2426_vm8, %v3932_v8, %v3933_v18  ;;  %v4697_v23 = vld [vmem:[%s6625_s28 + $0x1a0] sm:$0x3] }
 0x497   : > { %v3938_v33 = vrot.slane %v4697_v23, 1 }
 0x498   : > { %v4103_v2 = vmax.f32 %v4071_v6, 0.0  ;;  %v4072_v24 = vadd.f32 %v4040_v63, %v3919_v59  ;;  %v3936_v59 = vrot.slane %v4696_v62, 1 }
 0x499   : > { %v3749_v45 = vpop.f32.mrf.mxu2 }
 0x49a   : > { %4135 = vst [vmem:[%s5111_s25 + $0xa8] sm:$0xff] %v4103_v2  ;;  %v4104_v36 = vmax.f32 %v4072_v24, 0.0  ;;  %v4003_v32 = vmul.f32 %v6644_v15, %v3749_v45  ;;  %v3937_v24 = vsel %vm2426_vm8, %v3935_v57, %v3936_v59 }
 0x49b   : > { %v3703_v55 = vpop.f32.mrf.mxu1 }
 0x49c   : > { %4136 = vst [vmem:[%s5111_s25 + $0xb0] sm:$0xff] %v4104_v36  ;;  %v4041_v43 = vadd.f32 %v6647_v27, %v4003_v32  ;;  %v4004_v39 = vmul.f32 %v6635_v58, %v3703_v55  ;;  %v4698_v36 = vld [vmem:[%s6625_s28 + $0x1a8] sm:$0x3]  ;;  %v3939_v32 = vsel %vm2426_vm8, %v3933_v18, %v3938_v33  ;;  %s6889_s28 = sand.u32 1, %s4946_s14  }
 0x49d   : > { %s4147_s0 = scalar_lea.sflag [#allocation4], %s6889_s28 }
 0x49e   : > { %v4073_v21 = vadd.f32 %v4041_v43, %v3921_v35  ;;  %v4042_v40 = vadd.f32 %v6637_v56, %v4004_v39  ;;  %v3940_v43 = vrot.slane %v4698_v36, 1 }
 0x4a0   : > { %v4105_v61 = vmax.f32 %v4073_v21, 0.0  ;;  %v4074_v50 = vadd.f32 %v4042_v40, %v3924_v19  ;;  %v3941_v21 = vsel %vm2426_vm8, %v3936_v59, %v3940_v43 }
 0x4a1   : > { %v3752_v54 = vpop.f32.mrf.mxu2 }
 0x4a2   : > { %4137 = vst [vmem:[%s5111_s25 + $0xb8] sm:$0xff] %v4105_v61  ;;  %v4106_v26 = vmax.f32 %v4074_v50, 0.0  ;;  %v4005_v47 = vmul.f32 %v6644_v15, %v3752_v54 }
 0x4a3   : > { %v3705_v1 = vpop.f32.mrf.mxu1 }
 0x4a4   : > { %4138 = vst [vmem:[%s5111_s25 + $0xc0] sm:$0xff] %v4106_v26  ;;  %v4043_v38 = vadd.f32 %v6647_v27, %v4005_v47  ;;  %v4006_v22 = vmul.f32 %v6635_v58, %v3705_v1 }
 0x4a6   : > { %v4075_v48 = vadd.f32 %v4043_v38, %v3927_v16  ;;  %v4044_v4 = vadd.f32 %v6637_v56, %v4006_v22 }
 0x4a8   : > { %v4107_v29 = vmax.f32 %v4075_v48, 0.0  ;;  %v4076_v44 = vadd.f32 %v4044_v4, %v3929_v25 }
 0x4a9   : > { %v3754_v11 = vpop.f32.mrf.mxu2 }
 0x4aa   : > { %4139 = vst [vmem:[%s5111_s25 + $0xc8] sm:$0xff] %v4107_v29  ;;  %v4108_v28 = vmax.f32 %v4076_v44, 0.0  ;;  %v4007_v30 = vmul.f32 %v6644_v15, %v3754_v11 }
 0x4ab   : > { %v3708_v42 = vpop.f32.mrf.mxu1 }
 0x4ac   : > { %4140 = vst [vmem:[%s5111_s25 + $0xd0] sm:$0xff] %v4108_v28  ;;  %v4045_v0 = vadd.f32 %v6647_v27, %v4007_v30  ;;  %v4008_v12 = vmul.f32 %v6635_v58, %v3708_v42 }
 0x4ae   : > { %v4077_v51 = vadd.f32 %v4045_v0, %v3931_v53  ;;  %v4046_v34 = vadd.f32 %v6637_v56, %v4008_v12 }
 0x4b0   : > { %v4109_v6 = vmax.f32 %v4077_v51, 0.0  ;;  %v4078_v63 = vadd.f32 %v4046_v34, %v3934_v46 }
 0x4b1   : > { %v3757_v20 = vpop.f32.mrf.mxu2 }
 0x4b2   : > { %4141 = vst [vmem:[%s5111_s25 + $0xd8] sm:$0xff] %v4109_v6  ;;  %v4110_v41 = vmax.f32 %v4078_v63, 0.0  ;;  %v4009_v2 = vmul.f32 %v6644_v15, %v3757_v20 }
 0x4b3   : > { %v3710_v45 = vpop.f32.mrf.mxu1 }
 0x4b4   : > { %4142 = vst [vmem:[%s5111_s25 + $0xe0] sm:$0xff] %v4110_v41  ;;  %v4047_v5 = vadd.f32 %v6647_v27, %v4009_v2  ;;  %v4010_v14 = vmul.f32 %v6635_v58, %v3710_v45 }
 0x4b6   : > { %v4079_v35 = vadd.f32 %v4047_v5, %v3937_v24  ;;  %v4048_v55 = vadd.f32 %v6637_v56, %v4010_v14 }
 0x4b8   : > { %v4111_v39 = vmax.f32 %v4079_v35, 0.0  ;;  %v4080_v7 = vadd.f32 %v4048_v55, %v3939_v32 }
 0x4b9   : > { %v3759_v49 = vpop.f32.mrf.mxu2 }
 0x4ba   : > { %4143 = vst [vmem:[%s5111_s25 + $0xe8] sm:$0xff] %v4111_v39  ;;  %v4112_v58 = vmax.f32 %v4080_v7, 0.0  ;;  %v4011_v19 = vmul.f32 %v6644_v15, %v3759_v49 }
 0x4bc   : > { %4144 = vst [vmem:[%s5111_s25 + $0xf0] sm:$0xff] %v4112_v58  ;;  %v4049_v56 = vadd.f32 %v6647_v27, %v4011_v19 }
 0x4be   : > { %v4081_v40 = vadd.f32 %v4049_v56, %v3941_v21 }
 0x4c0   : > { %v4113_v37 = vmax.f32 %v4081_v40, 0.0 }
 0x4c2   : > { %4145 = vst [vmem:[%s5111_s25 + $0xf8] sm:$0xff] %v4113_v37 }
 0x4c3   : > { %4903 = shalt.err (!%p4900_p7)
}
 0x4c4   : > { %s4973_s25 = smov 256   ;;  %s4974_s17 = smov 16  }
 0x4c5   : > { %4796 = dma.vmem_to_hbm [thread:$0]  (%p5081_p3), %s4163_s12, 4096, %s4165_s22, %s4147_s0, %s4973_s25, %s4973_s25, %s4974_s17  }
 0x4c6 PF: > { %p4802_p9 = scmp.ge.s32.totalorder %s4970_s20, 2  ;;  %s4179_s21 = sand.u32 1, %s4942_s13  }
 0x4c7   : > { %s4180_s28 = scalar_lea.sflag [#allocation4], %s4179_s21 }
 0x4c8   : > { %p4799_p10 = pnand %p4802_p9, %p5090_p8 }
 0x4ca   : > { %p4800_p11 = pneg %p4799_p10 }
 0x4cc   : > { %4937 = dma.done.wait (%p4800_p11), %s4180_s28, 4096  }
 0x4cd   : > { %4939 = vsyncadd (%p4800_p11), %s4180_s28, 4294963200  ;;  %s23_s20 = sadd.s32 1, %s4970_s20   ;;  %s6891_s16 = sld [smem:[#allocation6_spill]] }
 0x4ce   : > { %p20_p12 = scmp.ge.s32.totalorder %s23_s20, 6   ;;  %s6892_s18 = sld [smem:[#allocation7_spill]] }
 0x4cf   : > { %s6893_s26 = sld [smem:[#allocation8_spill]]  ;;  %s6894_s13 = smov %s4946_s14 }
 0x4d0   : > { %s6895_s14 = smov %s4950_s15  ;;  %s6896_s15 = smov %s5099_s11 }
 0x4d1   : > { %s6897_s17 = smov %s4966_s19  ;;  %22 = sbr.rel (!%p20_p12) target bundleno = 8 (0x8), region = 123 }
 0x4d5   : > { %s6898_s19 = smov %s6893_s26 }
 0x4d6   :  { %4186 = vsyncpa [#allocation4], 1 }
 0x4d7   :  { %4188 = vsyncpa [#allocation4 + $0x1], 1 }

</bundles_post_ra>
